<compile_context>
chip_gen: v6e
topology: v6e:2x2x1
jax: 0.10.0
libtpu: 0.0.40
codegen_flags: <defaults>
</compile_context>

<pallas_src>
import functools
import math

import jax
import jax.numpy as jnp
from jax.experimental import pallas as pl
from jax.experimental.pallas import tpu as pltpu


def _softplus(x):
    # Numerically stable softplus: max(x, 0) + log1p(exp(-|x|)).
    return jnp.maximum(x, 0.0) + jnp.log1p(jnp.exp(-jnp.abs(x)))


def _dann_kernel(n_s, n_t, bs_s, bs_t, tiles_s, tiles_t, tiles_per_core,
                 fs_ref, ft_ref, ws_ref, wt_ref,
                 w1_ref, b1_ref, w2_ref, b2_ref, w3_ref, b3_ref,
                 out_ref, acc_s_ref, acc_t_ref):
    """One grid step: (optionally) one source tile and one target tile through the
    discriminator MLP; weighted-BCE / accuracy partial sums accumulate in VMEM scratch;
    the per-core raw sums are written on the last step of this core's tile loop."""
    c = pl.program_id(0)                 # core-split index ("parallel" axis)
    j = pl.program_id(1)                 # batch-tile index within this core ("arbitrary")
    t = c * tiles_per_core + j           # global batch-tile index

    @pl.when(j == 0)
    def _init():
        acc_s_ref[...] = jnp.zeros_like(acc_s_ref)
        acc_t_ref[...] = jnp.zeros_like(acc_t_ref)

    # Hoisted once per grid step (shared by both domain branches).
    b1f = b1_ref[...].astype(jnp.float32)          # (1, H)
    b2f = b2_ref[...].astype(jnp.float32)          # (1, H)
    w3f = w3_ref[...].astype(jnp.float32)          # (1, H) row vector
    b3f = b3_ref[...].astype(jnp.float32)          # (1, 1)

    def discriminator(x):
        # Linear -> ReLU -> Linear -> ReLU -> Linear (logits). bf16 operands feed the
        # MXU with f32 accumulation; the bias/ReLU epilogue stays f32.
        h = jnp.dot(x, w1_ref[...], preferred_element_type=jnp.float32)
        h = jnp.maximum(h + b1f, 0.0)
        h = jnp.dot(h.astype(w2_ref.dtype), w2_ref[...], preferred_element_type=jnp.float32)
        h = jnp.maximum(h + b2f, 0.0)
        # Final (H,1) layer on the VPU + XLU lane reduce instead of a 1-column MXU
        # matmul (a 1-lane MXU result wastes the array and forces a drain).
        return jnp.sum(h * w3f, axis=-1, keepdims=True) + b3f       # (rows, 1) f32 logits

    def partial_sums(d, w, label_is_one, first_row, n_rows):
        # Mask padded tail rows of the last tile. NOTE: select-0 (not multiply-by-mask)
        # so padded garbage rows can never leak NaN/Inf into the sums.
        row = jax.lax.broadcasted_iota(jnp.int32, d.shape, 0)
        valid = (first_row + row) < n_rows
        # BCEWithLogits: label 1 -> softplus(-x); label 0 -> softplus(x).
        loss = w.astype(jnp.float32) * _softplus((-d) if label_is_one else d)
        # binary_accuracy_with_logits: predicted positive iff logit >= 0 (ties at 0 count
        # as positive, matching sigmoid(0) >= 0.5); accuracy uses no sample weights.
        corr = ((d >= 0.0) if label_is_one else (d < 0.0)).astype(jnp.float32)
        part = jnp.concatenate([jnp.where(valid, loss, 0.0),
                                jnp.where(valid, corr, 0.0)], axis=1)      # (rows, 2)
        return jnp.sum(part, axis=0, keepdims=True)                        # (1, 2)

    # Run each domain's matmul chain only on grid steps that actually own one of its
    # tiles: with imbalanced n_s / n_t the shorter domain's clamped repeat tile is
    # skipped entirely instead of being recomputed and masked to zero.
    @pl.when(t < tiles_s)
    def _source():
        d_s = discriminator(fs_ref[...])
        acc_s_ref[...] += partial_sums(d_s, ws_ref[...], True, t * bs_s, n_s)

    @pl.when(t < tiles_t)
    def _target():
        d_t = discriminator(ft_ref[...])
        acc_t_ref[...] += partial_sums(d_t, wt_ref[...], False, t * bs_t, n_t)

    @pl.when(j == pl.num_programs(1) - 1)
    def _finalize():
        # Per-core raw sums: [loss_s_sum, corr_s_sum, loss_t_sum, corr_t_sum].
        out_ref[0] = jnp.concatenate([acc_s_ref[...], acc_t_ref[...]], axis=1)


def domain_adversarial_loss(f_s, f_t, params, w_s=None, w_t=None, *, tile_rows=512):
    """Forward pass of DomainAdversarialLoss (binary_pred=True, use_logits=True,
    reduction='mean'). Returns (loss, domain_discriminator_accuracy)."""
    # TODO(synk): the gradient-reversal layer (GRL) only affects the backward pass; the
    # forward pass is identity and is what is modeled here. Only the binary_pred=True,
    # reduction='mean' path of the module is implemented.
    n_s, in_f = f_s.shape
    n_t, in_f_t = f_t.shape
    assert in_f == in_f_t
    if n_s == 0 or n_t == 0:
        raise ValueError("DomainAdversarialLoss: source and target batches must be non-empty")

    if w_s is None:
        w_s = jnp.ones((n_s,), jnp.float32)
    if w_t is None:
        w_t = jnp.ones((n_t,), jnp.float32)
    w_s = w_s.reshape(n_s, 1).astype(jnp.float32)
    w_t = w_t.reshape(n_t, 1).astype(jnp.float32)

    w1, b1 = params["w1"], params["b1"]
    w2, b2 = params["w2"], params["b2"]
    w3, b3 = params["w3"], params["b3"]
    hid = w1.shape[1]
    w3_row = w3.reshape(1, hid)           # (H,1) -> (1,H) row vector for the VPU final layer

    # ---- generation-aware VMEM budget (v5e/v6e: 128 MiB physical, v7x: 64 MiB) ----
    try:
        phys_vmem = int(pltpu.get_tpu_info().vmem_capacity_bytes)
    except Exception:
        phys_vmem = 64 << 20              # conservative fallback: v7x per-TensorCore VMEM
    tile_budget = (phys_vmem * 7) // 10   # target footprint when sizing the row tile
    hard_cap = (phys_vmem * 9) // 10      # never request more than this from Mosaic

    def nbytes(shape, dt):
        return math.prod(shape) * jnp.dtype(dt).itemsize

    weight_bytes = sum(nbytes(p.shape, p.dtype) for p in (w1, b1, w2, b2, w3_row, b3))

    def footprint(bs_s_, bs_t_, weight_buffers):
        tile_bytes = (nbytes((bs_s_, in_f), f_s.dtype) + nbytes((bs_t_, in_f), f_t.dtype)
                      + nbytes((bs_s_, 1), jnp.float32) + nbytes((bs_t_, 1), jnp.float32))
        act_bytes = 4 * (bs_s_ + bs_t_) * (2 * hid + 16)   # f32 activations, both domains
        return weight_buffers * weight_bytes + 2 * tile_bytes + act_bytes + (2 << 20)

    # ---- batch tiling: large row tiles (default 512) amortize the ~0.35us/step cost;
    #      shrink only if the footprint would blow the generation-specific budget ----
    tile_rows = max(8, (int(tile_rows) // 8) * 8)

    def row_tiles(rows):
        return (n_s if n_s <= rows else rows), (n_t if n_t <= rows else rows)

    bs_s, bs_t = row_tiles(tile_rows)
    while footprint(bs_s, bs_t, 2) > tile_budget and tile_rows > 64:
        tile_rows = max(64, ((tile_rows // 2) // 8) * 8)
        bs_s, bs_t = row_tiles(tile_rows)

    tiles_s = pl.cdiv(n_s, bs_s)
    tiles_t = pl.cdiv(n_t, bs_t)
    n_tiles = max(tiles_s, tiles_t)

    # Leading "parallel" grid axis so v7x's two TensorCores each take half the batch
    # tiles (a cheap extra loop level on single-core v5e/v6e). Each core emits its own
    # raw-sum row; the tiny finalize/combine happens in JAX below.
    core_splits = 2 if n_tiles >= 2 else 1
    tiles_per_core = pl.cdiv(n_tiles, core_splits)

    def clamped(tiles):
        # Steps past this domain's tile count clamp to its last block (the kernel skips
        # them with pl.when); the repeated block index avoids extra DMA.
        return lambda c, j: (jnp.minimum(c * tiles_per_core + j, tiles - 1), 0)

    def resident(c, j):
        return (0, 0)

    kernel = functools.partial(_dann_kernel, n_s, n_t, bs_s, bs_t,
                               tiles_s, tiles_t, tiles_per_core)

    def run(weight_mode, weight_buffers):
        def weight_spec(shape):
            if weight_mode is None:
                return pl.BlockSpec(shape, resident)
            return pl.BlockSpec(shape, resident, pipeline_mode=weight_mode)

        in_specs = [
            pl.BlockSpec((bs_s, in_f), clamped(tiles_s)),   # f_s tile
            pl.BlockSpec((bs_t, in_f), clamped(tiles_t)),   # f_t tile
            pl.BlockSpec((bs_s, 1), clamped(tiles_s)),      # w_s tile
            pl.BlockSpec((bs_t, 1), clamped(tiles_t)),      # w_t tile
            weight_spec(w1.shape),                          # VMEM-resident weights
            weight_spec(b1.shape),
            weight_spec(w2.shape),
            weight_spec(b2.shape),
            weight_spec(w3_row.shape),
            weight_spec(b3.shape),
        ]
        vmem_limit = int(min(max(footprint(bs_s, bs_t, weight_buffers), 16 << 20), hard_cap))
        return pl.pallas_call(
            kernel,
            out_shape=jax.ShapeDtypeStruct((core_splits, 1, 4), jnp.float32),
            grid_spec=pltpu.PrefetchScalarGridSpec(
                num_scalar_prefetch=0,
                grid=(core_splits, tiles_per_core),
                in_specs=in_specs,
                out_specs=pl.BlockSpec((1, 1, 4), lambda c, j: (c, 0, 0)),
                scratch_shapes=[pltpu.VMEM((1, 2), jnp.float32),
                                pltpu.VMEM((1, 2), jnp.float32)],
            ),
            compiler_params=pltpu.CompilerParams(
                dimension_semantics=("parallel", "arbitrary"),
                vmem_limit_bytes=vmem_limit,
            ),
        )(f_s, f_t, w_s, w_t, w1, b1, w2, b2, w3_row, b3)

    try:
        # Constant-index weights only need a single VMEM buffer; double-buffering them
        # wastes VMEM that larger feature tiles could use (critical on v7x's 64 MiB).
        out = run(pl.Buffered(1), 1)
    except Exception:
        # Fallback for jax builds where BlockSpec pipeline_mode is not supported.
        out = run(None, 2)

    # Tiny scalar epilogue in JAX (per-domain means, nan_to_num, batch-weighted combine):
    # avoids captured array constants inside the kernel and combines the per-core rows.
    sums = jnp.sum(out, axis=(0, 1))                # [loss_s, corr_s, loss_t, corr_t] sums
    n_tot = n_s + n_t
    src_loss = jnp.nan_to_num(sums[0] / n_s)        # torch applies .nan_to_num() to the mean
    tgt_loss = jnp.nan_to_num(sums[2] / n_t)
    src_acc = sums[1] / n_s * 100.0
    tgt_acc = sums[3] / n_t * 100.0
    loss = (src_loss * n_s + tgt_loss * n_t) / n_tot
    disc_acc = (src_acc * n_s + tgt_acc * n_t) / n_tot
    return loss, disc_acc


def init_discriminator_params(key, in_feature, hidden_size,
                              weight_dtype=jnp.bfloat16, bias_dtype=jnp.float32):
    """DomainDiscriminator-style MLP: Linear(F,H) -> ReLU -> Linear(H,H) -> ReLU -> Linear(H,1).
    Weights stored (in_dim, out_dim) in bf16 (AMP-style) so the hot path is bf16 x @ W on the
    MXU; biases kept f32 for the f32 epilogue. For v6e/v7x pick hidden_size as a multiple of
    256 (fills the 256-wide MXU); 128 already fills v5e's 128x128 MXU."""
    def linear(k, fan_in, fan_out):
        kw, kb = jax.random.split(k)
        bound = 1.0 / (fan_in ** 0.5)
        w = jax.random.uniform(kw, (fan_in, fan_out), jnp.float32, -bound, bound)
        b = jax.random.uniform(kb, (1, fan_out), jnp.float32, -bound, bound)
        return w.astype(weight_dtype), b.astype(bias_dtype)

    k1, k2, k3 = jax.random.split(key, 3)
    w1, b1 = linear(k1, in_feature, hidden_size)
    w2, b2 = linear(k2, hidden_size, hidden_size)
    w3, b3 = linear(k3, hidden_size, 1)
    return dict(w1=w1, b1=b1, w2=w2, b2=b2, w3=w3, b3=b3)


def _reference(f_s, f_t, params, w_s, w_t):
    """Pure-JAX reference with the same bf16-operand / f32-accumulation numerics."""
    def disc(x):
        h = jax.nn.relu(jnp.dot(x, params["w1"], preferred_element_type=jnp.float32)
                        + params["b1"].astype(jnp.float32))
        h = jax.nn.relu(jnp.dot(h.astype(params["w2"].dtype), params["w2"],
                                preferred_element_type=jnp.float32)
                        + params["b2"].astype(jnp.float32))
        w3 = params["w3"].reshape(1, -1).astype(jnp.float32)
        return jnp.sum(h * w3, axis=-1, keepdims=True) + params["b3"].astype(jnp.float32)

    n_s, n_t = f_s.shape[0], f_t.shape[0]
    d_s, d_t = disc(f_s), disc(f_t)
    src_loss = jnp.nan_to_num(jnp.mean(w_s.reshape(-1, 1) * jax.nn.softplus(-d_s)))
    tgt_loss = jnp.nan_to_num(jnp.mean(w_t.reshape(-1, 1) * jax.nn.softplus(d_t)))
    src_acc = jnp.mean((d_s >= 0).astype(jnp.float32)) * 100.0
    tgt_acc = jnp.mean((d_t < 0).astype(jnp.float32)) * 100.0
    n = n_s + n_t
    return ((src_loss * n_s + tgt_loss * n_t) / n,
            (src_acc * n_s + tgt_acc * n_t) / n)


if __name__ == "__main__":
    key = jax.random.PRNGKey(0)
    k_fs, k_ft, k_ws, k_wt, k_params = jax.random.split(key, 5)

    # Small demo shapes: unequal, non-tile-aligned batches + tile_rows=16 exercise the
    # multi-tile grid, the per-domain pl.when skip, tail-row masking and the 2-way
    # core-split ("parallel") axis. H=256 fills the 256-wide v6e/v7x MXU.
    N_S, N_T, F, H = 36, 20, 256, 256
    f_s = jax.random.normal(k_fs, (N_S, F), jnp.float32).astype(jnp.bfloat16)
    f_t = jax.random.normal(k_ft, (N_T, F), jnp.float32).astype(jnp.bfloat16)
    w_s = jax.random.uniform(k_ws, (N_S,), jnp.float32, 0.5, 1.5)
    w_t = jax.random.uniform(k_wt, (N_T,), jnp.float32, 0.5, 1.5)
    params = init_discriminator_params(k_params, F, H, weight_dtype=jnp.bfloat16)

    loss, acc = domain_adversarial_loss(f_s, f_t, params, w_s, w_t, tile_rows=16)
    loss = jax.block_until_ready(loss)
    acc = jax.block_until_ready(acc)

    loss_ref, acc_ref = _reference(f_s, f_t, params, w_s, w_t)
    assert abs(float(loss) - float(loss_ref)) <= 1e-3 + 5e-3 * abs(float(loss_ref)), \
        (float(loss), float(loss_ref))
    assert abs(float(acc) - float(acc_ref)) <= 3.0, (float(acc), float(acc_ref))
    print("KERNEL_OK")
</pallas_src>

<mosaic_0001>
module attributes {stable_mosaic.version = 11 : i64} {
  func.func @_dann_kernel(%arg0: i32, %arg1: i32, %arg2: memref<16x256xbf16, #tpu.memory_space<vmem>>, %arg3: memref<16x256xbf16, #tpu.memory_space<vmem>>, %arg4: memref<16x1xf32, #tpu.memory_space<vmem>>, %arg5: memref<16x1xf32, #tpu.memory_space<vmem>>, %arg6: memref<256x256xbf16, #tpu.memory_space<vmem>>, %arg7: memref<1x256xf32, #tpu.memory_space<vmem>>, %arg8: memref<256x256xbf16, #tpu.memory_space<vmem>>, %arg9: memref<1x256xf32, #tpu.memory_space<vmem>>, %arg10: memref<1x256xbf16, #tpu.memory_space<vmem>>, %arg11: memref<1x1xf32, #tpu.memory_space<vmem>>, %arg12: memref<1x1x4xf32, #tpu.memory_space<vmem>>, %arg13: memref<1x2xf32, #tpu.memory_space<vmem>>, %arg14: memref<1x2xf32, #tpu.memory_space<vmem>>) attributes {dimension_semantics = [#tpu.dimension_semantics<parallel>, #tpu.dimension_semantics<arbitrary>], iteration_bounds = array<i64: 2, 2>, scalar_prefetch = 0 : i64, scratch_operands = 2 : i64, tpu.core_type = #tpu.core_type<tc>, window_params = [{transform_indices = @transform_0, window_bounds = array<i64: 16, 256>}, {transform_indices = @transform_1, window_bounds = array<i64: 16, 256>}, {transform_indices = @transform_2, window_bounds = array<i64: 16, 1>}, {transform_indices = @transform_3, window_bounds = array<i64: 16, 1>}, {pipeline_mode = #tpu.pipeline_mode<synchronous>, transform_indices = @transform_4, window_bounds = array<i64: 256, 256>}, {pipeline_mode = #tpu.pipeline_mode<synchronous>, transform_indices = @transform_5, window_bounds = array<i64: 1, 256>}, {pipeline_mode = #tpu.pipeline_mode<synchronous>, transform_indices = @transform_6, window_bounds = array<i64: 256, 256>}, {pipeline_mode = #tpu.pipeline_mode<synchronous>, transform_indices = @transform_7, window_bounds = array<i64: 1, 256>}, {pipeline_mode = #tpu.pipeline_mode<synchronous>, transform_indices = @transform_8, window_bounds = array<i64: 1, 256>}, {pipeline_mode = #tpu.pipeline_mode<synchronous>, transform_indices = @transform_9, window_bounds = array<i64: 1, 1>}, {transform_indices = @transform_10, window_bounds = array<i64: 1, 1, 4>}]} {
    %c2_i32 = arith.constant 2 : i32
    %0 = arith.muli %arg0, %c2_i32 : i32
    %1 = arith.addi %0, %arg1 : i32
    %c0_i32 = arith.constant 0 : i32
    %2 = arith.cmpi eq, %arg1, %c0_i32 : i32
    %3 = arith.extui %2 : i1 to i32
    %c0_i32_0 = arith.constant 0 : i32
    %4 = arith.cmpi ne, %3, %c0_i32_0 : i32
    scf.if %4 {
      %cst = arith.constant 0.000000e+00 : f32
      %19 = vector.broadcast %cst : f32 to vector<1x2xf32>
      %c0_12 = arith.constant 0 : index
      %c0_13 = arith.constant 0 : index
      %20 = vector.load %arg13[%c0_12, %c0_13] : memref<1x2xf32, #tpu.memory_space<vmem>>, vector<1x2xf32>
      tpu.vector_store %arg13[%c0_12, %c0_13], %19 {strides = array<i32>} : memref<1x2xf32, #tpu.memory_space<vmem>>, vector<1x2xf32>,
      %cst_14 = arith.constant 0.000000e+00 : f32
      %21 = vector.broadcast %cst_14 : f32 to vector<1x2xf32>
      %c0_15 = arith.constant 0 : index
      %c0_16 = arith.constant 0 : index
      %22 = vector.load %arg14[%c0_15, %c0_16] : memref<1x2xf32, #tpu.memory_space<vmem>>, vector<1x2xf32>
      tpu.vector_store %arg14[%c0_15, %c0_16], %21 {strides = array<i32>} : memref<1x2xf32, #tpu.memory_space<vmem>>, vector<1x2xf32>,
    } else {
    }
    %c0 = arith.constant 0 : index
    %c0_1 = arith.constant 0 : index
    %5 = vector.load %arg7[%c0, %c0_1] : memref<1x256xf32, #tpu.memory_space<vmem>>, vector<1x256xf32>
    %c0_2 = arith.constant 0 : index
    %c0_3 = arith.constant 0 : index
    %6 = vector.load %arg9[%c0_2, %c0_3] : memref<1x256xf32, #tpu.memory_space<vmem>>, vector<1x256xf32>
    %c0_4 = arith.constant 0 : index
    %c0_5 = arith.constant 0 : index
    %7 = vector.load %arg10[%c0_4, %c0_5] : memref<1x256xbf16, #tpu.memory_space<vmem>>, vector<1x256xbf16>
    %8 = arith.extf %7 : vector<1x256xbf16> to vector<1x256xf32>
    %c0_6 = arith.constant 0 : index
    %c0_7 = arith.constant 0 : index
    %9 = vector.load %arg11[%c0_6, %c0_7] : memref<1x1xf32, #tpu.memory_space<vmem>>, vector<1x1xf32>
    %c3_i32 = arith.constant 3 : i32
    %10 = arith.cmpi slt, %1, %c3_i32 : i32
    %11 = arith.extui %10 : i1 to i32
    %c0_i32_8 = arith.constant 0 : i32
    %12 = arith.cmpi ne, %11, %c0_i32_8 : i32
    scf.if %12 {
      %c0_12 = arith.constant 0 : index
      %c0_13 = arith.constant 0 : index
      %19 = vector.load %arg2[%c0_12, %c0_13] : memref<16x256xbf16, #tpu.memory_space<vmem>>, vector<16x256xbf16>
      %c0_14 = arith.constant 0 : index
      %c0_15 = arith.constant 0 : index
      %20 = vector.load %arg6[%c0_14, %c0_15] : memref<256x256xbf16, #tpu.memory_space<vmem>>, vector<256x256xbf16>
      %cst = arith.constant dense<0.000000e+00> : vector<16x256xf32>
      %21 = tpu.matmul %19, %20, %cst {dimension_numbers = #tpu.dot_dimension_numbers<[1], [0], [0], [1], [0, 0, 1, 1], [], []>} : vector<16x256xbf16>, vector<256x256xbf16>, vector<16x256xf32> -> vector<16x256xf32>
      %22 = vector.broadcast %5 : vector<1x256xf32> to vector<16x256xf32>
      %23 = arith.addf %21, %22 : vector<16x256xf32>
      %cst_16 = arith.constant 0.000000e+00 : f32
      %24 = vector.broadcast %cst_16 : f32 to vector<16x256xf32>
      %25 = arith.maximumf %23, %24 : vector<16x256xf32>
      %26 = arith.truncf %25 : vector<16x256xf32> to vector<16x256xbf16>
      %c0_17 = arith.constant 0 : index
      %c0_18 = arith.constant 0 : index
      %27 = vector.load %arg8[%c0_17, %c0_18] : memref<256x256xbf16, #tpu.memory_space<vmem>>, vector<256x256xbf16>
      %cst_19 = arith.constant dense<0.000000e+00> : vector<16x256xf32>
      %28 = tpu.matmul %26, %27, %cst_19 {dimension_numbers = #tpu.dot_dimension_numbers<[1], [0], [0], [1], [0, 0, 1, 1], [], []>} : vector<16x256xbf16>, vector<256x256xbf16>, vector<16x256xf32> -> vector<16x256xf32>
      %29 = vector.broadcast %6 : vector<1x256xf32> to vector<16x256xf32>
      %30 = arith.addf %28, %29 : vector<16x256xf32>
      %cst_20 = arith.constant 0.000000e+00 : f32
      %31 = vector.broadcast %cst_20 : f32 to vector<16x256xf32>
      %32 = arith.maximumf %30, %31 : vector<16x256xf32>
      %33 = vector.broadcast %8 : vector<1x256xf32> to vector<16x256xf32>
      %34 = arith.mulf %32, %33 : vector<16x256xf32>
      %cst_21 = arith.constant dense<0.000000e+00> : vector<16xf32>
      %35 = vector.multi_reduction <add>, %34, %cst_21 [1] : vector<16x256xf32> to vector<16xf32>
      %36 = vector.shape_cast %35 : vector<16xf32> to vector<16x1xf32>
      %37 = vector.broadcast %9 : vector<1x1xf32> to vector<16x1xf32>
      %38 = arith.addf %36, %37 : vector<16x1xf32>
      %c0_22 = arith.constant 0 : index
      %c0_23 = arith.constant 0 : index
      %39 = vector.load %arg13[%c0_22, %c0_23] : memref<1x2xf32, #tpu.memory_space<vmem>>, vector<1x2xf32>
      %c0_24 = arith.constant 0 : index
      %c0_25 = arith.constant 0 : index
      %40 = vector.load %arg4[%c0_24, %c0_25] : memref<16x1xf32, #tpu.memory_space<vmem>>, vector<16x1xf32>
      %c16_i32 = arith.constant 16 : i32
      %41 = arith.muli %1, %c16_i32 : i32
      %42 = tpu.iota {dimensions = array<i32: 0>} : vector<16x1xi32>
      %43 = vector.broadcast %41 : i32 to vector<16x1xi32>
      %44 = arith.addi %43, %42 : vector<16x1xi32>
      %c36_i32 = arith.constant 36 : i32
      %45 = vector.broadcast %c36_i32 : i32 to vector<16x1xi32>
      %46 = arith.cmpi slt, %44, %45 : vector<16x1xi32>
      %cst_26 = arith.constant 0.000000e+00 : f32
      %47 = vector.broadcast %cst_26 : f32 to vector<16x1xf32>
      %48 = arith.subf %47, %38 : vector<16x1xf32>
      %cst_27 = arith.constant 0.000000e+00 : f32
      %49 = vector.broadcast %cst_27 : f32 to vector<16x1xf32>
      %50 = arith.maximumf %48, %49 : vector<16x1xf32>
      %51 = math.absf %48 : vector<16x1xf32>
      %cst_28 = arith.constant 0.000000e+00 : f32
      %52 = vector.broadcast %cst_28 : f32 to vector<16x1xf32>
      %53 = arith.subf %52, %51 : vector<16x1xf32>
      %54 = math.exp %53 : vector<16x1xf32>
      %55 = math.log1p %54 : vector<16x1xf32>
      %56 = arith.addf %50, %55 : vector<16x1xf32>
      %57 = arith.mulf %40, %56 : vector<16x1xf32>
      %cst_29 = arith.constant 0.000000e+00 : f32
      %58 = vector.broadcast %cst_29 : f32 to vector<16x1xf32>
      %59 = arith.cmpf oge, %38, %58 : vector<16x1xf32>
      %60 = arith.extui %59 : vector<16x1xi1> to vector<16x1xi32>
      %61 = arith.sitofp %60 : vector<16x1xi32> to vector<16x1xf32>
      %cst_30 = arith.constant 0.000000e+00 : f32
      %62 = vector.broadcast %cst_30 : f32 to vector<16x1xf32>
      %63 = arith.select %46, %57, %62 : vector<16x1xi1>, vector<16x1xf32>
      %cst_31 = arith.constant 0.000000e+00 : f32
      %64 = vector.broadcast %cst_31 : f32 to vector<16x1xf32>
      %65 = arith.select %46, %61, %64 : vector<16x1xi1>, vector<16x1xf32>
      %66 = tpu.concatenate %63, %65 in 1 : vector<16x1xf32>, vector<16x1xf32> -> vector<16x2xf32>
      %cst_32 = arith.constant dense<0.000000e+00> : vector<2xf32>
      %67 = vector.multi_reduction <add>, %66, %cst_32 [0] : vector<16x2xf32> to vector<2xf32>
      %68 = vector.shape_cast %67 : vector<2xf32> to vector<1x2xf32>
      %69 = arith.addf %39, %68 : vector<1x2xf32>
      %c0_33 = arith.constant 0 : index
      %c0_34 = arith.constant 0 : index
      %70 = vector.load %arg13[%c0_33, %c0_34] : memref<1x2xf32, #tpu.memory_space<vmem>>, vector<1x2xf32>
      tpu.vector_store %arg13[%c0_33, %c0_34], %69 {strides = array<i32>} : memref<1x2xf32, #tpu.memory_space<vmem>>, vector<1x2xf32>,
    } else {
    }
    %c2_i32_9 = arith.constant 2 : i32
    %13 = arith.cmpi slt, %1, %c2_i32_9 : i32
    %14 = arith.extui %13 : i1 to i32
    %c0_i32_10 = arith.constant 0 : i32
    %15 = arith.cmpi ne, %14, %c0_i32_10 : i32
    scf.if %15 {
      %c0_12 = arith.constant 0 : index
      %c0_13 = arith.constant 0 : index
      %19 = vector.load %arg3[%c0_12, %c0_13] : memref<16x256xbf16, #tpu.memory_space<vmem>>, vector<16x256xbf16>
      %c0_14 = arith.constant 0 : index
      %c0_15 = arith.constant 0 : index
      %20 = vector.load %arg6[%c0_14, %c0_15] : memref<256x256xbf16, #tpu.memory_space<vmem>>, vector<256x256xbf16>
      %cst = arith.constant dense<0.000000e+00> : vector<16x256xf32>
      %21 = tpu.matmul %19, %20, %cst {dimension_numbers = #tpu.dot_dimension_numbers<[1], [0], [0], [1], [0, 0, 1, 1], [], []>} : vector<16x256xbf16>, vector<256x256xbf16>, vector<16x256xf32> -> vector<16x256xf32>
      %22 = vector.broadcast %5 : vector<1x256xf32> to vector<16x256xf32>
      %23 = arith.addf %21, %22 : vector<16x256xf32>
      %cst_16 = arith.constant 0.000000e+00 : f32
      %24 = vector.broadcast %cst_16 : f32 to vector<16x256xf32>
      %25 = arith.maximumf %23, %24 : vector<16x256xf32>
      %26 = arith.truncf %25 : vector<16x256xf32> to vector<16x256xbf16>
      %c0_17 = arith.constant 0 : index
      %c0_18 = arith.constant 0 : index
      %27 = vector.load %arg8[%c0_17, %c0_18] : memref<256x256xbf16, #tpu.memory_space<vmem>>, vector<256x256xbf16>
      %cst_19 = arith.constant dense<0.000000e+00> : vector<16x256xf32>
      %28 = tpu.matmul %26, %27, %cst_19 {dimension_numbers = #tpu.dot_dimension_numbers<[1], [0], [0], [1], [0, 0, 1, 1], [], []>} : vector<16x256xbf16>, vector<256x256xbf16>, vector<16x256xf32> -> vector<16x256xf32>
      %29 = vector.broadcast %6 : vector<1x256xf32> to vector<16x256xf32>
      %30 = arith.addf %28, %29 : vector<16x256xf32>
      %cst_20 = arith.constant 0.000000e+00 : f32
      %31 = vector.broadcast %cst_20 : f32 to vector<16x256xf32>
      %32 = arith.maximumf %30, %31 : vector<16x256xf32>
      %33 = vector.broadcast %8 : vector<1x256xf32> to vector<16x256xf32>
      %34 = arith.mulf %32, %33 : vector<16x256xf32>
      %cst_21 = arith.constant dense<0.000000e+00> : vector<16xf32>
      %35 = vector.multi_reduction <add>, %34, %cst_21 [1] : vector<16x256xf32> to vector<16xf32>
      %36 = vector.shape_cast %35 : vector<16xf32> to vector<16x1xf32>
      %37 = vector.broadcast %9 : vector<1x1xf32> to vector<16x1xf32>
      %38 = arith.addf %36, %37 : vector<16x1xf32>
      %c0_22 = arith.constant 0 : index
      %c0_23 = arith.constant 0 : index
      %39 = vector.load %arg14[%c0_22, %c0_23] : memref<1x2xf32, #tpu.memory_space<vmem>>, vector<1x2xf32>
      %c0_24 = arith.constant 0 : index
      %c0_25 = arith.constant 0 : index
      %40 = vector.load %arg5[%c0_24, %c0_25] : memref<16x1xf32, #tpu.memory_space<vmem>>, vector<16x1xf32>
      %c16_i32 = arith.constant 16 : i32
      %41 = arith.muli %1, %c16_i32 : i32
      %42 = tpu.iota {dimensions = array<i32: 0>} : vector<16x1xi32>
      %43 = vector.broadcast %41 : i32 to vector<16x1xi32>
      %44 = arith.addi %43, %42 : vector<16x1xi32>
      %c20_i32 = arith.constant 20 : i32
      %45 = vector.broadcast %c20_i32 : i32 to vector<16x1xi32>
      %46 = arith.cmpi slt, %44, %45 : vector<16x1xi32>
      %cst_26 = arith.constant 0.000000e+00 : f32
      %47 = vector.broadcast %cst_26 : f32 to vector<16x1xf32>
      %48 = arith.maximumf %38, %47 : vector<16x1xf32>
      %49 = math.absf %38 : vector<16x1xf32>
      %cst_27 = arith.constant 0.000000e+00 : f32
      %50 = vector.broadcast %cst_27 : f32 to vector<16x1xf32>
      %51 = arith.subf %50, %49 : vector<16x1xf32>
      %52 = math.exp %51 : vector<16x1xf32>
      %53 = math.log1p %52 : vector<16x1xf32>
      %54 = arith.addf %48, %53 : vector<16x1xf32>
      %55 = arith.mulf %40, %54 : vector<16x1xf32>
      %cst_28 = arith.constant 0.000000e+00 : f32
      %56 = vector.broadcast %cst_28 : f32 to vector<16x1xf32>
      %57 = arith.cmpf olt, %38, %56 : vector<16x1xf32>
      %58 = arith.extui %57 : vector<16x1xi1> to vector<16x1xi32>
      %59 = arith.sitofp %58 : vector<16x1xi32> to vector<16x1xf32>
      %cst_29 = arith.constant 0.000000e+00 : f32
      %60 = vector.broadcast %cst_29 : f32 to vector<16x1xf32>
      %61 = arith.select %46, %55, %60 : vector<16x1xi1>, vector<16x1xf32>
      %cst_30 = arith.constant 0.000000e+00 : f32
      %62 = vector.broadcast %cst_30 : f32 to vector<16x1xf32>
      %63 = arith.select %46, %59, %62 : vector<16x1xi1>, vector<16x1xf32>
      %64 = tpu.concatenate %61, %63 in 1 : vector<16x1xf32>, vector<16x1xf32> -> vector<16x2xf32>
      %cst_31 = arith.constant dense<0.000000e+00> : vector<2xf32>
      %65 = vector.multi_reduction <add>, %64, %cst_31 [0] : vector<16x2xf32> to vector<2xf32>
      %66 = vector.shape_cast %65 : vector<2xf32> to vector<1x2xf32>
      %67 = arith.addf %39, %66 : vector<1x2xf32>
      %c0_32 = arith.constant 0 : index
      %c0_33 = arith.constant 0 : index
      %68 = vector.load %arg14[%c0_32, %c0_33] : memref<1x2xf32, #tpu.memory_space<vmem>>, vector<1x2xf32>
      tpu.vector_store %arg14[%c0_32, %c0_33], %67 {strides = array<i32>} : memref<1x2xf32, #tpu.memory_space<vmem>>, vector<1x2xf32>,
    } else {
    }
    %c1_i32 = arith.constant 1 : i32
    %16 = arith.cmpi eq, %arg1, %c1_i32 : i32
    %17 = arith.extui %16 : i1 to i32
    %c0_i32_11 = arith.constant 0 : i32
    %18 = arith.cmpi ne, %17, %c0_i32_11 : i32
    scf.if %18 {
      %c0_12 = arith.constant 0 : index
      %c0_13 = arith.constant 0 : index
      %19 = vector.load %arg13[%c0_12, %c0_13] : memref<1x2xf32, #tpu.memory_space<vmem>>, vector<1x2xf32>
      %c0_14 = arith.constant 0 : index
      %c0_15 = arith.constant 0 : index
      %20 = vector.load %arg14[%c0_14, %c0_15] : memref<1x2xf32, #tpu.memory_space<vmem>>, vector<1x2xf32>
      %21 = tpu.concatenate %19, %20 in 1 : vector<1x2xf32>, vector<1x2xf32> -> vector<1x4xf32>
      %c0_16 = arith.constant 0 : index
      %c0_17 = arith.constant 0 : index
      %c0_18 = arith.constant 0 : index
      %22 = vector.load %arg12[%c0_16, %c0_17, %c0_18] : memref<1x1x4xf32, #tpu.memory_space<vmem>>, vector<1x1x4xf32>
      %23 = vector.shape_cast %22 : vector<1x1x4xf32> to vector<1x4xf32>
      %24 = vector.shape_cast %21 : vector<1x4xf32> to vector<1x1x4xf32>
      tpu.vector_store %arg12[%c0_16, %c0_17, %c0_18], %24 {strides = array<i32>} : memref<1x1x4xf32, #tpu.memory_space<vmem>>, vector<1x1x4xf32>,
    } else {
    }
    return
  }
  func.func @transform_0(%arg0: i32, %arg1: i32) -> (i32, i32) {
    %c2_i32 = arith.constant 2 : i32
    %0 = arith.muli %arg0, %c2_i32 : i32
    %1 = arith.addi %0, %arg1 : i32
    %c2_i32_0 = arith.constant 2 : i32
    %2 = arith.minsi %1, %c2_i32_0 : i32
    %c0_i32 = arith.constant 0 : i32
    %c0_i32_1 = arith.constant 0 : i32
    return %2, %c0_i32 : i32, i32
  }
  func.func @transform_1(%arg0: i32, %arg1: i32) -> (i32, i32) {
    %c2_i32 = arith.constant 2 : i32
    %0 = arith.muli %arg0, %c2_i32 : i32
    %1 = arith.addi %0, %arg1 : i32
    %c1_i32 = arith.constant 1 : i32
    %2 = arith.minsi %1, %c1_i32 : i32
    %c0_i32 = arith.constant 0 : i32
    %c0_i32_0 = arith.constant 0 : i32
    return %2, %c0_i32 : i32, i32
  }
  func.func @transform_2(%arg0: i32, %arg1: i32) -> (i32, i32) {
    %c2_i32 = arith.constant 2 : i32
    %0 = arith.muli %arg0, %c2_i32 : i32
    %1 = arith.addi %0, %arg1 : i32
    %c2_i32_0 = arith.constant 2 : i32
    %2 = arith.minsi %1, %c2_i32_0 : i32
    %c0_i32 = arith.constant 0 : i32
    %c0_i32_1 = arith.constant 0 : i32
    return %2, %c0_i32 : i32, i32
  }
  func.func @transform_3(%arg0: i32, %arg1: i32) -> (i32, i32) {
    %c2_i32 = arith.constant 2 : i32
    %0 = arith.muli %arg0, %c2_i32 : i32
    %1 = arith.addi %0, %arg1 : i32
    %c1_i32 = arith.constant 1 : i32
    %2 = arith.minsi %1, %c1_i32 : i32
    %c0_i32 = arith.constant 0 : i32
    %c0_i32_0 = arith.constant 0 : i32
    return %2, %c0_i32 : i32, i32
  }
  func.func @transform_4(%arg0: i32, %arg1: i32) -> (i32, i32) {
    %c0_i32 = arith.constant 0 : i32
    %c0_i32_0 = arith.constant 0 : i32
    %c0_i32_1 = arith.constant 0 : i32
    return %c0_i32, %c0_i32_0 : i32, i32
  }
  func.func @transform_5(%arg0: i32, %arg1: i32) -> (i32, i32) {
    %c0_i32 = arith.constant 0 : i32
    %c0_i32_0 = arith.constant 0 : i32
    %c0_i32_1 = arith.constant 0 : i32
    return %c0_i32, %c0_i32_0 : i32, i32
  }
  func.func @transform_6(%arg0: i32, %arg1: i32) -> (i32, i32) {
    %c0_i32 = arith.constant 0 : i32
    %c0_i32_0 = arith.constant 0 : i32
    %c0_i32_1 = arith.constant 0 : i32
    return %c0_i32, %c0_i32_0 : i32, i32
  }
  func.func @transform_7(%arg0: i32, %arg1: i32) -> (i32, i32) {
    %c0_i32 = arith.constant 0 : i32
    %c0_i32_0 = arith.constant 0 : i32
    %c0_i32_1 = arith.constant 0 : i32
    return %c0_i32, %c0_i32_0 : i32, i32
  }
  func.func @transform_8(%arg0: i32, %arg1: i32) -> (i32, i32) {
    %c0_i32 = arith.constant 0 : i32
    %c0_i32_0 = arith.constant 0 : i32
    %c0_i32_1 = arith.constant 0 : i32
    return %c0_i32, %c0_i32_0 : i32, i32
  }
  func.func @transform_9(%arg0: i32, %arg1: i32) -> (i32, i32) {
    %c0_i32 = arith.constant 0 : i32
    %c0_i32_0 = arith.constant 0 : i32
    %c0_i32_1 = arith.constant 0 : i32
    return %c0_i32, %c0_i32_0 : i32, i32
  }
  func.func @transform_10(%arg0: i32, %arg1: i32) -> (i32, i32, i32) {
    %c0_i32 = arith.constant 0 : i32
    %c0_i32_0 = arith.constant 0 : i32
    %c0_i32_1 = arith.constant 0 : i32
    return %arg0, %c0_i32, %c0_i32_0 : i32, i32, i32
  }
}

module attributes {stable_mosaic.version = 11 : i64} {
  func.func @_dann_kernel(%arg0: i32, %arg1: i32, %arg2: memref<16x256xbf16, #tpu.memory_space<vmem>>, %arg3: memref<16x256xbf16, #tpu.memory_space<vmem>>, %arg4: memref<16x1xf32, #tpu.memory_space<vmem>>, %arg5: memref<16x1xf32, #tpu.memory_space<vmem>>, %arg6: memref<256x256xbf16, #tpu.memory_space<vmem>>, %arg7: memref<1x256xf32, #tpu.memory_space<vmem>>, %arg8: memref<256x256xbf16, #tpu.memory_space<vmem>>, %arg9: memref<1x256xf32, #tpu.memory_space<vmem>>, %arg10: memref<1x256xbf16, #tpu.memory_space<vmem>>, %arg11: memref<1x1xf32, #tpu.memory_space<vmem>>, %arg12: memref<1x1x4xf32, #tpu.memory_space<vmem>>, %arg13: memref<1x2xf32, #tpu.memory_space<vmem>>, %arg14: memref<1x2xf32, #tpu.memory_space<vmem>>) attributes {dimension_semantics = [#tpu.dimension_semantics<parallel>, #tpu.dimension_semantics<arbitrary>], iteration_bounds = array<i64: 2, 2>, scalar_prefetch = 0 : i64, scratch_operands = 2 : i64, tpu.core_type = #tpu.core_type<tc>, window_params = [{transform_indices = @transform_0, window_bounds = array<i64: 16, 256>}, {transform_indices = @transform_1, window_bounds = array<i64: 16, 256>}, {transform_indices = @transform_2, window_bounds = array<i64: 16, 1>}, {transform_indices = @transform_3, window_bounds = array<i64: 16, 1>}, {pipeline_mode = #tpu.pipeline_mode<synchronous>, transform_indices = @transform_4, window_bounds = array<i64: 256, 256>}, {pipeline_mode = #tpu.pipeline_mode<synchronous>, transform_indices = @transform_5, window_bounds = array<i64: 1, 256>}, {pipeline_mode = #tpu.pipeline_mode<synchronous>, transform_indices = @transform_6, window_bounds = array<i64: 256, 256>}, {pipeline_mode = #tpu.pipeline_mode<synchronous>, transform_indices = @transform_7, window_bounds = array<i64: 1, 256>}, {pipeline_mode = #tpu.pipeline_mode<synchronous>, transform_indices = @transform_8, window_bounds = array<i64: 1, 256>}, {pipeline_mode = #tpu.pipeline_mode<synchronous>, transform_indices = @transform_9, window_bounds = array<i64: 1, 1>}, {transform_indices = @transform_10, window_bounds = array<i64: 1, 1, 4>}]} {
    %c2_i32 = arith.constant 2 : i32
    %0 = arith.muli %arg0, %c2_i32 : i32
    %1 = arith.addi %0, %arg1 : i32
    %c0_i32 = arith.constant 0 : i32
    %2 = arith.cmpi eq, %arg1, %c0_i32 : i32
    %3 = arith.extui %2 : i1 to i32
    %c0_i32_0 = arith.constant 0 : i32
    %4 = arith.cmpi ne, %3, %c0_i32_0 : i32
    scf.if %4 {
      %cst = arith.constant 0.000000e+00 : f32
      %19 = vector.broadcast %cst : f32 to vector<1x2xf32>
      %c0_12 = arith.constant 0 : index
      %c0_13 = arith.constant 0 : index
      %20 = vector.load %arg13[%c0_12, %c0_13] : memref<1x2xf32, #tpu.memory_space<vmem>>, vector<1x2xf32>
      tpu.vector_store %arg13[%c0_12, %c0_13], %19 {strides = array<i32>} : memref<1x2xf32, #tpu.memory_space<vmem>>, vector<1x2xf32>,
      %cst_14 = arith.constant 0.000000e+00 : f32
      %21 = vector.broadcast %cst_14 : f32 to vector<1x2xf32>
      %c0_15 = arith.constant 0 : index
      %c0_16 = arith.constant 0 : index
      %22 = vector.load %arg14[%c0_15, %c0_16] : memref<1x2xf32, #tpu.memory_space<vmem>>, vector<1x2xf32>
      tpu.vector_store %arg14[%c0_15, %c0_16], %21 {strides = array<i32>} : memref<1x2xf32, #tpu.memory_space<vmem>>, vector<1x2xf32>,
    } else {
    }
    %c0 = arith.constant 0 : index
    %c0_1 = arith.constant 0 : index
    %5 = vector.load %arg7[%c0, %c0_1] : memref<1x256xf32, #tpu.memory_space<vmem>>, vector<1x256xf32>
    %c0_2 = arith.constant 0 : index
    %c0_3 = arith.constant 0 : index
    %6 = vector.load %arg9[%c0_2, %c0_3] : memref<1x256xf32, #tpu.memory_space<vmem>>, vector<1x256xf32>
    %c0_4 = arith.constant 0 : index
    %c0_5 = arith.constant 0 : index
    %7 = vector.load %arg10[%c0_4, %c0_5] : memref<1x256xbf16, #tpu.memory_space<vmem>>, vector<1x256xbf16>
    %8 = arith.extf %7 : vector<1x256xbf16> to vector<1x256xf32>
    %c0_6 = arith.constant 0 : index
    %c0_7 = arith.constant 0 : index
    %9 = vector.load %arg11[%c0_6, %c0_7] : memref<1x1xf32, #tpu.memory_space<vmem>>, vector<1x1xf32>
    %c3_i32 = arith.constant 3 : i32
    %10 = arith.cmpi slt, %1, %c3_i32 : i32
    %11 = arith.extui %10 : i1 to i32
    %c0_i32_8 = arith.constant 0 : i32
    %12 = arith.cmpi ne, %11, %c0_i32_8 : i32
    scf.if %12 {
      %c0_12 = arith.constant 0 : index
      %c0_13 = arith.constant 0 : index
      %19 = vector.load %arg2[%c0_12, %c0_13] : memref<16x256xbf16, #tpu.memory_space<vmem>>, vector<16x256xbf16>
      %c0_14 = arith.constant 0 : index
      %c0_15 = arith.constant 0 : index
      %20 = vector.load %arg6[%c0_14, %c0_15] : memref<256x256xbf16, #tpu.memory_space<vmem>>, vector<256x256xbf16>
      %cst = arith.constant dense<0.000000e+00> : vector<16x256xf32>
      %21 = tpu.matmul %19, %20, %cst {dimension_numbers = #tpu.dot_dimension_numbers<[1], [0], [0], [1], [0, 0, 1, 1], [], []>} : vector<16x256xbf16>, vector<256x256xbf16>, vector<16x256xf32> -> vector<16x256xf32>
      %22 = vector.broadcast %5 : vector<1x256xf32> to vector<16x256xf32>
      %23 = arith.addf %21, %22 : vector<16x256xf32>
      %cst_16 = arith.constant 0.000000e+00 : f32
      %24 = vector.broadcast %cst_16 : f32 to vector<16x256xf32>
      %25 = arith.maximumf %23, %24 : vector<16x256xf32>
      %26 = arith.truncf %25 : vector<16x256xf32> to vector<16x256xbf16>
      %c0_17 = arith.constant 0 : index
      %c0_18 = arith.constant 0 : index
      %27 = vector.load %arg8[%c0_17, %c0_18] : memref<256x256xbf16, #tpu.memory_space<vmem>>, vector<256x256xbf16>
      %cst_19 = arith.constant dense<0.000000e+00> : vector<16x256xf32>
      %28 = tpu.matmul %26, %27, %cst_19 {dimension_numbers = #tpu.dot_dimension_numbers<[1], [0], [0], [1], [0, 0, 1, 1], [], []>} : vector<16x256xbf16>, vector<256x256xbf16>, vector<16x256xf32> -> vector<16x256xf32>
      %29 = vector.broadcast %6 : vector<1x256xf32> to vector<16x256xf32>
      %30 = arith.addf %28, %29 : vector<16x256xf32>
      %cst_20 = arith.constant 0.000000e+00 : f32
      %31 = vector.broadcast %cst_20 : f32 to vector<16x256xf32>
      %32 = arith.maximumf %30, %31 : vector<16x256xf32>
      %33 = vector.broadcast %8 : vector<1x256xf32> to vector<16x256xf32>
      %34 = arith.mulf %32, %33 : vector<16x256xf32>
      %cst_21 = arith.constant dense<0.000000e+00> : vector<16xf32>
      %35 = vector.multi_reduction <add>, %34, %cst_21 [1] : vector<16x256xf32> to vector<16xf32>
      %36 = vector.shape_cast %35 : vector<16xf32> to vector<16x1xf32>
      %37 = vector.broadcast %9 : vector<1x1xf32> to vector<16x1xf32>
      %38 = arith.addf %36, %37 : vector<16x1xf32>
      %c0_22 = arith.constant 0 : index
      %c0_23 = arith.constant 0 : index
      %39 = vector.load %arg13[%c0_22, %c0_23] : memref<1x2xf32, #tpu.memory_space<vmem>>, vector<1x2xf32>
      %c0_24 = arith.constant 0 : index
      %c0_25 = arith.constant 0 : index
      %40 = vector.load %arg4[%c0_24, %c0_25] : memref<16x1xf32, #tpu.memory_space<vmem>>, vector<16x1xf32>
      %c16_i32 = arith.constant 16 : i32
      %41 = arith.muli %1, %c16_i32 : i32
      %42 = tpu.iota {dimensions = array<i32: 0>} : vector<16x1xi32>
      %43 = vector.broadcast %41 : i32 to vector<16x1xi32>
      %44 = arith.addi %43, %42 : vector<16x1xi32>
      %c36_i32 = arith.constant 36 : i32
      %45 = vector.broadcast %c36_i32 : i32 to vector<16x1xi32>
      %46 = arith.cmpi slt, %44, %45 : vector<16x1xi32>
      %cst_26 = arith.constant 0.000000e+00 : f32
      %47 = vector.broadcast %cst_26 : f32 to vector<16x1xf32>
      %48 = arith.subf %47, %38 : vector<16x1xf32>
      %cst_27 = arith.constant 0.000000e+00 : f32
      %49 = vector.broadcast %cst_27 : f32 to vector<16x1xf32>
      %50 = arith.maximumf %48, %49 : vector<16x1xf32>
      %51 = math.absf %48 : vector<16x1xf32>
      %cst_28 = arith.constant 0.000000e+00 : f32
      %52 = vector.broadcast %cst_28 : f32 to vector<16x1xf32>
      %53 = arith.subf %52, %51 : vector<16x1xf32>
      %54 = math.exp %53 : vector<16x1xf32>
      %55 = math.log1p %54 : vector<16x1xf32>
      %56 = arith.addf %50, %55 : vector<16x1xf32>
      %57 = arith.mulf %40, %56 : vector<16x1xf32>
      %cst_29 = arith.constant 0.000000e+00 : f32
      %58 = vector.broadcast %cst_29 : f32 to vector<16x1xf32>
      %59 = arith.cmpf oge, %38, %58 : vector<16x1xf32>
      %60 = arith.extui %59 : vector<16x1xi1> to vector<16x1xi32>
      %61 = arith.sitofp %60 : vector<16x1xi32> to vector<16x1xf32>
      %cst_30 = arith.constant 0.000000e+00 : f32
      %62 = vector.broadcast %cst_30 : f32 to vector<16x1xf32>
      %63 = arith.select %46, %57, %62 : vector<16x1xi1>, vector<16x1xf32>
      %cst_31 = arith.constant 0.000000e+00 : f32
      %64 = vector.broadcast %cst_31 : f32 to vector<16x1xf32>
      %65 = arith.select %46, %61, %64 : vector<16x1xi1>, vector<16x1xf32>
      %66 = tpu.concatenate %63, %65 in 1 : vector<16x1xf32>, vector<16x1xf32> -> vector<16x2xf32>
      %cst_32 = arith.constant dense<0.000000e+00> : vector<2xf32>
      %67 = vector.multi_reduction <add>, %66, %cst_32 [0] : vector<16x2xf32> to vector<2xf32>
      %68 = vector.shape_cast %67 : vector<2xf32> to vector<1x2xf32>
      %69 = arith.addf %39, %68 : vector<1x2xf32>
      %c0_33 = arith.constant 0 : index
      %c0_34 = arith.constant 0 : index
      %70 = vector.load %arg13[%c0_33, %c0_34] : memref<1x2xf32, #tpu.memory_space<vmem>>, vector<1x2xf32>
      tpu.vector_store %arg13[%c0_33, %c0_34], %69 {strides = array<i32>} : memref<1x2xf32, #tpu.memory_space<vmem>>, vector<1x2xf32>,
    } else {
    }
    %c2_i32_9 = arith.constant 2 : i32
    %13 = arith.cmpi slt, %1, %c2_i32_9 : i32
    %14 = arith.extui %13 : i1 to i32
    %c0_i32_10 = arith.constant 0 : i32
    %15 = arith.cmpi ne, %14, %c0_i32_10 : i32
    scf.if %15 {
      %c0_12 = arith.constant 0 : index
      %c0_13 = arith.constant 0 : index
      %19 = vector.load %arg3[%c0_12, %c0_13] : memref<16x256xbf16, #tpu.memory_space<vmem>>, vector<16x256xbf16>
      %c0_14 = arith.constant 0 : index
      %c0_15 = arith.constant 0 : index
      %20 = vector.load %arg6[%c0_14, %c0_15] : memref<256x256xbf16, #tpu.memory_space<vmem>>, vector<256x256xbf16>
      %cst = arith.constant dense<0.000000e+00> : vector<16x256xf32>
      %21 = tpu.matmul %19, %20, %cst {dimension_numbers = #tpu.dot_dimension_numbers<[1], [0], [0], [1], [0, 0, 1, 1], [], []>} : vector<16x256xbf16>, vector<256x256xbf16>, vector<16x256xf32> -> vector<16x256xf32>
      %22 = vector.broadcast %5 : vector<1x256xf32> to vector<16x256xf32>
      %23 = arith.addf %21, %22 : vector<16x256xf32>
      %cst_16 = arith.constant 0.000000e+00 : f32
      %24 = vector.broadcast %cst_16 : f32 to vector<16x256xf32>
      %25 = arith.maximumf %23, %24 : vector<16x256xf32>
      %26 = arith.truncf %25 : vector<16x256xf32> to vector<16x256xbf16>
      %c0_17 = arith.constant 0 : index
      %c0_18 = arith.constant 0 : index
      %27 = vector.load %arg8[%c0_17, %c0_18] : memref<256x256xbf16, #tpu.memory_space<vmem>>, vector<256x256xbf16>
      %cst_19 = arith.constant dense<0.000000e+00> : vector<16x256xf32>
      %28 = tpu.matmul %26, %27, %cst_19 {dimension_numbers = #tpu.dot_dimension_numbers<[1], [0], [0], [1], [0, 0, 1, 1], [], []>} : vector<16x256xbf16>, vector<256x256xbf16>, vector<16x256xf32> -> vector<16x256xf32>
      %29 = vector.broadcast %6 : vector<1x256xf32> to vector<16x256xf32>
      %30 = arith.addf %28, %29 : vector<16x256xf32>
      %cst_20 = arith.constant 0.000000e+00 : f32
      %31 = vector.broadcast %cst_20 : f32 to vector<16x256xf32>
      %32 = arith.maximumf %30, %31 : vector<16x256xf32>
      %33 = vector.broadcast %8 : vector<1x256xf32> to vector<16x256xf32>
      %34 = arith.mulf %32, %33 : vector<16x256xf32>
      %cst_21 = arith.constant dense<0.000000e+00> : vector<16xf32>
      %35 = vector.multi_reduction <add>, %34, %cst_21 [1] : vector<16x256xf32> to vector<16xf32>
      %36 = vector.shape_cast %35 : vector<16xf32> to vector<16x1xf32>
      %37 = vector.broadcast %9 : vector<1x1xf32> to vector<16x1xf32>
      %38 = arith.addf %36, %37 : vector<16x1xf32>
      %c0_22 = arith.constant 0 : index
      %c0_23 = arith.constant 0 : index
      %39 = vector.load %arg14[%c0_22, %c0_23] : memref<1x2xf32, #tpu.memory_space<vmem>>, vector<1x2xf32>
      %c0_24 = arith.constant 0 : index
      %c0_25 = arith.constant 0 : index
      %40 = vector.load %arg5[%c0_24, %c0_25] : memref<16x1xf32, #tpu.memory_space<vmem>>, vector<16x1xf32>
      %c16_i32 = arith.constant 16 : i32
      %41 = arith.muli %1, %c16_i32 : i32
      %42 = tpu.iota {dimensions = array<i32: 0>} : vector<16x1xi32>
      %43 = vector.broadcast %41 : i32 to vector<16x1xi32>
      %44 = arith.addi %43, %42 : vector<16x1xi32>
      %c20_i32 = arith.constant 20 : i32
      %45 = vector.broadcast %c20_i32 : i32 to vector<16x1xi32>
      %46 = arith.cmpi slt, %44, %45 : vector<16x1xi32>
      %cst_26 = arith.constant 0.000000e+00 : f32
      %47 = vector.broadcast %cst_26 : f32 to vector<16x1xf32>
      %48 = arith.maximumf %38, %47 : vector<16x1xf32>
      %49 = math.absf %38 : vector<16x1xf32>
      %cst_27 = arith.constant 0.000000e+00 : f32
      %50 = vector.broadcast %cst_27 : f32 to vector<16x1xf32>
      %51 = arith.subf %50, %49 : vector<16x1xf32>
      %52 = math.exp %51 : vector<16x1xf32>
      %53 = math.log1p %52 : vector<16x1xf32>
      %54 = arith.addf %48, %53 : vector<16x1xf32>
      %55 = arith.mulf %40, %54 : vector<16x1xf32>
      %cst_28 = arith.constant 0.000000e+00 : f32
      %56 = vector.broadcast %cst_28 : f32 to vector<16x1xf32>
      %57 = arith.cmpf olt, %38, %56 : vector<16x1xf32>
      %58 = arith.extui %57 : vector<16x1xi1> to vector<16x1xi32>
      %59 = arith.sitofp %58 : vector<16x1xi32> to vector<16x1xf32>
      %cst_29 = arith.constant 0.000000e+00 : f32
      %60 = vector.broadcast %cst_29 : f32 to vector<16x1xf32>
      %61 = arith.select %46, %55, %60 : vector<16x1xi1>, vector<16x1xf32>
      %cst_30 = arith.constant 0.000000e+00 : f32
      %62 = vector.broadcast %cst_30 : f32 to vector<16x1xf32>
      %63 = arith.select %46, %59, %62 : vector<16x1xi1>, vector<16x1xf32>
      %64 = tpu.concatenate %61, %63 in 1 : vector<16x1xf32>, vector<16x1xf32> -> vector<16x2xf32>
      %cst_31 = arith.constant dense<0.000000e+00> : vector<2xf32>
      %65 = vector.multi_reduction <add>, %64, %cst_31 [0] : vector<16x2xf32> to vector<2xf32>
      %66 = vector.shape_cast %65 : vector<2xf32> to vector<1x2xf32>
      %67 = arith.addf %39, %66 : vector<1x2xf32>
      %c0_32 = arith.constant 0 : index
      %c0_33 = arith.constant 0 : index
      %68 = vector.load %arg14[%c0_32, %c0_33] : memref<1x2xf32, #tpu.memory_space<vmem>>, vector<1x2xf32>
      tpu.vector_store %arg14[%c0_32, %c0_33], %67 {strides = array<i32>} : memref<1x2xf32, #tpu.memory_space<vmem>>, vector<1x2xf32>,
    } else {
    }
    %c1_i32 = arith.constant 1 : i32
    %16 = arith.cmpi eq, %arg1, %c1_i32 : i32
    %17 = arith.extui %16 : i1 to i32
    %c0_i32_11 = arith.constant 0 : i32
    %18 = arith.cmpi ne, %17, %c0_i32_11 : i32
    scf.if %18 {
      %c0_12 = arith.constant 0 : index
      %c0_13 = arith.constant 0 : index
      %19 = vector.load %arg13[%c0_12, %c0_13] : memref<1x2xf32, #tpu.memory_space<vmem>>, vector<1x2xf32>
      %c0_14 = arith.constant 0 : index
      %c0_15 = arith.constant 0 : index
      %20 = vector.load %arg14[%c0_14, %c0_15] : memref<1x2xf32, #tpu.memory_space<vmem>>, vector<1x2xf32>
      %21 = tpu.concatenate %19, %20 in 1 : vector<1x2xf32>, vector<1x2xf32> -> vector<1x4xf32>
      %c0_16 = arith.constant 0 : index
      %c0_17 = arith.constant 0 : index
      %c0_18 = arith.constant 0 : index
      %22 = vector.load %arg12[%c0_16, %c0_17, %c0_18] : memref<1x1x4xf32, #tpu.memory_space<vmem>>, vector<1x1x4xf32>
      %23 = vector.shape_cast %22 : vector<1x1x4xf32> to vector<1x4xf32>
      %24 = vector.shape_cast %21 : vector<1x4xf32> to vector<1x1x4xf32>
      tpu.vector_store %arg12[%c0_16, %c0_17, %c0_18], %24 {strides = array<i32>} : memref<1x1x4xf32, #tpu.memory_space<vmem>>, vector<1x1x4xf32>,
    } else {
    }
    return
  }
  func.func @transform_0(%arg0: i32, %arg1: i32) -> (i32, i32) {
    %c2_i32 = arith.constant 2 : i32
    %0 = arith.muli %arg0, %c2_i32 : i32
    %1 = arith.addi %0, %arg1 : i32
    %c2_i32_0 = arith.constant 2 : i32
    %2 = arith.minsi %1, %c2_i32_0 : i32
    %c0_i32 = arith.constant 0 : i32
    %c0_i32_1 = arith.constant 0 : i32
    return %2, %c0_i32 : i32, i32
  }
  func.func @transform_1(%arg0: i32, %arg1: i32) -> (i32, i32) {
    %c2_i32 = arith.constant 2 : i32
    %0 = arith.muli %arg0, %c2_i32 : i32
    %1 = arith.addi %0, %arg1 : i32
    %c1_i32 = arith.constant 1 : i32
    %2 = arith.minsi %1, %c1_i32 : i32
    %c0_i32 = arith.constant 0 : i32
    %c0_i32_0 = arith.constant 0 : i32
    return %2, %c0_i32 : i32, i32
  }
  func.func @transform_2(%arg0: i32, %arg1: i32) -> (i32, i32) {
    %c2_i32 = arith.constant 2 : i32
    %0 = arith.muli %arg0, %c2_i32 : i32
    %1 = arith.addi %0, %arg1 : i32
    %c2_i32_0 = arith.constant 2 : i32
    %2 = arith.minsi %1, %c2_i32_0 : i32
    %c0_i32 = arith.constant 0 : i32
    %c0_i32_1 = arith.constant 0 : i32
    return %2, %c0_i32 : i32, i32
  }
  func.func @transform_3(%arg0: i32, %arg1: i32) -> (i32, i32) {
    %c2_i32 = arith.constant 2 : i32
    %0 = arith.muli %arg0, %c2_i32 : i32
    %1 = arith.addi %0, %arg1 : i32
    %c1_i32 = arith.constant 1 : i32
    %2 = arith.minsi %1, %c1_i32 : i32
    %c0_i32 = arith.constant 0 : i32
    %c0_i32_0 = arith.constant 0 : i32
    return %2, %c0_i32 : i32, i32
  }
  func.func @transform_4(%arg0: i32, %arg1: i32) -> (i32, i32) {
    %c0_i32 = arith.constant 0 : i32
    %c0_i32_0 = arith.constant 0 : i32
    %c0_i32_1 = arith.constant 0 : i32
    return %c0_i32, %c0_i32_0 : i32, i32
  }
  func.func @transform_5(%arg0: i32, %arg1: i32) -> (i32, i32) {
    %c0_i32 = arith.constant 0 : i32
    %c0_i32_0 = arith.constant 0 : i32
    %c0_i32_1 = arith.constant 0 : i32
    return %c0_i32, %c0_i32_0 : i32, i32
  }
  func.func @transform_6(%arg0: i32, %arg1: i32) -> (i32, i32) {
    %c0_i32 = arith.constant 0 : i32
    %c0_i32_0 = arith.constant 0 : i32
    %c0_i32_1 = arith.constant 0 : i32
    return %c0_i32, %c0_i32_0 : i32, i32
  }
  func.func @transform_7(%arg0: i32, %arg1: i32) -> (i32, i32) {
    %c0_i32 = arith.constant 0 : i32
    %c0_i32_0 = arith.constant 0 : i32
    %c0_i32_1 = arith.constant 0 : i32
    return %c0_i32, %c0_i32_0 : i32, i32
  }
  func.func @transform_8(%arg0: i32, %arg1: i32) -> (i32, i32) {
    %c0_i32 = arith.constant 0 : i32
    %c0_i32_0 = arith.constant 0 : i32
    %c0_i32_1 = arith.constant 0 : i32
    return %c0_i32, %c0_i32_0 : i32, i32
  }
  func.func @transform_9(%arg0: i32, %arg1: i32) -> (i32, i32) {
    %c0_i32 = arith.constant 0 : i32
    %c0_i32_0 = arith.constant 0 : i32
    %c0_i32_1 = arith.constant 0 : i32
    return %c0_i32, %c0_i32_0 : i32, i32
  }
  func.func @transform_10(%arg0: i32, %arg1: i32) -> (i32, i32, i32) {
    %c0_i32 = arith.constant 0 : i32
    %c0_i32_0 = arith.constant 0 : i32
    %c0_i32_1 = arith.constant 0 : i32
    return %arg0, %c0_i32, %c0_i32_0 : i32, i32, i32
  }
}

</mosaic_0001>

<bundles_post_ra>
// kernel: tpu_custom_call.1
= control target key start
LH: loop header
LB: loop body
LE: loop exit
PB: predicated region body
PF: predicated region fallthrough
CT: control target
= control target key end

     0   :  { %s3088_s0 = inlined_call_operand.vmem [shape: bf16[36,256], index: 0, kind: input, shape index: {}]   ;;  %s3089_s1 = inlined_call_operand.vmem [shape: bf16[20,256], index: 1, kind: input, shape index: {}]   ;;  %s3090_s2 = inlined_call_operand.vmem [shape: f32[36,1], index: 2, kind: input, shape index: {}]   ;;  %s3091_s3 = inlined_call_operand.vmem [shape: f32[20,1], index: 3, kind: input, shape index: {}]   ;;  %s3092_s4 = inlined_call_operand.hbm [shape: bf16[256,256], index: 4, kind: input, shape index: {}]   ;;  %s3093_s5 = inlined_call_operand.vmem [shape: f32[1,256], index: 5, kind: input, shape index: {}]   ;;  %s3094_s6 = inlined_call_operand.hbm [shape: bf16[256,256], index: 6, kind: input, shape index: {}]   ;;  %s3095_s7 = inlined_call_operand.vmem [shape: f32[1,256], index: 7, kind: input, shape index: {}]   ;;  %s3096_s8 = inlined_call_operand.vmem [shape: bf16[1,256], index: 8, kind: input, shape index: {}]   ;;  %s3097_s9 = inlined_call_operand.<no memory space> [shape: f32[1,1], index: 9, kind: input, shape index: {}]   ;;  %s3098_s10 = inlined_call_operand.hbm [shape: f32[2,1,4], index: 10, kind: output, shape index: {}]  }
   0x1   :  { %3104 = sst [smem:[#allocation21_spill]] %s3092_s4  ;;  %v15_v0 = vstv %s3097_s9 }
   0x2   :  { %3105 = sst [smem:[#allocation22_spill]] %s3094_s6  ;;  %16 = vst [vmem:[#allocation4] sm:$0x1] %v15_v0 }
   0x3   :  { %17 = vsyncpa [#allocation6], 0 }
   0x4   :  { %18 = vsyncpa [#allocation9], 0 }
   0x5   :  { %19 = vsyncpa [#allocation7], 0 }
   0x6   :  { %21 = vsyncpa [#allocation7 + $0x1], 0  ;;  %s2841_s15 = smov 0   ;;  %s2843_s16 = smov 0  }
   0x7   :  { %s2845_s17 = smov 0   ;;  %s2847_s18 = smov 0  }
   0x8   :  { %s2849_s19 = smov 0   ;;  %s2851_s20 = smov 0  }
   0x9   :  { %s2853_s21 = smov 0   ;;  %s2855_s9 = smov 0  }
   0xa LB: > { %3106 = sst [smem:[#allocation14_spill]] %s2750_s17  ;;  %s2114_s22 = sadd.s32 4294967295, %s2770_s9   ;;  %s2770_s9 = sphi %s2855_s9, %s27_s9   ;;  %s2766_s21 = sphi %s2853_s21, %s3131_s21   ;;  %s2762_s20 = sphi %s2851_s20, %s3127_s20   ;;  %s2758_s19 = sphi %s2849_s19, %s3126_s19   ;;  %s2754_s18 = sphi %s2847_s18, %s3125_s18   ;;  %s2750_s17 = sphi %s2845_s17, %s3124_s17   ;;  %s2746_s16 = sphi %s2843_s16, %s3130_s16   ;;  %s2742_s15 = sphi %s2841_s15, %s3129_s15  }
   0xb   : > { %3107 = sst [smem:[#allocation15_spill]] %s2762_s20  ;;  %s2115_s23 = sadd.s32 4294967294, %s2770_s9  }
   0xc   : > { %3108 = sst [smem:[#allocation16_spill]] %s2766_s21  ;;  %s36_s24 = sadd.s32 1, %s2762_s20 }
   0xd   : > { %s39_s25 = sadd.s32 1, %s2766_s21  ;;  %p37_p0 = scmp.ge.s32.totalorder %s36_s24, 2 }
   0xe   : > { %s308_s26 = sadd.s32 1, %s2750_s17  ;;  %p318_p1 = scmp.ne.s32.totalorder %s2750_s17, %s2746_s16 }
   0xf   : > { %p319_p2 = scmp.eq.s32.totalorder %s2114_s22, 3  ;;  %s3133_s24 = smov (%p37_p0, %s36_s24), 0 }
  0x10   : > { %3109 = sst [smem:[#allocation17_spill]] %s3133_s24  ;;  %s3135_s25 = smov (!%p37_p0, %s39_s25), %s2766_s21 }
  0x11   : > { %p2891_p3 = por %p319_p2, %p318_p1  ;;  %p324_p4 = scmp.ne.s32.totalorder %s2746_s16, %s2742_s15 }
  0x12   : > { %p41_p5 = scmp.ge.s32.totalorder %s3135_s25, 2  ;;  %p325_p6 = scmp.eq.s32.totalorder %s2115_s23, 3 }
  0x13   : > { %p2124_p7 = scmp.ge.s32.totalorder %s2770_s9, 1  ;;  %p332_p8 = scmp.lt.s32.totalorder %s2770_s9, 5 }
  0x14   : > { %s3137_s25 = smov (%p41_p5, %s3135_s25), 0  ;;  %p2901_p9 = por %p325_p6, %p324_p4 }
  0x15   : > { %3111 = sst [smem:[#allocation18_spill]] %s3137_s25  ;;  %p2905_p10 = pnand %p2124_p7, %p332_p8 }
  0x16   : > { %s3112_s28 = scalar_select %p2901_p9, 1, 0 }
  0x17   : > { %s305_s30 = ssub.s32 %s2766_s21, %s3137_s25  ;;  %p2304_p12 = pneg %p2905_p10 }
  0x18   : > { %3113 = sst [smem:[#allocation19_spill]] %s3112_s28  ;;  %p306_p11 = scmp.eq.s32.totalorder %s305_s30, 0 }
  0x19   : > { %p2913_p13 = scmp.eq.s32.totalorder %s2114_s22, 0  ;;  %s2772_s13 = smov [#allocation5]  }
  0x1a   : > { %s2918_s12 = scalar_select %p306_p11, %s2750_s17, %s308_s26  }
  0x1b   : > { %s344_s14 = sshll.u32 %s2772_s13, 4  ;;  %p2922_p0 = pnand %p2913_p13, %p2304_p12  ;;  %s345_s14 = int_to_ptr.vmem [resolvable:$true] %s344_s14 }
  0x1c   : > { %3116 = sst [smem:[#allocation20_spill]] %s2918_s12  ;;  %s2629_s30 = scalar_lea.vmem %s345_s14, 4096 }
  0x1d   : > { %p2620_p1 = pneg %p2922_p0  ;;  %p2630_p2 = scmp.ne.s32.totalorder %s345_s14, %s2629_s30 }
  0x1e   : > { %p2637_p6 = scmp.lt.s32.totalorder %s345_s14, %s345_s14  ;;  %p2638_p7 = scmp.lt.s32.totalorder %s2629_s30, %s2629_s30 }
  0x1f   : > { %p2632_p4 = pnand %p2630_p2, %p2620_p1 }
  0x20   : > { %p2639_p8 = por %p2638_p7, %p2637_p6 }
  0x21   : > { %p2633_p5 = pneg %p2632_p4 }
  0x23   : > { %p2640_p11 = pnand %p2639_p8, %p2633_p5 }
  0x25   : > { %2643 = shalt.err (!%p2640_p11)
}
  0x26   : > { %s2773_s22 = smov 128   ;;  %s2774_s26 = smov 8  }
  0x27   : > { %s3118_s4 = sld [smem:[#allocation21_spill]]  ;;  %s2775_s24 = smov [#allocation8]  }
  0x28   : > { %s360_s21 = sshll.u32 %s2775_s24, 4  ;;  %s361_s21 = int_to_ptr.vmem [resolvable:$true] %s360_s21 }
  0x29   : > { %s2655_s20 = scalar_lea.vmem %s361_s21, 4096  ;;  %p2663_p5 = scmp.lt.s32.totalorder %s361_s21, %s361_s21 }
  0x2a   : > { %p2656_p12 = scmp.ne.s32.totalorder %s361_s21, %s2655_s20  ;;  %p2664_p6 = scmp.lt.s32.totalorder %s2655_s20, %s2655_s20 }
  0x2c   : > { %p2658_p2 = pnand %p2656_p12, %p2620_p1  ;;  %p2665_p7 = por %p2664_p6, %p2663_p5 }
  0x2d   : > { %2307 = dma.hbm_to_vmem [thread:$0]  (!%p2922_p0), %s3118_s4, 4096, %s345_s14, [#allocation6], %s2773_s22, %s2773_s22, %s2774_s26  }
  0x2e   : > { %p2659_p4 = pneg %p2658_p2 }
  0x30   : > { %p2666_p8 = pnand %p2665_p7, %p2659_p4 }
  0x32   : > { %2669 = shalt.err (!%p2666_p8)
}
  0x33   : > { %s3119_s6 = sld [smem:[#allocation22_spill]] }
  0x35   : > { %491 = sbr.rel (%p2905_p10) target bundleno = 1758 (0x6de), region = 60 }
  0x39   : > { %2310 = dma.hbm_to_vmem [thread:$0]  (!%p2922_p0), %s3119_s6, 4096, %s361_s21, [#allocation9], %s2773_s22, %s2773_s22, %s2774_s26  }
  0x3a   : > { %2729 = dma.done.wait (%p2913_p13), [#allocation6], 4096  }
  0x3b   : > { %2731 = vsyncadd (%p2913_p13), [#allocation6], 4294963200 }
  0x3c   : > { %2733 = dma.done.wait (%p2913_p13), [#allocation9], 4096  }
  0x3d   : > { %2735 = vsyncadd (%p2913_p13), [#allocation9], 4294963200  ;;  %s2131_s21 = sshll.u32 %s2758_s19, 1  ;;  %s3120_s28 = sand.u32 1, %s2746_s16  }
  0x3e   : > { %s2957_s24 = sadd.s32 %s2754_s18, %s2131_s21  ;;  %s2985_s23 = scalar_lea.vmem [#allocation10], %s3120_s28 }
  0x3f   : > { %p585_p10 = scmp.lt.s32.totalorder %s2957_s24, 2  ;;  %p610_p0 = scmp.lt.s32.totalorder %s2957_s24, 1 }
  0x40   : > { %p2146_p11 = scmp.ne.s32.totalorder %s2754_s18, 0 }
  0x41   : > { %s586_s25 = scalar_select %p585_p10, %s2957_s24, 2 }
  0x42   : > { %s611_s29 = scalar_select %p610_p0, %s2957_s24, 1 }
  0x43   : > { %s2132_s12 = sshll.u32 %s586_s25, 1 }
  0x44   : > { %p593_p1 = scmp.lt.s32.totalorder %s2132_s12, 4  ;;  %s2136_s11 = sshll.u32 %s611_s29, 1 }
  0x45   : > { %p618_p13 = scmp.lt.s32.totalorder %s2136_s11, 2 }
  0x46   : > { %s3139_s12 = smov (!%p593_p1, %s2132_s12), 4  ;;  %682 = sbr.rel (%p2146_p11) target bundleno = 77 (0x4d), region = 72 }
  0x47   : > { %s3141_s11 = smov (!%p618_p13, %s2136_s11), 2  ;;  %s2292_s14 = sshll.u32 %s3139_s12, 3 }
  0x48   : > { %s2966_s26 = scalar_lea.vmem %s3088_s0, %s2292_s14  ;;  %s2293_s13 = sshll.u32 %s3141_s11, 3 }
  0x49   : > { %s2971_s20 = scalar_lea.vmem %s3089_s1, %s2293_s13  ;;  %s2976_s25 = scalar_lea.vmem %s3090_s2, %s2292_s14 }
  0x4a   : > { %s2981_s12 = scalar_lea.vmem %s3091_s3, %s2293_s13 }
  0x4b   : > { %vm683_vm0 = vcmask 8192   ;;  %v2776_v1 = vmov 0.0  }
  0x4c   : > { %684 = vst.msk [vmem:[#allocation2] sm:$0x1] %vm683_vm0, %v2776_v1  ;;  %685 = vst.msk [vmem:[#allocation3] sm:$0x1] %vm683_vm0, %v2776_v1 }
  0x4d PF: > { %v2991_v2 = vld [vmem:[%s3093_s5] sm:$0x3]  ;;  %v3003_v6 = vld [vmem:[#allocation4] sm:$0x1]  ;;  %p2147_p12 = scmp.ge.s32.totalorder %s2957_s24, 3 }
  0x4e   : > { %v2996_v3 = vld [vmem:[%s3095_s7] sm:$0x3]  ;;  %s2214_s22 = sshll.u32 (!%p2147_p12), %s2957_s24, 4 }
  0x4f   : > { %v688_v4 = vld [vmem:[%s3096_s8] sm:$0x3]  ;;  %694 = sbr.rel (%p2147_p12) target bundleno = 843 (0x34b), region = 76 }
  0x50   : > { %v3001_v5 = vunpack.c.l.bf16 %v688_v4 }
  0x54   : > { %v2399_v7 = vld [vmem:[#allocation5 + $0x74] ss:$8 sps:$4 sm:$0xff]   ;;  %v2401_v8 = vld [vmem:[#allocation5 + $0x70] ss:$8 sps:$4 sm:$0xff]   ;;  %v2402_v9 = vld [vmem:[#allocation5 + $0x64] ss:$8 sps:$4 sm:$0xff]  }
  0x55   : > { %910 = vmatprep.subr.bf16.mxu0 %v2399_v7  ;;  %v2404_v10 = vld [vmem:[#allocation5 + $0x60] ss:$8 sps:$4 sm:$0xff]   ;;  %v2405_v11 = vld [vmem:[#allocation5 + $0x54] ss:$8 sps:$4 sm:$0xff]   ;;  %v2407_v12 = vld [vmem:[#allocation5 + $0x50] ss:$8 sps:$4 sm:$0xff]  }
  0x56   : > { %911 = vmatpush1.bf16.msra.mxu0 %v2401_v8  ;;  %v2408_v13 = vld [vmem:[#allocation5 + $0x44] ss:$8 sps:$4 sm:$0xff]   ;;  %v2410_v14 = vld [vmem:[#allocation5 + $0x40] ss:$8 sps:$4 sm:$0xff]   ;;  %v2411_v15 = vld [vmem:[#allocation5 + $0x34] ss:$8 sps:$4 sm:$0xff]  }
  0x57   : > { %912 = vmatprep.subr.bf16.mxu0 %v2402_v9  ;;  %v2413_v16 = vld [vmem:[#allocation5 + $0x30] ss:$8 sps:$4 sm:$0xff]   ;;  %v2414_v17 = vld [vmem:[#allocation5 + $0x24] ss:$8 sps:$4 sm:$0xff]   ;;  %v2416_v18 = vld [vmem:[#allocation5 + $0x20] ss:$8 sps:$4 sm:$0xff]  }
  0x58   : > { %v2417_v19 = vld [vmem:[#allocation5 + $0x14] ss:$8 sps:$4 sm:$0xff]   ;;  %v2419_v20 = vld [vmem:[#allocation5 + $0x10] ss:$8 sps:$4 sm:$0xff]   ;;  %v2420_v21 = vld [vmem:[#allocation5 + $0x4] ss:$8 sps:$4 sm:$0xff]  }
  0x59   : > { %v2449_v22 = vld [vmem:[%s2966_s26 + $0x4] ss:$8 sps:$4 sm:$0xff]   ;;  %v2450_v23 = vld [vmem:[#allocation8 + $0x74] ss:$8 sps:$4 sm:$0xff]   ;;  %v2452_v24 = vld [vmem:[#allocation8 + $0x70] ss:$8 sps:$4 sm:$0xff]  }
  0x5a   : > { %913 = vmatpush1.bf16.msra.mxu0 %v2404_v10  ;;  %942 = vmatprep.mubr.bf16.mxu0 %v2449_v22  ;;  %v2453_v25 = vld [vmem:[#allocation8 + $0x64] ss:$8 sps:$4 sm:$0xff]   ;;  %v2455_v26 = vld [vmem:[#allocation8 + $0x60] ss:$8 sps:$4 sm:$0xff]   ;;  %v2456_v28 = vld [vmem:[#allocation8 + $0x54] ss:$8 sps:$4 sm:$0xff]  }
  0x5b   : > { %914 = vmatprep.subr.bf16.mxu0 %v2405_v11  ;;  %1162 = vmatprep.subr.bf16.mxu1 %v2450_v23  ;;  %v2422_v27 = vld [vmem:[#allocation5] ss:$8 sps:$4 sm:$0xff]   ;;  %v2423_v29 = vld [vmem:[#allocation5 + $0xf4] ss:$8 sps:$4 sm:$0xff]   ;;  %v2458_v30 = vld [vmem:[#allocation8 + $0x50] ss:$8 sps:$4 sm:$0xff]  }
  0x5c   : > { %1163 = vmatpush1.bf16.msra.mxu1 %v2452_v24  ;;  %v2425_v31 = vld [vmem:[#allocation5 + $0xf0] ss:$8 sps:$4 sm:$0xff]   ;;  %v2459_v32 = vld [vmem:[#allocation8 + $0x44] ss:$8 sps:$4 sm:$0xff]   ;;  %v2461_v34 = vld [vmem:[#allocation8 + $0x40] ss:$8 sps:$4 sm:$0xff]  }
  0x5d   : > { %1164 = vmatprep.subr.bf16.mxu1 %v2453_v25  ;;  %v2426_v33 = vld [vmem:[#allocation5 + $0xe4] ss:$8 sps:$4 sm:$0xff]   ;;  %v2428_v35 = vld [vmem:[#allocation5 + $0xe0] ss:$8 sps:$4 sm:$0xff]   ;;  %v2462_v36 = vld [vmem:[#allocation8 + $0x34] ss:$8 sps:$4 sm:$0xff]  }
  0x5e   : > { %915 = vmatpush1.bf16.msra.mxu0 %v2407_v12  ;;  %v2429_v37 = vld [vmem:[#allocation5 + $0xd4] ss:$8 sps:$4 sm:$0xff]   ;;  %v2431_v38 = vld [vmem:[#allocation5 + $0xd0] ss:$8 sps:$4 sm:$0xff]   ;;  %v2432_v40 = vld [vmem:[#allocation5 + $0xc4] ss:$8 sps:$4 sm:$0xff]  }
  0x5f   : > { %916 = vmatprep.subr.bf16.mxu0 %v2408_v13  ;;  %v2464_v39 = vld [vmem:[#allocation8 + $0x30] ss:$8 sps:$4 sm:$0xff]   ;;  %v2465_v41 = vld [vmem:[#allocation8 + $0x24] ss:$8 sps:$4 sm:$0xff]   ;;  %v2467_v42 = vld [vmem:[#allocation8 + $0x20] ss:$8 sps:$4 sm:$0xff]   ;;  %v730_v13 = vlaneseq }
  0x60   : > { %1165 = vmatpush1.bf16.msra.mxu1 %v2455_v26  ;;  %v2434_v43 = vld [vmem:[#allocation5 + $0xc0] ss:$8 sps:$4 sm:$0xff]   ;;  %v2468_v44 = vld [vmem:[#allocation8 + $0x14] ss:$8 sps:$4 sm:$0xff]   ;;  %v2470_v46 = vld [vmem:[#allocation8 + $0x10] ss:$8 sps:$4 sm:$0xff]  }
  0x61   : > { %1166 = vmatprep.subr.bf16.mxu1 %v2456_v28  ;;  %v2435_v45 = vld [vmem:[#allocation5 + $0xb4] ss:$8 sps:$4 sm:$0xff]   ;;  %v2437_v47 = vld [vmem:[#allocation5 + $0xb0] ss:$8 sps:$4 sm:$0xff]   ;;  %v2471_v48 = vld [vmem:[#allocation8 + $0x4] ss:$8 sps:$4 sm:$0xff]  }
  0x62   : > { %917 = vmatpush1.bf16.msra.mxu0 %v2410_v14  ;;  %v2438_v49 = vld [vmem:[#allocation5 + $0xa4] ss:$8 sps:$4 sm:$0xff]   ;;  %v2473_v50 = vld [vmem:[#allocation8] ss:$8 sps:$4 sm:$0xff]   ;;  %v2474_v52 = vld [vmem:[#allocation8 + $0xf4] ss:$8 sps:$4 sm:$0xff]  }
  0x63   : > { %918 = vmatprep.subr.bf16.mxu0 %v2411_v15  ;;  %v2440_v51 = vld [vmem:[#allocation5 + $0xa0] ss:$8 sps:$4 sm:$0xff]   ;;  %v2441_v53 = vld [vmem:[#allocation5 + $0x94] ss:$8 sps:$4 sm:$0xff]   ;;  %v2476_v54 = vld [vmem:[#allocation8 + $0xf0] ss:$8 sps:$4 sm:$0xff]  }
  0x64   : > { %1167 = vmatpush1.bf16.msra.mxu1 %v2458_v30  ;;  %v2443_v55 = vld [vmem:[#allocation5 + $0x90] ss:$8 sps:$4 sm:$0xff]   ;;  %v2477_v56 = vld [vmem:[#allocation8 + $0xe4] ss:$8 sps:$4 sm:$0xff]   ;;  %v2479_v58 = vld [vmem:[#allocation8 + $0xe0] ss:$8 sps:$4 sm:$0xff]  }
  0x65   : > { %1168 = vmatprep.subr.bf16.mxu1 %v2459_v32  ;;  %v2444_v57 = vld [vmem:[#allocation5 + $0x84] ss:$8 sps:$4 sm:$0xff]   ;;  %v2446_v59 = vld [vmem:[#allocation5 + $0x80] ss:$8 sps:$4 sm:$0xff]   ;;  %v2480_v60 = vld [vmem:[#allocation8 + $0xd4] ss:$8 sps:$4 sm:$0xff]  }
  0x66   : > { %919 = vmatpush1.bf16.msra.mxu0 %v2413_v16  ;;  %v2447_v61 = vld [vmem:[%s2966_s26] ss:$8 sps:$4 sm:$0xff]   ;;  %v2482_v62 = vld [vmem:[#allocation8 + $0xd0] ss:$8 sps:$4 sm:$0xff]   ;;  %v731_v14 = vshrl.u32 %v730_v13, 7  ;;  %s2778_s26 = smov 1  }
  0x67   : > { %920 = vmatprep.subr.bf16.mxu0 %v2414_v17  ;;  %v2483_v63 = vld [vmem:[#allocation8 + $0xc4] ss:$8 sps:$4 sm:$0xff]   ;;  %v2485_v0 = vld [vmem:[#allocation8 + $0xc0] ss:$8 sps:$4 sm:$0xff]   ;;  %v2486_v1 = vld [vmem:[#allocation8 + $0xb4] ss:$8 sps:$4 sm:$0xff]  }
  0x68   : > { %1169 = vmatpush1.bf16.msra.mxu1 %v2461_v34  ;;  %v2488_v4 = vld [vmem:[#allocation8 + $0xb0] ss:$8 sps:$4 sm:$0xff]   ;;  %v2489_v7 = vld [vmem:[#allocation8 + $0xa4] ss:$8 sps:$4 sm:$0xff]   ;;  %v2491_v8 = vld [vmem:[#allocation8 + $0xa0] ss:$8 sps:$4 sm:$0xff]  }
  0x69   : > { %1170 = vmatprep.subr.bf16.mxu1 %v2462_v36  ;;  %v2492_v9 = vld [vmem:[#allocation8 + $0x94] ss:$8 sps:$4 sm:$0xff]   ;;  %v2494_v10 = vld [vmem:[#allocation8 + $0x90] ss:$8 sps:$4 sm:$0xff]   ;;  %v2495_v11 = vld [vmem:[#allocation8 + $0x84] ss:$8 sps:$4 sm:$0xff]  }
  0x6a   : > { %921 = vmatpush1.bf16.msra.mxu0 %v2416_v18  ;;  %v2497_v12 = vld [vmem:[#allocation8 + $0x80] ss:$8 sps:$4 sm:$0xff]   ;;  %v736_v15 = vsub.s32 1, %v731_v14  ;;  %v732_v16 = vsub.s32 0, %v731_v14  ;;  %vm1310_vm7 = vcmask 7168   ;;  %vm1313_vm8 = vcmask 15360  }
  0x6b   : > { %922 = vmatprep.subr.bf16.mxu0 %v2417_v19  ;;  %vm1324_vm9 = vcmask 8192  }
  0x6c   : > { %1171 = vmatpush1.bf16.msra.mxu1 %v2464_v39  ;;  %v737_v18 = vrot.slane %v2991_v2, %v736_v15  ;;  %v733_v19 = vrot.slane %v2991_v2, %v732_v16  ;;  %v995_v34 = vrot.slane %v2996_v3, %v732_v16  ;;  %v1213_v36 = vrot.slane %v3001_v5, %v732_v16 }
  0x6d   : > { %1172 = vmatprep.subr.bf16.mxu1 %v2465_v41 }
  0x6e   : > { %923 = vmatpush1.bf16.msra.mxu0 %v2419_v20 }
  0x6f   : > { %924 = vmatprep.subr.bf16.mxu0 %v2420_v21 }
  0x70   : > { %1173 = vmatpush1.bf16.msra.mxu1 %v2467_v42 }
  0x71   : > { %1174 = vmatprep.subr.bf16.mxu1 %v2468_v44 }
  0x72   : > { %925 = vmatpush1.bf16.msra.mxu0 %v2422_v27 }
  0x73   : > { %926 = vmatprep.subr.bf16.mxu0 %v2423_v29 }
  0x74   : > { %1175 = vmatpush1.bf16.msra.mxu1 %v2470_v46 }
  0x75   : > { %1176 = vmatprep.subr.bf16.mxu1 %v2471_v48 }
  0x76   : > { %927 = vmatpush2.bf16.msra.mxu0 %v2425_v31 }
  0x77   : > { %928 = vmatprep.subr.bf16.mxu0 %v2426_v33  ;;  %v1216_v33 = vsub.s32 2, %v731_v14 }
  0x78   : > { %1177 = vmatpush1.bf16.msra.mxu1 %v2473_v50 }
  0x79   : > { %1178 = vmatprep.subr.bf16.mxu1 %v2474_v52 }
  0x7a   : > { %929 = vmatpush2.bf16.msra.mxu0 %v2428_v35  ;;  %v999_v35 = vrot.slane %v2996_v3, %v736_v15 }
  0x7b   : > { %930 = vmatprep.subr.bf16.mxu0 %v2429_v37  ;;  %v1217_v37 = vrot.slane %v3001_v5, %v1216_v33 }
  0x7c   : > { %1179 = vmatpush2.bf16.msra.mxu1 %v2476_v54 }
  0x7d   : > { %1180 = vmatprep.subr.bf16.mxu1 %v2477_v56  ;;  %v1227_v44 = vrot.slane %v1217_v37, %v732_v16 }
  0x7e   : > { %931 = vmatpush2.bf16.msra.mxu0 %v2431_v38 }
  0x7f   : > { %932 = vmatprep.subr.bf16.mxu0 %v2432_v40 }
  0x80   : > { %1181 = vmatpush2.bf16.msra.mxu1 %v2479_v58  ;;  %v1242_v58 = vrot.slane %v3003_v6, %v732_v16 }
  0x81   : > { %1182 = vmatprep.subr.bf16.mxu1 %v2480_v60  ;;  %v1253_v60 = vstv %s2214_s22 }
  0x82   : > { %933 = vmatpush2.bf16.msra.mxu0 %v2434_v43  ;;  %v1223_v43 = vrot.slane %v1213_v36, %v732_v16  ;;  %v1247_v36 = vld [vmem:[%s2976_s25] sm:$0xff] }
  0x83   : > { %934 = vmatprep.subr.bf16.mxu0 %v2435_v45 }
  0x84   : > { %1183 = vmatpush2.bf16.msra.mxu1 %v2482_v62 }
  0x85   : > { %1184 = vmatprep.subr.bf16.mxu1 %v2483_v63  ;;  %v1254_v63 = vadd.s32 %v1253_v60, %v731_v14 }
  0x86   : > { %935 = vmatpush2.bf16.msra.mxu0 %v2437_v47 }
  0x87   : > { %936 = vmatprep.subr.bf16.mxu0 %v2438_v49  ;;  %vm1256_vm2 = vcmp.lt.s32.totalorder %v1254_v63, 36 }
  0x88   : > { %1185 = vmatpush2.bf16.msra.mxu1 %v2485_v0 }
  0x89   : > { %1186 = vmatprep.subr.bf16.mxu1 %v2486_v1 }
  0x8a   : > { %937 = vmatpush2.bf16.msra.mxu0 %v2440_v51 }
  0x8b   : > { %938 = vmatprep.subr.bf16.mxu0 %v2441_v53 }
  0x8c   : > { %1187 = vmatpush2.bf16.msra.mxu1 %v2488_v4 }
  0x8d   : > { %1188 = vmatprep.subr.bf16.mxu1 %v2489_v7 }
  0x8e   : > { %939 = vmatpush2.bf16.msra.mxu0 %v2443_v55 }
  0x8f   : > { %940 = vmatprep.subr.bf16.mxu0 %v2444_v57 }
  0x90   : > { %1189 = vmatpush2.bf16.msra.mxu1 %v2491_v8 }
  0x91   : > { %1190 = vmatprep.subr.bf16.mxu1 %v2492_v9  ;;  %v2777_v9 = vmov 0.0  }
  0x92   : > { %941 = vmatpush2.bf16.msra.mxu0 %v2446_v59  ;;  %v1252_v59 = vadd.s32 8, %v731_v14 }
  0x94   : > { %1191 = vmatpush2.bf16.msra.mxu1 %v2494_v10  ;;  %v1255_v0 = vadd.s32 %v1253_v60, %v1252_v59 }
  0x95   : > { %943 = vmatmul.mubr.bf16.vlgmr.msra.gmra.mxu0 %v2447_v61  ;;  %1192 = vmatprep.subr.bf16.mxu1 %v2495_v11 }
  0x96   : > { %vm1257_vm3 = vcmp.lt.s32.totalorder %v1255_v0, 36 }
  0x98   : > { %1193 = vmatpush2.bf16.msra.mxu1 %v2497_v12 }
 0x155   : > { %v944_v17 = vpop.f32.mrf.mxu0 }
 0x156   : > { %v945_v24 = vadd.f32 %v944_v17, %v733_v19 }
 0x157   : > { %v946_v20 = vpop.f32.mrf.mxu0 }
 0x158   : > { %v947_v22 = vadd.f32 %v946_v20, %v737_v18  ;;  %v953_v30 = vmax.f32 %v945_v24, 0.0 }
 0x159   : > { %v948_v21 = vpop.f32.mrf.mxu0 }
 0x15a   : > { %v949_v23 = vadd.f32 %v948_v21, %v733_v19  ;;  %v954_v28 = vmax.f32 %v947_v22, 0.0 }
 0x15b   : > { %v950_v25 = vpop.f32.mrf.mxu0 }
 0x15c   : > { %v951_v26 = vadd.f32 %v950_v25, %v737_v18  ;;  %v955_v27 = vmax.f32 %v949_v23, 0.0 }
 0x15e   : > { %v956_v29 = vmax.f32 %v951_v26, 0.0  ;;  %v957_v32 = vpack.c.bf16 %v955_v27, %v953_v30 }
 0x160   : > { %v958_v31 = vpack.c.bf16 %v956_v29, %v954_v28 }
 0x162   : > { %1194 = vmatprep.mubr.bf16.mxu1 %v958_v31 }
 0x163   : > { %1195 = vmatmul.mubr.bf16.vlgmr.msra.gmra.mxu1 %v957_v32 }
 0x223   : > { %v1196_v38 = vpop.f32.mrf.mxu1 }
 0x224   : > { %v1197_v39 = vadd.f32 %v1196_v38, %v995_v34 }
 0x225   : > { %v1198_v40 = vpop.f32.mrf.mxu1 }
 0x226   : > { %v1205_v41 = vmax.f32 %v1197_v39, 0.0  ;;  %v1199_v42 = vadd.f32 %v1198_v40, %v999_v35 }
 0x227   : > { %v1200_v45 = vpop.f32.mrf.mxu1 }
 0x228   : > { %v1206_v46 = vmax.f32 %v1199_v42, 0.0  ;;  %v1201_v47 = vadd.f32 %v1200_v45, %v995_v34  ;;  %v1228_v51 = vmul.f32 %v1223_v43, %v1205_v41 }
 0x229   : > { %v1202_v48 = vpop.f32.mrf.mxu1 }
 0x22a   : > { %v1207_v49 = vmax.f32 %v1201_v47, 0.0  ;;  %v1203_v50 = vadd.f32 %v1202_v48, %v999_v35  ;;  %v1229_v52 = vmul.f32 %v1227_v44, %v1206_v46 }
 0x22c   : > { %v1208_v53 = vmax.f32 %v1203_v50, 0.0  ;;  %v1232_v54 = vadd.f32 %v1229_v52, %v1228_v51  ;;  %v1230_v55 = vmul.f32 %v1223_v43, %v1207_v49 }
 0x22e   : > { %v1231_v56 = vmul.f32 %v1227_v44, %v1208_v53  ;;  %1233 = vadd.xlane.f32.xlu0 %v1232_v54  ;;  %v1248_v44 = vld [vmem:[%s2976_s25 + $0x8] sm:$0xff] }
 0x230   : > { %v1235_v57 = vadd.f32 %v1231_v56, %v1230_v55 }
 0x232   : > { %1236 = vadd.xlane.f32.xlu0 %v1235_v57 }
 0x2b7   : > { %v1234_v61 = vpop.xlane.xlu0 %1233 }
 0x2b8   : > { %v1244_v62 = vadd.f32 %v1242_v58, %v1234_v61 }
 0x2ba   : > { %v1258_v1 = vsub.f32 0.0, %v1244_v62  ;;  %vm1292_vm1 = vcmp.ge.f32.partialorder %v1244_v62, 0.0  ;;  %v1246_v62 = vld [vmem:[#allocation2] sm:$0x1] }
 0x2bb   : > { %v1237_v4 = vpop.xlane.xlu0 %1236  ;;  %v2215_v10 = vsel %vm1292_vm1, 1.0, %v2777_v9 }
 0x2bc   : > { %v1262_v7 = vand.u32 2147483647, %v1258_v1  ;;  %v1245_v8 = vadd.f32 %v1242_v58, %v1237_v4  ;;  %v1300_v17 = vsel %vm1256_vm2, %v2215_v10, 0.0  ;;  %v1260_v33 = vmax.f32 %v1258_v1, 0.0 }
 0x2be   : > { %v1264_v11 = vsub.f32 0.0, %v1262_v7  ;;  %v1259_v12 = vsub.f32 0.0, %v1245_v8  ;;  %vm1293_vm4 = vcmp.ge.f32.partialorder %v1245_v8, 0.0 }
 0x2bf   : > { %v2216_v13 = vsel %vm1293_vm4, 1.0, %v2777_v9 }
 0x2c0   : > { %v1266_v15 = vmul.f32 1.442695, %v1264_v11  ;;  %v1263_v16 = vand.u32 2147483647, %v1259_v12  ;;  %v1301_v14 = vsel %vm1257_vm3, %v2216_v13, 0.0  ;;  %v1261_v41 = vmax.f32 %v1259_v12, 0.0 }
 0x2c1   : > { %v2394_v18 = vpack.i.bf16 %v1301_v14, %v1300_v17 }
 0x2c2   : > { %2498 = vpow2.f32 %v1266_v15  ;;  %v1265_v19 = vsub.f32 0.0, %v1263_v16 }
 0x2c3   : > { %2395 = vrot.lane.b32.xlu1 %v2394_v18, %s2778_s26 }
 0x2c4   : > { %v1268_v20 = vmul.f32 1.442695, %v1265_v19 }
 0x2c6   : > { %2500 = vpow2.f32 %v1268_v20 }
 0x2cf   : > { %v2499_v21 = vpop.eup %2498 }
 0x2d0   : > { %v1270_v22 = vadd.f32 1.0, %v2499_v21  ;;  %v1273_v25 = vmul.f32 -0.5, %v2499_v21  ;;  %v1276_v28 = vand.u32 2147483647, %v2499_v21 }
 0x2d2   : > { %2502 = vlog2.f32 %v1270_v22  ;;  %v1274_v26 = vadd.f32 1.0, %v1273_v25  ;;  %vm1277_vm5 = vcmp.lt.f32.partialorder %v1276_v28, 0.0004427343 }
 0x2d3   : > { %v2501_v23 = vpop.eup %2500 }
 0x2d4   : > { %v1279_v24 = vadd.f32 1.0, %v2501_v23  ;;  %v1282_v27 = vmul.f32 -0.5, %v2501_v23  ;;  %v1275_v31 = vmul.f32 %v2499_v21, %v1274_v26  ;;  %v1285_v34 = vand.u32 2147483647, %v2501_v23 }
 0x2d6   : > { %2504 = vlog2.f32 %v1279_v24  ;;  %v1283_v32 = vadd.f32 1.0, %v1282_v27  ;;  %vm1286_vm6 = vcmp.lt.f32.partialorder %v1285_v34, 0.0004427343 }
 0x2d8   : > { %v1284_v40 = vmul.f32 %v2501_v23, %v1283_v32 }
 0x2df   : > { %v2503_v29 = vpop.eup %2502 }
 0x2e0   : > { %v1272_v30 = vmul.f32 0.6931472, %v2503_v29 }
 0x2e2   : > { %v1278_v35 = vsel %vm1277_vm5, %v1275_v31, %v1272_v30 }
 0x2e3   : > { %v2505_v37 = vpop.eup %2504  ;;  %v1288_v38 = vadd.f32 %v1278_v35, %v1260_v33 }
 0x2e4   : > { %v1281_v39 = vmul.f32 0.6931472, %v2505_v37 }
 0x2e5   : > { %v1290_v42 = vmul.f32 %v1288_v38, %v1247_v36 }
 0x2e6   : > { %v1287_v43 = vsel %vm1286_vm6, %v1284_v40, %v1281_v39 }
 0x2e7   : > { %v1289_v45 = vadd.f32 %v1287_v43, %v1261_v41  ;;  %v1298_v46 = vsel %vm1256_vm2, %v1290_v42, 0.0 }
 0x2e9   : > { %v1291_v47 = vmul.f32 %v1289_v45, %v1248_v44 }
 0x2eb   : > { %v1299_v48 = vsel %vm1257_vm3, %v1291_v47, 0.0 }
 0x335   : > { %v2396_v49 = vpop.permute.xlu1 %2395 }
 0x336   : > { %v2398_v50 = vunpack.i.h.bf16 %v2396_v49  ;;  %v2397_v51 = vunpack.i.l.bf16 %v2396_v49 }
 0x338   : > { %v1311_v52 = vsel %vm1310_vm7, %v1298_v46, %v2397_v51  ;;  %v1312_v53 = vsel %vm1310_vm7, %v1299_v48, %v2398_v50 }
 0x339   : > { %v1314_v54 = vsel %vm1313_vm8, %v1311_v52, 0.0  ;;  %v1315_v55 = vsel %vm1313_vm8, %v1312_v53, 0.0 }
 0x33a   : > { %v1316_v56 = vadd.f32 %v1315_v55, %v1314_v54 }
 0x33c   : > { %v1317_v57 = vrot.slane %v1316_v56, 4 }
 0x33e   : > { %v1318_v58 = vadd.f32 %v1317_v57, %v1316_v56 }
 0x340   : > { %v1319_v59 = vrot.slane %v1318_v58, 2 }
 0x342   : > { %v1320_v60 = vadd.f32 %v1319_v59, %v1318_v58 }
 0x344   : > { %v1321_v61 = vrot.slane %v1320_v60, 1 }
 0x346   : > { %v1322_v63 = vadd.f32 %v1321_v61, %v1320_v60 }
 0x348   : > { %v1323_v0 = vadd.f32 %v1322_v63, %v1246_v62 }
 0x34a   : > { %1325 = vst.msk [vmem:[#allocation2] sm:$0x1] %vm1324_vm9, %v1323_v0 }
 0x34b PF: > { %p2217_p2 = scmp.ge.s32.totalorder %s2957_s24, 2 }
 0x34d   : > { %1329 = sbr.rel (%p2217_p2) target bundleno = 1609 (0x649), region = 80 }
 0x352   : > { %v2511_v1 = vld [vmem:[#allocation5 + $0x74] ss:$8 sps:$4 sm:$0xff]   ;;  %v2513_v4 = vld [vmem:[#allocation5 + $0x70] ss:$8 sps:$4 sm:$0xff]   ;;  %v2514_v7 = vld [vmem:[#allocation5 + $0x64] ss:$8 sps:$4 sm:$0xff]  }
 0x353   : > { %1545 = vmatprep.subr.bf16.mxu0 %v2511_v1  ;;  %v2516_v8 = vld [vmem:[#allocation5 + $0x60] ss:$8 sps:$4 sm:$0xff]   ;;  %v2517_v9 = vld [vmem:[#allocation5 + $0x54] ss:$8 sps:$4 sm:$0xff]   ;;  %v2519_v10 = vld [vmem:[#allocation5 + $0x50] ss:$8 sps:$4 sm:$0xff]  }
 0x354   : > { %1546 = vmatpush1.bf16.msra.mxu0 %v2513_v4  ;;  %v2520_v11 = vld [vmem:[#allocation5 + $0x44] ss:$8 sps:$4 sm:$0xff]   ;;  %v2522_v12 = vld [vmem:[#allocation5 + $0x40] ss:$8 sps:$4 sm:$0xff]   ;;  %v2523_v13 = vld [vmem:[#allocation5 + $0x34] ss:$8 sps:$4 sm:$0xff]  }
 0x355   : > { %1547 = vmatprep.subr.bf16.mxu0 %v2514_v7  ;;  %v2525_v15 = vld [vmem:[#allocation5 + $0x30] ss:$8 sps:$4 sm:$0xff]   ;;  %v2526_v16 = vld [vmem:[#allocation5 + $0x24] ss:$8 sps:$4 sm:$0xff]   ;;  %v2528_v17 = vld [vmem:[#allocation5 + $0x20] ss:$8 sps:$4 sm:$0xff]  }
 0x356   : > { %v2529_v14 = vld [vmem:[#allocation5 + $0x14] ss:$8 sps:$4 sm:$0xff]   ;;  %v2531_v18 = vld [vmem:[#allocation5 + $0x10] ss:$8 sps:$4 sm:$0xff]   ;;  %v2532_v19 = vld [vmem:[#allocation5 + $0x4] ss:$8 sps:$4 sm:$0xff]  }
 0x357   : > { %v2561_v20 = vld [vmem:[%s2971_s20 + $0x4] ss:$8 sps:$4 sm:$0xff]   ;;  %v2562_v21 = vld [vmem:[#allocation8 + $0x74] ss:$8 sps:$4 sm:$0xff]   ;;  %v2564_v22 = vld [vmem:[#allocation8 + $0x70] ss:$8 sps:$4 sm:$0xff]  }
 0x358   : > { %1548 = vmatpush1.bf16.msra.mxu0 %v2516_v8  ;;  %1577 = vmatprep.mubr.bf16.mxu0 %v2561_v20  ;;  %v2565_v23 = vld [vmem:[#allocation8 + $0x64] ss:$8 sps:$4 sm:$0xff]   ;;  %v2567_v24 = vld [vmem:[#allocation8 + $0x60] ss:$8 sps:$4 sm:$0xff]   ;;  %v2568_v26 = vld [vmem:[#allocation8 + $0x54] ss:$8 sps:$4 sm:$0xff]  }
 0x359   : > { %1549 = vmatprep.subr.bf16.mxu0 %v2517_v9  ;;  %1797 = vmatprep.subr.bf16.mxu1 %v2562_v21  ;;  %v2534_v25 = vld [vmem:[#allocation5] ss:$8 sps:$4 sm:$0xff]   ;;  %v2535_v27 = vld [vmem:[#allocation5 + $0xf4] ss:$8 sps:$4 sm:$0xff]   ;;  %v2570_v28 = vld [vmem:[#allocation8 + $0x50] ss:$8 sps:$4 sm:$0xff]  }
 0x35a   : > { %1798 = vmatpush1.bf16.msra.mxu1 %v2564_v22  ;;  %v2537_v29 = vld [vmem:[#allocation5 + $0xf0] ss:$8 sps:$4 sm:$0xff]   ;;  %v2571_v30 = vld [vmem:[#allocation8 + $0x44] ss:$8 sps:$4 sm:$0xff]   ;;  %v2573_v32 = vld [vmem:[#allocation8 + $0x40] ss:$8 sps:$4 sm:$0xff]  }
 0x35b   : > { %1799 = vmatprep.subr.bf16.mxu1 %v2565_v23  ;;  %v2538_v31 = vld [vmem:[#allocation5 + $0xe4] ss:$8 sps:$4 sm:$0xff]   ;;  %v2540_v33 = vld [vmem:[#allocation5 + $0xe0] ss:$8 sps:$4 sm:$0xff]   ;;  %v2574_v34 = vld [vmem:[#allocation8 + $0x34] ss:$8 sps:$4 sm:$0xff]  }
 0x35c   : > { %1550 = vmatpush1.bf16.msra.mxu0 %v2519_v10  ;;  %v2541_v35 = vld [vmem:[#allocation5 + $0xd4] ss:$8 sps:$4 sm:$0xff]   ;;  %v2543_v36 = vld [vmem:[#allocation5 + $0xd0] ss:$8 sps:$4 sm:$0xff]   ;;  %v2544_v38 = vld [vmem:[#allocation5 + $0xc4] ss:$8 sps:$4 sm:$0xff]  }
 0x35d   : > { %1551 = vmatprep.subr.bf16.mxu0 %v2520_v11  ;;  %v2576_v37 = vld [vmem:[#allocation8 + $0x30] ss:$8 sps:$4 sm:$0xff]   ;;  %v2577_v39 = vld [vmem:[#allocation8 + $0x24] ss:$8 sps:$4 sm:$0xff]   ;;  %v2579_v40 = vld [vmem:[#allocation8 + $0x20] ss:$8 sps:$4 sm:$0xff]   ;;  %v1365_v11 = vlaneseq }
 0x35e   : > { %1800 = vmatpush1.bf16.msra.mxu1 %v2567_v24  ;;  %v2546_v41 = vld [vmem:[#allocation5 + $0xc0] ss:$8 sps:$4 sm:$0xff]   ;;  %v2580_v42 = vld [vmem:[#allocation8 + $0x14] ss:$8 sps:$4 sm:$0xff]   ;;  %v2582_v44 = vld [vmem:[#allocation8 + $0x10] ss:$8 sps:$4 sm:$0xff]  }
 0x35f   : > { %1801 = vmatprep.subr.bf16.mxu1 %v2568_v26  ;;  %v2547_v43 = vld [vmem:[#allocation5 + $0xb4] ss:$8 sps:$4 sm:$0xff]   ;;  %v2549_v45 = vld [vmem:[#allocation5 + $0xb0] ss:$8 sps:$4 sm:$0xff]   ;;  %v2583_v46 = vld [vmem:[#allocation8 + $0x4] ss:$8 sps:$4 sm:$0xff]  }
 0x360   : > { %1552 = vmatpush1.bf16.msra.mxu0 %v2522_v12  ;;  %v2550_v47 = vld [vmem:[#allocation5 + $0xa4] ss:$8 sps:$4 sm:$0xff]   ;;  %v2585_v48 = vld [vmem:[#allocation8] ss:$8 sps:$4 sm:$0xff]   ;;  %v2586_v50 = vld [vmem:[#allocation8 + $0xf4] ss:$8 sps:$4 sm:$0xff]  }
 0x361   : > { %1553 = vmatprep.subr.bf16.mxu0 %v2523_v13  ;;  %v2552_v49 = vld [vmem:[#allocation5 + $0xa0] ss:$8 sps:$4 sm:$0xff]   ;;  %v2553_v51 = vld [vmem:[#allocation5 + $0x94] ss:$8 sps:$4 sm:$0xff]   ;;  %v2588_v52 = vld [vmem:[#allocation8 + $0xf0] ss:$8 sps:$4 sm:$0xff]  }
 0x362   : > { %1802 = vmatpush1.bf16.msra.mxu1 %v2570_v28  ;;  %v2555_v53 = vld [vmem:[#allocation5 + $0x90] ss:$8 sps:$4 sm:$0xff]   ;;  %v2589_v54 = vld [vmem:[#allocation8 + $0xe4] ss:$8 sps:$4 sm:$0xff]   ;;  %v2591_v56 = vld [vmem:[#allocation8 + $0xe0] ss:$8 sps:$4 sm:$0xff]  }
 0x363   : > { %1803 = vmatprep.subr.bf16.mxu1 %v2571_v30  ;;  %v2556_v55 = vld [vmem:[#allocation5 + $0x84] ss:$8 sps:$4 sm:$0xff]   ;;  %v2558_v57 = vld [vmem:[#allocation5 + $0x80] ss:$8 sps:$4 sm:$0xff]   ;;  %v2592_v58 = vld [vmem:[#allocation8 + $0xd4] ss:$8 sps:$4 sm:$0xff]  }
 0x364   : > { %1554 = vmatpush1.bf16.msra.mxu0 %v2525_v15  ;;  %v2559_v59 = vld [vmem:[%s2971_s20] ss:$8 sps:$4 sm:$0xff]   ;;  %v2594_v60 = vld [vmem:[#allocation8 + $0xd0] ss:$8 sps:$4 sm:$0xff]   ;;  %v1366_v12 = vshrl.u32 %v1365_v11, 7  ;;  %s2284_s20 = sshll.u32 %s2957_s24, 4 }
 0x365   : > { %1555 = vmatprep.subr.bf16.mxu0 %v2526_v16  ;;  %v2595_v61 = vld [vmem:[#allocation8 + $0xc4] ss:$8 sps:$4 sm:$0xff]   ;;  %v2597_v62 = vld [vmem:[#allocation8 + $0xc0] ss:$8 sps:$4 sm:$0xff]   ;;  %v2598_v63 = vld [vmem:[#allocation8 + $0xb4] ss:$8 sps:$4 sm:$0xff]  }
 0x366   : > { %1804 = vmatpush1.bf16.msra.mxu1 %v2573_v32  ;;  %v2600_v0 = vld [vmem:[#allocation8 + $0xb0] ss:$8 sps:$4 sm:$0xff]   ;;  %v2601_v1 = vld [vmem:[#allocation8 + $0xa4] ss:$8 sps:$4 sm:$0xff]   ;;  %v2603_v4 = vld [vmem:[#allocation8 + $0xa0] ss:$8 sps:$4 sm:$0xff]  }
 0x367   : > { %1805 = vmatprep.subr.bf16.mxu1 %v2574_v34  ;;  %v2604_v7 = vld [vmem:[#allocation8 + $0x94] ss:$8 sps:$4 sm:$0xff]   ;;  %v2606_v8 = vld [vmem:[#allocation8 + $0x90] ss:$8 sps:$4 sm:$0xff]   ;;  %v2607_v9 = vld [vmem:[#allocation8 + $0x84] ss:$8 sps:$4 sm:$0xff]  }
 0x368   : > { %1556 = vmatpush1.bf16.msra.mxu0 %v2528_v17  ;;  %v2609_v10 = vld [vmem:[#allocation8 + $0x80] ss:$8 sps:$4 sm:$0xff]   ;;  %v1371_v13 = vsub.s32 1, %v1366_v12  ;;  %v1367_v15 = vsub.s32 0, %v1366_v12  ;;  %s2780_s24 = smov 1   ;;  %vm1943_vm0 = vcmask 7168  }
 0x369   : > { %1557 = vmatprep.subr.bf16.mxu0 %v2529_v14  ;;  %vm1946_vm1 = vcmask 15360   ;;  %vm1957_vm2 = vcmask 8192  }
 0x36a   : > { %1806 = vmatpush1.bf16.msra.mxu1 %v2576_v37  ;;  %v1372_v17 = vrot.slane %v2991_v2, %v1371_v13  ;;  %v1368_v14 = vrot.slane %v2991_v2, %v1367_v15  ;;  %v1630_v32 = vrot.slane %v2996_v3, %v1367_v15  ;;  %v1634_v2 = vrot.slane %v2996_v3, %v1371_v13 }
 0x36b   : > { %1807 = vmatprep.subr.bf16.mxu1 %v2577_v39 }
 0x36c   : > { %1558 = vmatpush1.bf16.msra.mxu0 %v2531_v18 }
 0x36d   : > { %1559 = vmatprep.subr.bf16.mxu0 %v2532_v19 }
 0x36e   : > { %1808 = vmatpush1.bf16.msra.mxu1 %v2579_v40 }
 0x36f   : > { %1809 = vmatprep.subr.bf16.mxu1 %v2580_v42 }
 0x370   : > { %1560 = vmatpush1.bf16.msra.mxu0 %v2534_v25 }
 0x371   : > { %1561 = vmatprep.subr.bf16.mxu0 %v2535_v27 }
 0x372   : > { %1810 = vmatpush1.bf16.msra.mxu1 %v2582_v44 }
 0x373   : > { %1811 = vmatprep.subr.bf16.mxu1 %v2583_v46 }
 0x374   : > { %1562 = vmatpush2.bf16.msra.mxu0 %v2537_v29 }
 0x375   : > { %1563 = vmatprep.subr.bf16.mxu0 %v2538_v31  ;;  %v1851_v31 = vsub.s32 2, %v1366_v12 }
 0x376   : > { %1812 = vmatpush1.bf16.msra.mxu1 %v2585_v48 }
 0x377   : > { %1813 = vmatprep.subr.bf16.mxu1 %v2586_v50  ;;  %v1852_v34 = vrot.slane %v3001_v5, %v1851_v31 }
 0x378   : > { %1564 = vmatpush2.bf16.msra.mxu0 %v2540_v33  ;;  %v1848_v33 = vrot.slane %v3001_v5, %v1367_v15 }
 0x379   : > { %1565 = vmatprep.subr.bf16.mxu0 %v2541_v35 }
 0x37a   : > { %1814 = vmatpush2.bf16.msra.mxu1 %v2588_v52  ;;  %v1858_v40 = vrot.slane %v1848_v33, %v1367_v15 }
 0x37b   : > { %1815 = vmatprep.subr.bf16.mxu1 %v2589_v54  ;;  %v1887_v54 = vadd.s32 8, %v1366_v12 }
 0x37c   : > { %1566 = vmatpush2.bf16.msra.mxu0 %v2543_v36 }
 0x37d   : > { %1567 = vmatprep.subr.bf16.mxu0 %v2544_v38 }
 0x37e   : > { %1816 = vmatpush2.bf16.msra.mxu1 %v2591_v56 }
 0x37f   : > { %1817 = vmatprep.subr.bf16.mxu1 %v2592_v58 }
 0x380   : > { %1568 = vmatpush2.bf16.msra.mxu0 %v2546_v41  ;;  %v1862_v41 = vrot.slane %v1852_v34, %v1367_v15 }
 0x381   : > { %1569 = vmatprep.subr.bf16.mxu0 %v2547_v43 }
 0x382   : > { %1818 = vmatpush2.bf16.msra.mxu1 %v2594_v60 }
 0x383   : > { %1819 = vmatprep.subr.bf16.mxu1 %v2595_v61 }
 0x384   : > { %1570 = vmatpush2.bf16.msra.mxu0 %v2549_v45 }
 0x385   : > { %1571 = vmatprep.subr.bf16.mxu0 %v2550_v47 }
 0x386   : > { %1820 = vmatpush2.bf16.msra.mxu1 %v2597_v62 }
 0x387   : > { %1821 = vmatprep.subr.bf16.mxu1 %v2598_v63 }
 0x388   : > { %1572 = vmatpush2.bf16.msra.mxu0 %v2552_v49 }
 0x389   : > { %1573 = vmatprep.subr.bf16.mxu0 %v2553_v51 }
 0x38a   : > { %1822 = vmatpush2.bf16.msra.mxu1 %v2600_v0  ;;  %v2779_v0 = vmov 0.0  }
 0x38b   : > { %1823 = vmatprep.subr.bf16.mxu1 %v2601_v1 }
 0x38c   : > { %1574 = vmatpush2.bf16.msra.mxu0 %v2555_v53  ;;  %v1877_v53 = vrot.slane %v3003_v6, %v1367_v15 }
 0x38d   : > { %1575 = vmatprep.subr.bf16.mxu0 %v2556_v55  ;;  %v1888_v55 = vstv %s2284_s20 }
 0x38e   : > { %1824 = vmatpush2.bf16.msra.mxu1 %v2603_v4  ;;  %v1889_v58 = vadd.s32 %v1888_v55, %v1366_v12 }
 0x38f   : > { %1825 = vmatprep.subr.bf16.mxu1 %v2604_v7 }
 0x390   : > { %1576 = vmatpush2.bf16.msra.mxu0 %v2558_v57  ;;  %vm1891_vm11 = vcmp.lt.s32.totalorder %v1889_v58, 20 }
 0x392   : > { %1826 = vmatpush2.bf16.msra.mxu1 %v2606_v8 }
 0x393   : > { %1578 = vmatmul.mubr.bf16.vlgmr.msra.gmra.mxu0 %v2559_v59  ;;  %1827 = vmatprep.subr.bf16.mxu1 %v2607_v9  ;;  %v1890_v59 = vadd.s32 %v1888_v55, %v1887_v54 }
 0x395   : > { %vm1892_vm12 = vcmp.lt.s32.totalorder %v1890_v59, 20 }
 0x396   : > { %1828 = vmatpush2.bf16.msra.mxu1 %v2609_v10 }
 0x453   : > { %v1579_v16 = vpop.f32.mrf.mxu0 }
 0x454   : > { %v1580_v22 = vadd.f32 %v1579_v16, %v1368_v14 }
 0x455   : > { %v1581_v18 = vpop.f32.mrf.mxu0 }
 0x456   : > { %v1582_v20 = vadd.f32 %v1581_v18, %v1372_v17  ;;  %v1588_v28 = vmax.f32 %v1580_v22, 0.0 }
 0x457   : > { %v1583_v19 = vpop.f32.mrf.mxu0 }
 0x458   : > { %v1584_v21 = vadd.f32 %v1583_v19, %v1368_v14  ;;  %v1589_v26 = vmax.f32 %v1582_v20, 0.0 }
 0x459   : > { %v1585_v23 = vpop.f32.mrf.mxu0 }
 0x45a   : > { %v1586_v24 = vadd.f32 %v1585_v23, %v1372_v17  ;;  %v1590_v25 = vmax.f32 %v1584_v21, 0.0 }
 0x45c   : > { %v1591_v27 = vmax.f32 %v1586_v24, 0.0  ;;  %v1592_v30 = vpack.c.bf16 %v1590_v25, %v1588_v28  ;;  %v1882_v28 = vld [vmem:[%s2981_s12] sm:$0xff] }
 0x45e   : > { %v1593_v29 = vpack.c.bf16 %v1591_v27, %v1589_v26 }
 0x460   : > { %1829 = vmatprep.mubr.bf16.mxu1 %v1593_v29 }
 0x461   : > { %1830 = vmatmul.mubr.bf16.vlgmr.msra.gmra.mxu1 %v1592_v30 }
 0x521   : > { %v1831_v35 = vpop.f32.mrf.mxu1 }
 0x522   : > { %v1832_v36 = vadd.f32 %v1831_v35, %v1630_v32  ;;  %v1883_v35 = vld [vmem:[%s2981_s12 + $0x8] sm:$0xff] }
 0x523   : > { %v1833_v37 = vpop.f32.mrf.mxu1 }
 0x524   : > { %v1840_v38 = vmax.f32 %v1832_v36, 0.0  ;;  %v1834_v39 = vadd.f32 %v1833_v37, %v1634_v2 }
 0x525   : > { %v1835_v42 = vpop.f32.mrf.mxu1 }
 0x526   : > { %v1841_v43 = vmax.f32 %v1834_v39, 0.0  ;;  %v1836_v44 = vadd.f32 %v1835_v42, %v1630_v32  ;;  %v1863_v48 = vmul.f32 %v1858_v40, %v1840_v38 }
 0x527   : > { %v1837_v45 = vpop.f32.mrf.mxu1 }
 0x528   : > { %v1842_v46 = vmax.f32 %v1836_v44, 0.0  ;;  %v1838_v47 = vadd.f32 %v1837_v45, %v1634_v2  ;;  %v1864_v3 = vmul.f32 %v1862_v41, %v1841_v43 }
 0x52a   : > { %v1843_v49 = vmax.f32 %v1838_v47, 0.0  ;;  %v1867_v50 = vadd.f32 %v1864_v3, %v1863_v48  ;;  %v1865_v51 = vmul.f32 %v1858_v40, %v1842_v46 }
 0x52c   : > { %v1866_v5 = vmul.f32 %v1862_v41, %v1843_v49  ;;  %1868 = vadd.xlane.f32.xlu0 %v1867_v50 }
 0x52e   : > { %v1870_v52 = vadd.f32 %v1866_v5, %v1865_v51  ;;  %v1881_v5 = vld [vmem:[#allocation3] sm:$0x1] }
 0x530   : > { %1871 = vadd.xlane.f32.xlu0 %v1870_v52 }
 0x5b5   : > { %v1869_v56 = vpop.xlane.xlu0 %1868 }
 0x5b6   : > { %v1879_v57 = vadd.f32 %v1877_v53, %v1869_v56 }
 0x5b8   : > { %v1895_v60 = vand.u32 2147483647, %v1879_v57  ;;  %vm1925_vm10 = vcmp.lt.f32.partialorder %v1879_v57, 0.0  ;;  %v1893_v25 = vmax.f32 %v1879_v57, 0.0 }
 0x5b9   : > { %v1872_v61 = vpop.xlane.xlu0 %1871  ;;  %v2285_v1 = vsel %vm1925_vm10, 1.0, %v2779_v0 }
 0x5ba   : > { %v1897_v62 = vsub.f32 0.0, %v1895_v60  ;;  %v1880_v63 = vadd.f32 %v1877_v53, %v1872_v61  ;;  %v1933_v9 = vsel %vm1891_vm11, %v2285_v1, 0.0 }
 0x5bc   : > { %v1899_v4 = vmul.f32 1.442695, %v1897_v62  ;;  %v1896_v7 = vand.u32 2147483647, %v1880_v63  ;;  %vm1926_vm13 = vcmp.lt.f32.partialorder %v1880_v63, 0.0  ;;  %v1894_v2 = vmax.f32 %v1880_v63, 0.0 }
 0x5bd   : > { %v2286_v8 = vsel %vm1926_vm13, 1.0, %v2779_v0 }
 0x5be   : > { %2610 = vpow2.f32 %v1899_v4  ;;  %v1898_v6 = vsub.f32 0.0, %v1896_v7  ;;  %v1934_v10 = vsel %vm1892_vm12, %v2286_v8, 0.0 }
 0x5bf   : > { %v2506_v11 = vpack.i.bf16 %v1934_v10, %v1933_v9 }
 0x5c0   : > { %v1901_v12 = vmul.f32 1.442695, %v1898_v6 }
 0x5c1   : > { %2507 = vrot.lane.b32.xlu1 %v2506_v11, %s2780_s24 }
 0x5c2   : > { %2612 = vpow2.f32 %v1901_v12 }
 0x5cb   : > { %v2611_v13 = vpop.eup %2610 }
 0x5cc   : > { %v1903_v15 = vadd.f32 1.0, %v2611_v13  ;;  %v1906_v14 = vmul.f32 -0.5, %v2611_v13  ;;  %v1909_v20 = vand.u32 2147483647, %v2611_v13 }
 0x5ce   : > { %2614 = vlog2.f32 %v1903_v15  ;;  %v1907_v18 = vadd.f32 1.0, %v1906_v14  ;;  %vm1910_vm14 = vcmp.lt.f32.partialorder %v1909_v20, 0.0004427343 }
 0x5cf   : > { %v2613_v16 = vpop.eup %2612 }
 0x5d0   : > { %v1912_v17 = vadd.f32 1.0, %v2613_v16  ;;  %v1915_v19 = vmul.f32 -0.5, %v2613_v16  ;;  %v1908_v23 = vmul.f32 %v2611_v13, %v1907_v18  ;;  %v1918_v26 = vand.u32 2147483647, %v2613_v16 }
 0x5d2   : > { %2616 = vlog2.f32 %v1912_v17  ;;  %v1916_v24 = vadd.f32 1.0, %v1915_v19  ;;  %vm1919_vm15 = vcmp.lt.f32.partialorder %v1918_v26, 0.0004427343 }
 0x5d4   : > { %v1917_v32 = vmul.f32 %v2613_v16, %v1916_v24 }
 0x5db   : > { %v2615_v21 = vpop.eup %2614 }
 0x5dc   : > { %v1905_v22 = vmul.f32 0.6931472, %v2615_v21 }
 0x5de   : > { %v1911_v27 = vsel %vm1910_vm14, %v1908_v23, %v1905_v22 }
 0x5df   : > { %v2617_v29 = vpop.eup %2616  ;;  %v1921_v30 = vadd.f32 %v1911_v27, %v1893_v25 }
 0x5e0   : > { %v1914_v31 = vmul.f32 0.6931472, %v2617_v29 }
 0x5e1   : > { %v1923_v33 = vmul.f32 %v1921_v30, %v1882_v28 }
 0x5e2   : > { %v1920_v34 = vsel %vm1919_vm15, %v1917_v32, %v1914_v31 }
 0x5e3   : > { %v1922_v36 = vadd.f32 %v1920_v34, %v1894_v2  ;;  %v1931_v37 = vsel %vm1891_vm11, %v1923_v33, 0.0 }
 0x5e5   : > { %v1924_v38 = vmul.f32 %v1922_v36, %v1883_v35 }
 0x5e7   : > { %v1932_v39 = vsel %vm1892_vm12, %v1924_v38, 0.0 }
 0x633   : > { %v2508_v40 = vpop.permute.xlu1 %2507 }
 0x634   : > { %v2510_v41 = vunpack.i.h.bf16 %v2508_v40  ;;  %v2509_v42 = vunpack.i.l.bf16 %v2508_v40 }
 0x636   : > { %v1944_v43 = vsel %vm1943_vm0, %v1931_v37, %v2509_v42  ;;  %v1945_v44 = vsel %vm1943_vm0, %v1932_v39, %v2510_v41 }
 0x637   : > { %v1947_v45 = vsel %vm1946_vm1, %v1944_v43, 0.0  ;;  %v1948_v46 = vsel %vm1946_vm1, %v1945_v44, 0.0 }
 0x638   : > { %v1949_v47 = vadd.f32 %v1948_v46, %v1947_v45 }
 0x63a   : > { %v1950_v48 = vrot.slane %v1949_v47, 4 }
 0x63c   : > { %v1951_v3 = vadd.f32 %v1950_v48, %v1949_v47 }
 0x63e   : > { %v1952_v49 = vrot.slane %v1951_v3, 2 }
 0x640   : > { %v1953_v50 = vadd.f32 %v1952_v49, %v1951_v3 }
 0x642   : > { %v1954_v51 = vrot.slane %v1953_v50, 1 }
 0x644   : > { %v1955_v52 = vadd.f32 %v1954_v51, %v1953_v50 }
 0x646   : > { %v1956_v53 = vadd.f32 %v1955_v52, %v1881_v5 }
 0x648   : > { %1958 = vst.msk [vmem:[#allocation3] sm:$0x1] %vm1957_vm2, %v1956_v53 }
 0x649 PF: > { %p2287_p4 = scmp.ne.s32.totalorder %s2754_s18, 1 }
 0x64a   : > { %s2781_s13 = smov (!%p2287_p4), 2  }
 0x64b   : > { %1962 = sbr.rel (%p2287_p4) target bundleno = 1734 (0x6c6), region = 84 }
 0x650   : > { %v2288_v54 = vld [vmem:[#allocation3] ss:$0 sm:$0xff]  ;;  %v1963_v55 = vld [vmem:[#allocation2] sm:$0x1]  ;;  %vm1973_vm3 = vcmask 15360   ;;  %vm1975_vm4 = vcmask 24576  }
 0x651   : > { %1970 = vrot.lane.b32.xlu0 %v2288_v54, %s2781_s13 }
 0x6c3   : > { %v1971_v56 = vpop.permute.xlu0 %1970 }
 0x6c4   : > { %v1974_v57 = vsel %vm1973_vm3, %v1963_v55, %v1971_v56 }
 0x6c5   : > { %1976 = vst.msk [vmem:[%s2985_s23] sm:$0x1] %vm1975_vm4, %v1974_v57 }
 0x6c6 PF: > { %s2289_s30 = sshll.u32 %s2758_s19, 4  ;;  %s1990_s29 = sshll.u32 %s2985_s23, 4  ;;  %s1991_s29 = int_to_ptr.vmem [resolvable:$true] %s1990_s29 }
 0x6c7   : > { %s1988_s18 = scalar_lea.hbm %s3098_s10, %s2289_s30  ;;  %s3121_s12 = sand.u32 1, %s2746_s16  }
 0x6c8   : > { %s1978_s11 = scalar_lea.sflag [#allocation7], %s3121_s12  ;;  %s2670_s4 = scalar_lea.vmem %s1991_s29, 16 }
 0x6c9   : > { %p2671_p5 = scmp.ne.s32.totalorder %s1991_s29, %s2670_s4  ;;  %s2782_s6 = smov [#allocation10]  }
 0x6ca   : > { %s2674_s17 = sshll.u32 %s2782_s6, 4  ;;  %s2675_s17 = int_to_ptr.vmem [resolvable:$false] %s2674_s17 }
 0x6cb   : > { %p2672_p6 = pnand %p2671_p5, %p2891_p3  ;;  %s2676_s28 = scalar_lea.vmem %s2675_s17, 32 }
 0x6cc   : > { %p2677_p8 = scmp.lt.s32.totalorder %s1991_s29, %s2675_s17  ;;  %p2678_p10 = scmp.lt.s32.totalorder %s2676_s28, %s2670_s4 }
 0x6cd   : > { %p2673_p7 = pneg %p2672_p6 }
 0x6ce   : > { %p2679_p0 = por %p2678_p10, %p2677_p8 }
 0x6d0   : > { %p2680_p1 = pnand %p2679_p0, %p2673_p7 }
 0x6d2   : > { %2683 = shalt.err (!%p2680_p1)
}
 0x6d3   : > { %s2684_s19 = scalar_lea.hbm %s1988_s18, 16  ;;  %s2688_s22 = scalar_lea.hbm %s3098_s10, 32 }
 0x6d4   : > { %p2685_p13 = scmp.ne.s32.totalorder %s1988_s18, %s2684_s19  ;;  %p2689_p2 = scmp.lt.s32.totalorder %s1988_s18, %s3098_s10 }
 0x6d5   : > { %p2690_p4 = scmp.lt.s32.totalorder %s2688_s22, %s2684_s19 }
 0x6d6   : > { %p2686_p11 = pnand %p2685_p13, %p2891_p3 }
 0x6d7   : > { %p2691_p5 = por %p2690_p4, %p2689_p2 }
 0x6d8   : > { %p2687_p12 = pneg %p2686_p11 }
 0x6da   : > { %p2692_p6 = pnand %p2691_p5, %p2687_p12 }
 0x6dc   : > { %2695 = shalt.err (!%p2692_p6)
}
 0x6dd   : > { %2302 = dma.vmem_to_hbm [thread:$0]  (%p2891_p3), %s1991_s29, 16, %s1988_s18, %s1978_s11  }
 0x6de PF: > { %p2319_p7 = scmp.ge.s32.totalorder %s2770_s9, 2  ;;  %s2002_s13 = sand.u32 1, %s2742_s15  }
 0x6df   : > { %s2003_s30 = scalar_lea.sflag [#allocation7], %s2002_s13 }
 0x6e0   : > { %p2312_p8 = pnand %p2319_p7, %p2901_p9 }
 0x6e2   : > { %p2313_p10 = pneg %p2312_p8 }
 0x6e4   : > { %2737 = dma.done.wait (%p2313_p10), %s2003_s30, 16  }
 0x6e5   : > { %2739 = vsyncadd (%p2313_p10), %s2003_s30, 4294967280  ;;  %s27_s9 = sadd.s32 1, %s2770_s9   ;;  %s3123_s21 = sld [smem:[#allocation14_spill]] }
 0x6e6   : > { %p24_p0 = scmp.ge.s32.totalorder %s27_s9, 6   ;;  %s3124_s17 = sld [smem:[#allocation20_spill]] }
 0x6e7   : > { %s3125_s18 = sld [smem:[#allocation15_spill]]  ;;  %s3129_s15 = smov %s2746_s16 }
 0x6e8   : > { %s3126_s19 = sld [smem:[#allocation16_spill]] }
 0x6e9   : > { %s3127_s20 = sld [smem:[#allocation17_spill]] }
 0x6ea   : > { %s3128_s27 = sld [smem:[#allocation18_spill]] }
 0x6eb   : > { %s3130_s16 = smov %s3123_s21 }
 0x6ec   :  { %26 = sbr.rel (!%p24_p0) target bundleno = 10 (0xa), region = 129 }
 0x6f0   : > { %s3131_s21 = smov %s3128_s27 }
 0x6f1   :  { %2007 = vsyncpa [#allocation6], 1 }
 0x6f2   :  { %2009 = vsyncpa [#allocation6 + $0x1], 1 }
 0x6f3   :  { %2010 = vsyncpa [#allocation9], 1 }
 0x6f4   :  { %2011 = vsyncpa [#allocation7], 1 }
 0x6f5   :  { %2013 = vsyncpa [#allocation7 + $0x1], 1 }

// kernel: tpu_custom_call.1
= control target key start
LH: loop header
LB: loop body
LE: loop exit
PB: predicated region body
PF: predicated region fallthrough
CT: control target
= control target key end

     0   :  { %s3088_s0 = inlined_call_operand.vmem [shape: bf16[36,256], index: 0, kind: input, shape index: {}]   ;;  %s3089_s1 = inlined_call_operand.vmem [shape: bf16[20,256], index: 1, kind: input, shape index: {}]   ;;  %s3090_s2 = inlined_call_operand.vmem [shape: f32[36,1], index: 2, kind: input, shape index: {}]   ;;  %s3091_s3 = inlined_call_operand.vmem [shape: f32[20,1], index: 3, kind: input, shape index: {}]   ;;  %s3092_s4 = inlined_call_operand.hbm [shape: bf16[256,256], index: 4, kind: input, shape index: {}]   ;;  %s3093_s5 = inlined_call_operand.vmem [shape: f32[1,256], index: 5, kind: input, shape index: {}]   ;;  %s3094_s6 = inlined_call_operand.hbm [shape: bf16[256,256], index: 6, kind: input, shape index: {}]   ;;  %s3095_s7 = inlined_call_operand.vmem [shape: f32[1,256], index: 7, kind: input, shape index: {}]   ;;  %s3096_s8 = inlined_call_operand.vmem [shape: bf16[1,256], index: 8, kind: input, shape index: {}]   ;;  %s3097_s9 = inlined_call_operand.<no memory space> [shape: f32[1,1], index: 9, kind: input, shape index: {}]   ;;  %s3098_s10 = inlined_call_operand.hbm [shape: f32[2,1,4], index: 10, kind: output, shape index: {}]  }
   0x1   :  { %3104 = sst [smem:[#allocation21_spill]] %s3092_s4  ;;  %v15_v0 = vstv %s3097_s9 }
   0x2   :  { %3105 = sst [smem:[#allocation22_spill]] %s3094_s6  ;;  %16 = vst [vmem:[#allocation4] sm:$0x1] %v15_v0 }
   0x3   :  { %17 = vsyncpa [#allocation6], 0 }
   0x4   :  { %18 = vsyncpa [#allocation9], 0 }
   0x5   :  { %19 = vsyncpa [#allocation7], 0 }
   0x6   :  { %21 = vsyncpa [#allocation7 + $0x1], 0  ;;  %s2841_s15 = smov 0   ;;  %s2843_s16 = smov 0  }
   0x7   :  { %s2845_s17 = smov 0   ;;  %s2847_s18 = smov 0  }
   0x8   :  { %s2849_s19 = smov 0   ;;  %s2851_s20 = smov 0  }
   0x9   :  { %s2853_s21 = smov 0   ;;  %s2855_s9 = smov 0  }
   0xa LB: > { %3106 = sst [smem:[#allocation14_spill]] %s2750_s17  ;;  %s2114_s22 = sadd.s32 4294967295, %s2770_s9   ;;  %s2770_s9 = sphi %s2855_s9, %s27_s9   ;;  %s2766_s21 = sphi %s2853_s21, %s3131_s21   ;;  %s2762_s20 = sphi %s2851_s20, %s3127_s20   ;;  %s2758_s19 = sphi %s2849_s19, %s3126_s19   ;;  %s2754_s18 = sphi %s2847_s18, %s3125_s18   ;;  %s2750_s17 = sphi %s2845_s17, %s3124_s17   ;;  %s2746_s16 = sphi %s2843_s16, %s3130_s16   ;;  %s2742_s15 = sphi %s2841_s15, %s3129_s15  }
   0xb   : > { %3107 = sst [smem:[#allocation15_spill]] %s2762_s20  ;;  %s2115_s23 = sadd.s32 4294967294, %s2770_s9  }
   0xc   : > { %3108 = sst [smem:[#allocation16_spill]] %s2766_s21  ;;  %s36_s24 = sadd.s32 1, %s2762_s20 }
   0xd   : > { %s39_s25 = sadd.s32 1, %s2766_s21  ;;  %p37_p0 = scmp.ge.s32.totalorder %s36_s24, 2 }
   0xe   : > { %s308_s26 = sadd.s32 1, %s2750_s17  ;;  %p318_p1 = scmp.ne.s32.totalorder %s2750_s17, %s2746_s16 }
   0xf   : > { %p319_p2 = scmp.eq.s32.totalorder %s2114_s22, 3  ;;  %s3133_s24 = smov (%p37_p0, %s36_s24), 0 }
  0x10   : > { %3109 = sst [smem:[#allocation17_spill]] %s3133_s24  ;;  %s3135_s25 = smov (!%p37_p0, %s39_s25), %s2766_s21 }
  0x11   : > { %p2891_p3 = por %p319_p2, %p318_p1  ;;  %p324_p4 = scmp.ne.s32.totalorder %s2746_s16, %s2742_s15 }
  0x12   : > { %p41_p5 = scmp.ge.s32.totalorder %s3135_s25, 2  ;;  %p325_p6 = scmp.eq.s32.totalorder %s2115_s23, 3 }
  0x13   : > { %p2124_p7 = scmp.ge.s32.totalorder %s2770_s9, 1  ;;  %p332_p8 = scmp.lt.s32.totalorder %s2770_s9, 5 }
  0x14   : > { %s3137_s25 = smov (%p41_p5, %s3135_s25), 0  ;;  %p2901_p9 = por %p325_p6, %p324_p4 }
  0x15   : > { %3111 = sst [smem:[#allocation18_spill]] %s3137_s25  ;;  %p2905_p10 = pnand %p2124_p7, %p332_p8 }
  0x16   : > { %s3112_s28 = scalar_select %p2901_p9, 1, 0 }
  0x17   : > { %s305_s30 = ssub.s32 %s2766_s21, %s3137_s25  ;;  %p2304_p12 = pneg %p2905_p10 }
  0x18   : > { %3113 = sst [smem:[#allocation19_spill]] %s3112_s28  ;;  %p306_p11 = scmp.eq.s32.totalorder %s305_s30, 0 }
  0x19   : > { %p2913_p13 = scmp.eq.s32.totalorder %s2114_s22, 0  ;;  %s2772_s13 = smov [#allocation5]  }
  0x1a   : > { %s2918_s12 = scalar_select %p306_p11, %s2750_s17, %s308_s26  }
  0x1b   : > { %s344_s14 = sshll.u32 %s2772_s13, 4  ;;  %p2922_p0 = pnand %p2913_p13, %p2304_p12  ;;  %s345_s14 = int_to_ptr.vmem [resolvable:$true] %s344_s14 }
  0x1c   : > { %3116 = sst [smem:[#allocation20_spill]] %s2918_s12  ;;  %s2629_s30 = scalar_lea.vmem %s345_s14, 4096 }
  0x1d   : > { %p2620_p1 = pneg %p2922_p0  ;;  %p2630_p2 = scmp.ne.s32.totalorder %s345_s14, %s2629_s30 }
  0x1e   : > { %p2637_p6 = scmp.lt.s32.totalorder %s345_s14, %s345_s14  ;;  %p2638_p7 = scmp.lt.s32.totalorder %s2629_s30, %s2629_s30 }
  0x1f   : > { %p2632_p4 = pnand %p2630_p2, %p2620_p1 }
  0x20   : > { %p2639_p8 = por %p2638_p7, %p2637_p6 }
  0x21   : > { %p2633_p5 = pneg %p2632_p4 }
  0x23   : > { %p2640_p11 = pnand %p2639_p8, %p2633_p5 }
  0x25   : > { %2643 = shalt.err (!%p2640_p11)
}
  0x26   : > { %s2773_s22 = smov 128   ;;  %s2774_s26 = smov 8  }
  0x27   : > { %s3118_s4 = sld [smem:[#allocation21_spill]]  ;;  %s2775_s24 = smov [#allocation8]  }
  0x28   : > { %s360_s21 = sshll.u32 %s2775_s24, 4  ;;  %s361_s21 = int_to_ptr.vmem [resolvable:$true] %s360_s21 }
  0x29   : > { %s2655_s20 = scalar_lea.vmem %s361_s21, 4096  ;;  %p2663_p5 = scmp.lt.s32.totalorder %s361_s21, %s361_s21 }
  0x2a   : > { %p2656_p12 = scmp.ne.s32.totalorder %s361_s21, %s2655_s20  ;;  %p2664_p6 = scmp.lt.s32.totalorder %s2655_s20, %s2655_s20 }
  0x2c   : > { %p2658_p2 = pnand %p2656_p12, %p2620_p1  ;;  %p2665_p7 = por %p2664_p6, %p2663_p5 }
  0x2d   : > { %2307 = dma.hbm_to_vmem [thread:$0]  (!%p2922_p0), %s3118_s4, 4096, %s345_s14, [#allocation6], %s2773_s22, %s2773_s22, %s2774_s26  }
  0x2e   : > { %p2659_p4 = pneg %p2658_p2 }
  0x30   : > { %p2666_p8 = pnand %p2665_p7, %p2659_p4 }
  0x32   : > { %2669 = shalt.err (!%p2666_p8)
}
  0x33   : > { %s3119_s6 = sld [smem:[#allocation22_spill]] }
  0x35   : > { %491 = sbr.rel (%p2905_p10) target bundleno = 1758 (0x6de), region = 60 }
  0x39   : > { %2310 = dma.hbm_to_vmem [thread:$0]  (!%p2922_p0), %s3119_s6, 4096, %s361_s21, [#allocation9], %s2773_s22, %s2773_s22, %s2774_s26  }
  0x3a   : > { %2729 = dma.done.wait (%p2913_p13), [#allocation6], 4096  }
  0x3b   : > { %2731 = vsyncadd (%p2913_p13), [#allocation6], 4294963200 }
  0x3c   : > { %2733 = dma.done.wait (%p2913_p13), [#allocation9], 4096  }
  0x3d   : > { %2735 = vsyncadd (%p2913_p13), [#allocation9], 4294963200  ;;  %s2131_s21 = sshll.u32 %s2758_s19, 1  ;;  %s3120_s28 = sand.u32 1, %s2746_s16  }
  0x3e   : > { %s2957_s24 = sadd.s32 %s2754_s18, %s2131_s21  ;;  %s2985_s23 = scalar_lea.vmem [#allocation10], %s3120_s28 }
  0x3f   : > { %p585_p10 = scmp.lt.s32.totalorder %s2957_s24, 2  ;;  %p610_p0 = scmp.lt.s32.totalorder %s2957_s24, 1 }
  0x40   : > { %p2146_p11 = scmp.ne.s32.totalorder %s2754_s18, 0 }
  0x41   : > { %s586_s25 = scalar_select %p585_p10, %s2957_s24, 2 }
  0x42   : > { %s611_s29 = scalar_select %p610_p0, %s2957_s24, 1 }
  0x43   : > { %s2132_s12 = sshll.u32 %s586_s25, 1 }
  0x44   : > { %p593_p1 = scmp.lt.s32.totalorder %s2132_s12, 4  ;;  %s2136_s11 = sshll.u32 %s611_s29, 1 }
  0x45   : > { %p618_p13 = scmp.lt.s32.totalorder %s2136_s11, 2 }
  0x46   : > { %s3139_s12 = smov (!%p593_p1, %s2132_s12), 4  ;;  %682 = sbr.rel (%p2146_p11) target bundleno = 77 (0x4d), region = 72 }
  0x47   : > { %s3141_s11 = smov (!%p618_p13, %s2136_s11), 2  ;;  %s2292_s14 = sshll.u32 %s3139_s12, 3 }
  0x48   : > { %s2966_s26 = scalar_lea.vmem %s3088_s0, %s2292_s14  ;;  %s2293_s13 = sshll.u32 %s3141_s11, 3 }
  0x49   : > { %s2971_s20 = scalar_lea.vmem %s3089_s1, %s2293_s13  ;;  %s2976_s25 = scalar_lea.vmem %s3090_s2, %s2292_s14 }
  0x4a   : > { %s2981_s12 = scalar_lea.vmem %s3091_s3, %s2293_s13 }
  0x4b   : > { %vm683_vm0 = vcmask 8192   ;;  %v2776_v1 = vmov 0.0  }
  0x4c   : > { %684 = vst.msk [vmem:[#allocation2] sm:$0x1] %vm683_vm0, %v2776_v1  ;;  %685 = vst.msk [vmem:[#allocation3] sm:$0x1] %vm683_vm0, %v2776_v1 }
  0x4d PF: > { %v2991_v2 = vld [vmem:[%s3093_s5] sm:$0x3]  ;;  %v3003_v6 = vld [vmem:[#allocation4] sm:$0x1]  ;;  %p2147_p12 = scmp.ge.s32.totalorder %s2957_s24, 3 }
  0x4e   : > { %v2996_v3 = vld [vmem:[%s3095_s7] sm:$0x3]  ;;  %s2214_s22 = sshll.u32 (!%p2147_p12), %s2957_s24, 4 }
  0x4f   : > { %v688_v4 = vld [vmem:[%s3096_s8] sm:$0x3]  ;;  %694 = sbr.rel (%p2147_p12) target bundleno = 843 (0x34b), region = 76 }
  0x50   : > { %v3001_v5 = vunpack.c.l.bf16 %v688_v4 }
  0x54   : > { %v2399_v7 = vld [vmem:[#allocation5 + $0x74] ss:$8 sps:$4 sm:$0xff]   ;;  %v2401_v8 = vld [vmem:[#allocation5 + $0x70] ss:$8 sps:$4 sm:$0xff]   ;;  %v2402_v9 = vld [vmem:[#allocation5 + $0x64] ss:$8 sps:$4 sm:$0xff]  }
  0x55   : > { %910 = vmatprep.subr.bf16.mxu0 %v2399_v7  ;;  %v2404_v10 = vld [vmem:[#allocation5 + $0x60] ss:$8 sps:$4 sm:$0xff]   ;;  %v2405_v11 = vld [vmem:[#allocation5 + $0x54] ss:$8 sps:$4 sm:$0xff]   ;;  %v2407_v12 = vld [vmem:[#allocation5 + $0x50] ss:$8 sps:$4 sm:$0xff]  }
  0x56   : > { %911 = vmatpush1.bf16.msra.mxu0 %v2401_v8  ;;  %v2408_v13 = vld [vmem:[#allocation5 + $0x44] ss:$8 sps:$4 sm:$0xff]   ;;  %v2410_v14 = vld [vmem:[#allocation5 + $0x40] ss:$8 sps:$4 sm:$0xff]   ;;  %v2411_v15 = vld [vmem:[#allocation5 + $0x34] ss:$8 sps:$4 sm:$0xff]  }
  0x57   : > { %912 = vmatprep.subr.bf16.mxu0 %v2402_v9  ;;  %v2413_v16 = vld [vmem:[#allocation5 + $0x30] ss:$8 sps:$4 sm:$0xff]   ;;  %v2414_v17 = vld [vmem:[#allocation5 + $0x24] ss:$8 sps:$4 sm:$0xff]   ;;  %v2416_v18 = vld [vmem:[#allocation5 + $0x20] ss:$8 sps:$4 sm:$0xff]  }
  0x58   : > { %v2417_v19 = vld [vmem:[#allocation5 + $0x14] ss:$8 sps:$4 sm:$0xff]   ;;  %v2419_v20 = vld [vmem:[#allocation5 + $0x10] ss:$8 sps:$4 sm:$0xff]   ;;  %v2420_v21 = vld [vmem:[#allocation5 + $0x4] ss:$8 sps:$4 sm:$0xff]  }
  0x59   : > { %v2449_v22 = vld [vmem:[%s2966_s26 + $0x4] ss:$8 sps:$4 sm:$0xff]   ;;  %v2450_v23 = vld [vmem:[#allocation8 + $0x74] ss:$8 sps:$4 sm:$0xff]   ;;  %v2452_v24 = vld [vmem:[#allocation8 + $0x70] ss:$8 sps:$4 sm:$0xff]  }
  0x5a   : > { %913 = vmatpush1.bf16.msra.mxu0 %v2404_v10  ;;  %942 = vmatprep.mubr.bf16.mxu0 %v2449_v22  ;;  %v2453_v25 = vld [vmem:[#allocation8 + $0x64] ss:$8 sps:$4 sm:$0xff]   ;;  %v2455_v26 = vld [vmem:[#allocation8 + $0x60] ss:$8 sps:$4 sm:$0xff]   ;;  %v2456_v28 = vld [vmem:[#allocation8 + $0x54] ss:$8 sps:$4 sm:$0xff]  }
  0x5b   : > { %914 = vmatprep.subr.bf16.mxu0 %v2405_v11  ;;  %1162 = vmatprep.subr.bf16.mxu1 %v2450_v23  ;;  %v2422_v27 = vld [vmem:[#allocation5] ss:$8 sps:$4 sm:$0xff]   ;;  %v2423_v29 = vld [vmem:[#allocation5 + $0xf4] ss:$8 sps:$4 sm:$0xff]   ;;  %v2458_v30 = vld [vmem:[#allocation8 + $0x50] ss:$8 sps:$4 sm:$0xff]  }
  0x5c   : > { %1163 = vmatpush1.bf16.msra.mxu1 %v2452_v24  ;;  %v2425_v31 = vld [vmem:[#allocation5 + $0xf0] ss:$8 sps:$4 sm:$0xff]   ;;  %v2459_v32 = vld [vmem:[#allocation8 + $0x44] ss:$8 sps:$4 sm:$0xff]   ;;  %v2461_v34 = vld [vmem:[#allocation8 + $0x40] ss:$8 sps:$4 sm:$0xff]  }
  0x5d   : > { %1164 = vmatprep.subr.bf16.mxu1 %v2453_v25  ;;  %v2426_v33 = vld [vmem:[#allocation5 + $0xe4] ss:$8 sps:$4 sm:$0xff]   ;;  %v2428_v35 = vld [vmem:[#allocation5 + $0xe0] ss:$8 sps:$4 sm:$0xff]   ;;  %v2462_v36 = vld [vmem:[#allocation8 + $0x34] ss:$8 sps:$4 sm:$0xff]  }
  0x5e   : > { %915 = vmatpush1.bf16.msra.mxu0 %v2407_v12  ;;  %v2429_v37 = vld [vmem:[#allocation5 + $0xd4] ss:$8 sps:$4 sm:$0xff]   ;;  %v2431_v38 = vld [vmem:[#allocation5 + $0xd0] ss:$8 sps:$4 sm:$0xff]   ;;  %v2432_v40 = vld [vmem:[#allocation5 + $0xc4] ss:$8 sps:$4 sm:$0xff]  }
  0x5f   : > { %916 = vmatprep.subr.bf16.mxu0 %v2408_v13  ;;  %v2464_v39 = vld [vmem:[#allocation8 + $0x30] ss:$8 sps:$4 sm:$0xff]   ;;  %v2465_v41 = vld [vmem:[#allocation8 + $0x24] ss:$8 sps:$4 sm:$0xff]   ;;  %v2467_v42 = vld [vmem:[#allocation8 + $0x20] ss:$8 sps:$4 sm:$0xff]   ;;  %v730_v13 = vlaneseq }
  0x60   : > { %1165 = vmatpush1.bf16.msra.mxu1 %v2455_v26  ;;  %v2434_v43 = vld [vmem:[#allocation5 + $0xc0] ss:$8 sps:$4 sm:$0xff]   ;;  %v2468_v44 = vld [vmem:[#allocation8 + $0x14] ss:$8 sps:$4 sm:$0xff]   ;;  %v2470_v46 = vld [vmem:[#allocation8 + $0x10] ss:$8 sps:$4 sm:$0xff]  }
  0x61   : > { %1166 = vmatprep.subr.bf16.mxu1 %v2456_v28  ;;  %v2435_v45 = vld [vmem:[#allocation5 + $0xb4] ss:$8 sps:$4 sm:$0xff]   ;;  %v2437_v47 = vld [vmem:[#allocation5 + $0xb0] ss:$8 sps:$4 sm:$0xff]   ;;  %v2471_v48 = vld [vmem:[#allocation8 + $0x4] ss:$8 sps:$4 sm:$0xff]  }
  0x62   : > { %917 = vmatpush1.bf16.msra.mxu0 %v2410_v14  ;;  %v2438_v49 = vld [vmem:[#allocation5 + $0xa4] ss:$8 sps:$4 sm:$0xff]   ;;  %v2473_v50 = vld [vmem:[#allocation8] ss:$8 sps:$4 sm:$0xff]   ;;  %v2474_v52 = vld [vmem:[#allocation8 + $0xf4] ss:$8 sps:$4 sm:$0xff]  }
  0x63   : > { %918 = vmatprep.subr.bf16.mxu0 %v2411_v15  ;;  %v2440_v51 = vld [vmem:[#allocation5 + $0xa0] ss:$8 sps:$4 sm:$0xff]   ;;  %v2441_v53 = vld [vmem:[#allocation5 + $0x94] ss:$8 sps:$4 sm:$0xff]   ;;  %v2476_v54 = vld [vmem:[#allocation8 + $0xf0] ss:$8 sps:$4 sm:$0xff]  }
  0x64   : > { %1167 = vmatpush1.bf16.msra.mxu1 %v2458_v30  ;;  %v2443_v55 = vld [vmem:[#allocation5 + $0x90] ss:$8 sps:$4 sm:$0xff]   ;;  %v2477_v56 = vld [vmem:[#allocation8 + $0xe4] ss:$8 sps:$4 sm:$0xff]   ;;  %v2479_v58 = vld [vmem:[#allocation8 + $0xe0] ss:$8 sps:$4 sm:$0xff]  }
  0x65   : > { %1168 = vmatprep.subr.bf16.mxu1 %v2459_v32  ;;  %v2444_v57 = vld [vmem:[#allocation5 + $0x84] ss:$8 sps:$4 sm:$0xff]   ;;  %v2446_v59 = vld [vmem:[#allocation5 + $0x80] ss:$8 sps:$4 sm:$0xff]   ;;  %v2480_v60 = vld [vmem:[#allocation8 + $0xd4] ss:$8 sps:$4 sm:$0xff]  }
  0x66   : > { %919 = vmatpush1.bf16.msra.mxu0 %v2413_v16  ;;  %v2447_v61 = vld [vmem:[%s2966_s26] ss:$8 sps:$4 sm:$0xff]   ;;  %v2482_v62 = vld [vmem:[#allocation8 + $0xd0] ss:$8 sps:$4 sm:$0xff]   ;;  %v731_v14 = vshrl.u32 %v730_v13, 7  ;;  %s2778_s26 = smov 1  }
  0x67   : > { %920 = vmatprep.subr.bf16.mxu0 %v2414_v17  ;;  %v2483_v63 = vld [vmem:[#allocation8 + $0xc4] ss:$8 sps:$4 sm:$0xff]   ;;  %v2485_v0 = vld [vmem:[#allocation8 + $0xc0] ss:$8 sps:$4 sm:$0xff]   ;;  %v2486_v1 = vld [vmem:[#allocation8 + $0xb4] ss:$8 sps:$4 sm:$0xff]  }
  0x68   : > { %1169 = vmatpush1.bf16.msra.mxu1 %v2461_v34  ;;  %v2488_v4 = vld [vmem:[#allocation8 + $0xb0] ss:$8 sps:$4 sm:$0xff]   ;;  %v2489_v7 = vld [vmem:[#allocation8 + $0xa4] ss:$8 sps:$4 sm:$0xff]   ;;  %v2491_v8 = vld [vmem:[#allocation8 + $0xa0] ss:$8 sps:$4 sm:$0xff]  }
  0x69   : > { %1170 = vmatprep.subr.bf16.mxu1 %v2462_v36  ;;  %v2492_v9 = vld [vmem:[#allocation8 + $0x94] ss:$8 sps:$4 sm:$0xff]   ;;  %v2494_v10 = vld [vmem:[#allocation8 + $0x90] ss:$8 sps:$4 sm:$0xff]   ;;  %v2495_v11 = vld [vmem:[#allocation8 + $0x84] ss:$8 sps:$4 sm:$0xff]  }
  0x6a   : > { %921 = vmatpush1.bf16.msra.mxu0 %v2416_v18  ;;  %v2497_v12 = vld [vmem:[#allocation8 + $0x80] ss:$8 sps:$4 sm:$0xff]   ;;  %v736_v15 = vsub.s32 1, %v731_v14  ;;  %v732_v16 = vsub.s32 0, %v731_v14  ;;  %vm1310_vm7 = vcmask 7168   ;;  %vm1313_vm8 = vcmask 15360  }
  0x6b   : > { %922 = vmatprep.subr.bf16.mxu0 %v2417_v19  ;;  %vm1324_vm9 = vcmask 8192  }
  0x6c   : > { %1171 = vmatpush1.bf16.msra.mxu1 %v2464_v39  ;;  %v737_v18 = vrot.slane %v2991_v2, %v736_v15  ;;  %v733_v19 = vrot.slane %v2991_v2, %v732_v16  ;;  %v995_v34 = vrot.slane %v2996_v3, %v732_v16  ;;  %v1213_v36 = vrot.slane %v3001_v5, %v732_v16 }
  0x6d   : > { %1172 = vmatprep.subr.bf16.mxu1 %v2465_v41 }
  0x6e   : > { %923 = vmatpush1.bf16.msra.mxu0 %v2419_v20 }
  0x6f   : > { %924 = vmatprep.subr.bf16.mxu0 %v2420_v21 }
  0x70   : > { %1173 = vmatpush1.bf16.msra.mxu1 %v2467_v42 }
  0x71   : > { %1174 = vmatprep.subr.bf16.mxu1 %v2468_v44 }
  0x72   : > { %925 = vmatpush1.bf16.msra.mxu0 %v2422_v27 }
  0x73   : > { %926 = vmatprep.subr.bf16.mxu0 %v2423_v29 }
  0x74   : > { %1175 = vmatpush1.bf16.msra.mxu1 %v2470_v46 }
  0x75   : > { %1176 = vmatprep.subr.bf16.mxu1 %v2471_v48 }
  0x76   : > { %927 = vmatpush2.bf16.msra.mxu0 %v2425_v31 }
  0x77   : > { %928 = vmatprep.subr.bf16.mxu0 %v2426_v33  ;;  %v1216_v33 = vsub.s32 2, %v731_v14 }
  0x78   : > { %1177 = vmatpush1.bf16.msra.mxu1 %v2473_v50 }
  0x79   : > { %1178 = vmatprep.subr.bf16.mxu1 %v2474_v52 }
  0x7a   : > { %929 = vmatpush2.bf16.msra.mxu0 %v2428_v35  ;;  %v999_v35 = vrot.slane %v2996_v3, %v736_v15 }
  0x7b   : > { %930 = vmatprep.subr.bf16.mxu0 %v2429_v37  ;;  %v1217_v37 = vrot.slane %v3001_v5, %v1216_v33 }
  0x7c   : > { %1179 = vmatpush2.bf16.msra.mxu1 %v2476_v54 }
  0x7d   : > { %1180 = vmatprep.subr.bf16.mxu1 %v2477_v56  ;;  %v1227_v44 = vrot.slane %v1217_v37, %v732_v16 }
  0x7e   : > { %931 = vmatpush2.bf16.msra.mxu0 %v2431_v38 }
  0x7f   : > { %932 = vmatprep.subr.bf16.mxu0 %v2432_v40 }
  0x80   : > { %1181 = vmatpush2.bf16.msra.mxu1 %v2479_v58  ;;  %v1242_v58 = vrot.slane %v3003_v6, %v732_v16 }
  0x81   : > { %1182 = vmatprep.subr.bf16.mxu1 %v2480_v60  ;;  %v1253_v60 = vstv %s2214_s22 }
  0x82   : > { %933 = vmatpush2.bf16.msra.mxu0 %v2434_v43  ;;  %v1223_v43 = vrot.slane %v1213_v36, %v732_v16  ;;  %v1247_v36 = vld [vmem:[%s2976_s25] sm:$0xff] }
  0x83   : > { %934 = vmatprep.subr.bf16.mxu0 %v2435_v45 }
  0x84   : > { %1183 = vmatpush2.bf16.msra.mxu1 %v2482_v62 }
  0x85   : > { %1184 = vmatprep.subr.bf16.mxu1 %v2483_v63  ;;  %v1254_v63 = vadd.s32 %v1253_v60, %v731_v14 }
  0x86   : > { %935 = vmatpush2.bf16.msra.mxu0 %v2437_v47 }
  0x87   : > { %936 = vmatprep.subr.bf16.mxu0 %v2438_v49  ;;  %vm1256_vm2 = vcmp.lt.s32.totalorder %v1254_v63, 36 }
  0x88   : > { %1185 = vmatpush2.bf16.msra.mxu1 %v2485_v0 }
  0x89   : > { %1186 = vmatprep.subr.bf16.mxu1 %v2486_v1 }
  0x8a   : > { %937 = vmatpush2.bf16.msra.mxu0 %v2440_v51 }
  0x8b   : > { %938 = vmatprep.subr.bf16.mxu0 %v2441_v53 }
  0x8c   : > { %1187 = vmatpush2.bf16.msra.mxu1 %v2488_v4 }
  0x8d   : > { %1188 = vmatprep.subr.bf16.mxu1 %v2489_v7 }
  0x8e   : > { %939 = vmatpush2.bf16.msra.mxu0 %v2443_v55 }
  0x8f   : > { %940 = vmatprep.subr.bf16.mxu0 %v2444_v57 }
  0x90   : > { %1189 = vmatpush2.bf16.msra.mxu1 %v2491_v8 }
  0x91   : > { %1190 = vmatprep.subr.bf16.mxu1 %v2492_v9  ;;  %v2777_v9 = vmov 0.0  }
  0x92   : > { %941 = vmatpush2.bf16.msra.mxu0 %v2446_v59  ;;  %v1252_v59 = vadd.s32 8, %v731_v14 }
  0x94   : > { %1191 = vmatpush2.bf16.msra.mxu1 %v2494_v10  ;;  %v1255_v0 = vadd.s32 %v1253_v60, %v1252_v59 }
  0x95   : > { %943 = vmatmul.mubr.bf16.vlgmr.msra.gmra.mxu0 %v2447_v61  ;;  %1192 = vmatprep.subr.bf16.mxu1 %v2495_v11 }
  0x96   : > { %vm1257_vm3 = vcmp.lt.s32.totalorder %v1255_v0, 36 }
  0x98   : > { %1193 = vmatpush2.bf16.msra.mxu1 %v2497_v12 }
 0x155   : > { %v944_v17 = vpop.f32.mrf.mxu0 }
 0x156   : > { %v945_v24 = vadd.f32 %v944_v17, %v733_v19 }
 0x157   : > { %v946_v20 = vpop.f32.mrf.mxu0 }
 0x158   : > { %v947_v22 = vadd.f32 %v946_v20, %v737_v18  ;;  %v953_v30 = vmax.f32 %v945_v24, 0.0 }
 0x159   : > { %v948_v21 = vpop.f32.mrf.mxu0 }
 0x15a   : > { %v949_v23 = vadd.f32 %v948_v21, %v733_v19  ;;  %v954_v28 = vmax.f32 %v947_v22, 0.0 }
 0x15b   : > { %v950_v25 = vpop.f32.mrf.mxu0 }
 0x15c   : > { %v951_v26 = vadd.f32 %v950_v25, %v737_v18  ;;  %v955_v27 = vmax.f32 %v949_v23, 0.0 }
 0x15e   : > { %v956_v29 = vmax.f32 %v951_v26, 0.0  ;;  %v957_v32 = vpack.c.bf16 %v955_v27, %v953_v30 }
 0x160   : > { %v958_v31 = vpack.c.bf16 %v956_v29, %v954_v28 }
 0x162   : > { %1194 = vmatprep.mubr.bf16.mxu1 %v958_v31 }
 0x163   : > { %1195 = vmatmul.mubr.bf16.vlgmr.msra.gmra.mxu1 %v957_v32 }
 0x223   : > { %v1196_v38 = vpop.f32.mrf.mxu1 }
 0x224   : > { %v1197_v39 = vadd.f32 %v1196_v38, %v995_v34 }
 0x225   : > { %v1198_v40 = vpop.f32.mrf.mxu1 }
 0x226   : > { %v1205_v41 = vmax.f32 %v1197_v39, 0.0  ;;  %v1199_v42 = vadd.f32 %v1198_v40, %v999_v35 }
 0x227   : > { %v1200_v45 = vpop.f32.mrf.mxu1 }
 0x228   : > { %v1206_v46 = vmax.f32 %v1199_v42, 0.0  ;;  %v1201_v47 = vadd.f32 %v1200_v45, %v995_v34  ;;  %v1228_v51 = vmul.f32 %v1223_v43, %v1205_v41 }
 0x229   : > { %v1202_v48 = vpop.f32.mrf.mxu1 }
 0x22a   : > { %v1207_v49 = vmax.f32 %v1201_v47, 0.0  ;;  %v1203_v50 = vadd.f32 %v1202_v48, %v999_v35  ;;  %v1229_v52 = vmul.f32 %v1227_v44, %v1206_v46 }
 0x22c   : > { %v1208_v53 = vmax.f32 %v1203_v50, 0.0  ;;  %v1232_v54 = vadd.f32 %v1229_v52, %v1228_v51  ;;  %v1230_v55 = vmul.f32 %v1223_v43, %v1207_v49 }
 0x22e   : > { %v1231_v56 = vmul.f32 %v1227_v44, %v1208_v53  ;;  %1233 = vadd.xlane.f32.xlu0 %v1232_v54  ;;  %v1248_v44 = vld [vmem:[%s2976_s25 + $0x8] sm:$0xff] }
 0x230   : > { %v1235_v57 = vadd.f32 %v1231_v56, %v1230_v55 }
 0x232   : > { %1236 = vadd.xlane.f32.xlu0 %v1235_v57 }
 0x2b7   : > { %v1234_v61 = vpop.xlane.xlu0 %1233 }
 0x2b8   : > { %v1244_v62 = vadd.f32 %v1242_v58, %v1234_v61 }
 0x2ba   : > { %v1258_v1 = vsub.f32 0.0, %v1244_v62  ;;  %vm1292_vm1 = vcmp.ge.f32.partialorder %v1244_v62, 0.0  ;;  %v1246_v62 = vld [vmem:[#allocation2] sm:$0x1] }
 0x2bb   : > { %v1237_v4 = vpop.xlane.xlu0 %1236  ;;  %v2215_v10 = vsel %vm1292_vm1, 1.0, %v2777_v9 }
 0x2bc   : > { %v1262_v7 = vand.u32 2147483647, %v1258_v1  ;;  %v1245_v8 = vadd.f32 %v1242_v58, %v1237_v4  ;;  %v1300_v17 = vsel %vm1256_vm2, %v2215_v10, 0.0  ;;  %v1260_v33 = vmax.f32 %v1258_v1, 0.0 }
 0x2be   : > { %v1264_v11 = vsub.f32 0.0, %v1262_v7  ;;  %v1259_v12 = vsub.f32 0.0, %v1245_v8  ;;  %vm1293_vm4 = vcmp.ge.f32.partialorder %v1245_v8, 0.0 }
 0x2bf   : > { %v2216_v13 = vsel %vm1293_vm4, 1.0, %v2777_v9 }
 0x2c0   : > { %v1266_v15 = vmul.f32 1.442695, %v1264_v11  ;;  %v1263_v16 = vand.u32 2147483647, %v1259_v12  ;;  %v1301_v14 = vsel %vm1257_vm3, %v2216_v13, 0.0  ;;  %v1261_v41 = vmax.f32 %v1259_v12, 0.0 }
 0x2c1   : > { %v2394_v18 = vpack.i.bf16 %v1301_v14, %v1300_v17 }
 0x2c2   : > { %2498 = vpow2.f32 %v1266_v15  ;;  %v1265_v19 = vsub.f32 0.0, %v1263_v16 }
 0x2c3   : > { %2395 = vrot.lane.b32.xlu1 %v2394_v18, %s2778_s26 }
 0x2c4   : > { %v1268_v20 = vmul.f32 1.442695, %v1265_v19 }
 0x2c6   : > { %2500 = vpow2.f32 %v1268_v20 }
 0x2cf   : > { %v2499_v21 = vpop.eup %2498 }
 0x2d0   : > { %v1270_v22 = vadd.f32 1.0, %v2499_v21  ;;  %v1273_v25 = vmul.f32 -0.5, %v2499_v21  ;;  %v1276_v28 = vand.u32 2147483647, %v2499_v21 }
 0x2d2   : > { %2502 = vlog2.f32 %v1270_v22  ;;  %v1274_v26 = vadd.f32 1.0, %v1273_v25  ;;  %vm1277_vm5 = vcmp.lt.f32.partialorder %v1276_v28, 0.0004427343 }
 0x2d3   : > { %v2501_v23 = vpop.eup %2500 }
 0x2d4   : > { %v1279_v24 = vadd.f32 1.0, %v2501_v23  ;;  %v1282_v27 = vmul.f32 -0.5, %v2501_v23  ;;  %v1275_v31 = vmul.f32 %v2499_v21, %v1274_v26  ;;  %v1285_v34 = vand.u32 2147483647, %v2501_v23 }
 0x2d6   : > { %2504 = vlog2.f32 %v1279_v24  ;;  %v1283_v32 = vadd.f32 1.0, %v1282_v27  ;;  %vm1286_vm6 = vcmp.lt.f32.partialorder %v1285_v34, 0.0004427343 }
 0x2d8   : > { %v1284_v40 = vmul.f32 %v2501_v23, %v1283_v32 }
 0x2df   : > { %v2503_v29 = vpop.eup %2502 }
 0x2e0   : > { %v1272_v30 = vmul.f32 0.6931472, %v2503_v29 }
 0x2e2   : > { %v1278_v35 = vsel %vm1277_vm5, %v1275_v31, %v1272_v30 }
 0x2e3   : > { %v2505_v37 = vpop.eup %2504  ;;  %v1288_v38 = vadd.f32 %v1278_v35, %v1260_v33 }
 0x2e4   : > { %v1281_v39 = vmul.f32 0.6931472, %v2505_v37 }
 0x2e5   : > { %v1290_v42 = vmul.f32 %v1288_v38, %v1247_v36 }
 0x2e6   : > { %v1287_v43 = vsel %vm1286_vm6, %v1284_v40, %v1281_v39 }
 0x2e7   : > { %v1289_v45 = vadd.f32 %v1287_v43, %v1261_v41  ;;  %v1298_v46 = vsel %vm1256_vm2, %v1290_v42, 0.0 }
 0x2e9   : > { %v1291_v47 = vmul.f32 %v1289_v45, %v1248_v44 }
 0x2eb   : > { %v1299_v48 = vsel %vm1257_vm3, %v1291_v47, 0.0 }
 0x335   : > { %v2396_v49 = vpop.permute.xlu1 %2395 }
 0x336   : > { %v2398_v50 = vunpack.i.h.bf16 %v2396_v49  ;;  %v2397_v51 = vunpack.i.l.bf16 %v2396_v49 }
 0x338   : > { %v1311_v52 = vsel %vm1310_vm7, %v1298_v46, %v2397_v51  ;;  %v1312_v53 = vsel %vm1310_vm7, %v1299_v48, %v2398_v50 }
 0x339   : > { %v1314_v54 = vsel %vm1313_vm8, %v1311_v52, 0.0  ;;  %v1315_v55 = vsel %vm1313_vm8, %v1312_v53, 0.0 }
 0x33a   : > { %v1316_v56 = vadd.f32 %v1315_v55, %v1314_v54 }
 0x33c   : > { %v1317_v57 = vrot.slane %v1316_v56, 4 }
 0x33e   : > { %v1318_v58 = vadd.f32 %v1317_v57, %v1316_v56 }
 0x340   : > { %v1319_v59 = vrot.slane %v1318_v58, 2 }
 0x342   : > { %v1320_v60 = vadd.f32 %v1319_v59, %v1318_v58 }
 0x344   : > { %v1321_v61 = vrot.slane %v1320_v60, 1 }
 0x346   : > { %v1322_v63 = vadd.f32 %v1321_v61, %v1320_v60 }
 0x348   : > { %v1323_v0 = vadd.f32 %v1322_v63, %v1246_v62 }
 0x34a   : > { %1325 = vst.msk [vmem:[#allocation2] sm:$0x1] %vm1324_vm9, %v1323_v0 }
 0x34b PF: > { %p2217_p2 = scmp.ge.s32.totalorder %s2957_s24, 2 }
 0x34d   : > { %1329 = sbr.rel (%p2217_p2) target bundleno = 1609 (0x649), region = 80 }
 0x352   : > { %v2511_v1 = vld [vmem:[#allocation5 + $0x74] ss:$8 sps:$4 sm:$0xff]   ;;  %v2513_v4 = vld [vmem:[#allocation5 + $0x70] ss:$8 sps:$4 sm:$0xff]   ;;  %v2514_v7 = vld [vmem:[#allocation5 + $0x64] ss:$8 sps:$4 sm:$0xff]  }
 0x353   : > { %1545 = vmatprep.subr.bf16.mxu0 %v2511_v1  ;;  %v2516_v8 = vld [vmem:[#allocation5 + $0x60] ss:$8 sps:$4 sm:$0xff]   ;;  %v2517_v9 = vld [vmem:[#allocation5 + $0x54] ss:$8 sps:$4 sm:$0xff]   ;;  %v2519_v10 = vld [vmem:[#allocation5 + $0x50] ss:$8 sps:$4 sm:$0xff]  }
 0x354   : > { %1546 = vmatpush1.bf16.msra.mxu0 %v2513_v4  ;;  %v2520_v11 = vld [vmem:[#allocation5 + $0x44] ss:$8 sps:$4 sm:$0xff]   ;;  %v2522_v12 = vld [vmem:[#allocation5 + $0x40] ss:$8 sps:$4 sm:$0xff]   ;;  %v2523_v13 = vld [vmem:[#allocation5 + $0x34] ss:$8 sps:$4 sm:$0xff]  }
 0x355   : > { %1547 = vmatprep.subr.bf16.mxu0 %v2514_v7  ;;  %v2525_v15 = vld [vmem:[#allocation5 + $0x30] ss:$8 sps:$4 sm:$0xff]   ;;  %v2526_v16 = vld [vmem:[#allocation5 + $0x24] ss:$8 sps:$4 sm:$0xff]   ;;  %v2528_v17 = vld [vmem:[#allocation5 + $0x20] ss:$8 sps:$4 sm:$0xff]  }
 0x356   : > { %v2529_v14 = vld [vmem:[#allocation5 + $0x14] ss:$8 sps:$4 sm:$0xff]   ;;  %v2531_v18 = vld [vmem:[#allocation5 + $0x10] ss:$8 sps:$4 sm:$0xff]   ;;  %v2532_v19 = vld [vmem:[#allocation5 + $0x4] ss:$8 sps:$4 sm:$0xff]  }
 0x357   : > { %v2561_v20 = vld [vmem:[%s2971_s20 + $0x4] ss:$8 sps:$4 sm:$0xff]   ;;  %v2562_v21 = vld [vmem:[#allocation8 + $0x74] ss:$8 sps:$4 sm:$0xff]   ;;  %v2564_v22 = vld [vmem:[#allocation8 + $0x70] ss:$8 sps:$4 sm:$0xff]  }
 0x358   : > { %1548 = vmatpush1.bf16.msra.mxu0 %v2516_v8  ;;  %1577 = vmatprep.mubr.bf16.mxu0 %v2561_v20  ;;  %v2565_v23 = vld [vmem:[#allocation8 + $0x64] ss:$8 sps:$4 sm:$0xff]   ;;  %v2567_v24 = vld [vmem:[#allocation8 + $0x60] ss:$8 sps:$4 sm:$0xff]   ;;  %v2568_v26 = vld [vmem:[#allocation8 + $0x54] ss:$8 sps:$4 sm:$0xff]  }
 0x359   : > { %1549 = vmatprep.subr.bf16.mxu0 %v2517_v9  ;;  %1797 = vmatprep.subr.bf16.mxu1 %v2562_v21  ;;  %v2534_v25 = vld [vmem:[#allocation5] ss:$8 sps:$4 sm:$0xff]   ;;  %v2535_v27 = vld [vmem:[#allocation5 + $0xf4] ss:$8 sps:$4 sm:$0xff]   ;;  %v2570_v28 = vld [vmem:[#allocation8 + $0x50] ss:$8 sps:$4 sm:$0xff]  }
 0x35a   : > { %1798 = vmatpush1.bf16.msra.mxu1 %v2564_v22  ;;  %v2537_v29 = vld [vmem:[#allocation5 + $0xf0] ss:$8 sps:$4 sm:$0xff]   ;;  %v2571_v30 = vld [vmem:[#allocation8 + $0x44] ss:$8 sps:$4 sm:$0xff]   ;;  %v2573_v32 = vld [vmem:[#allocation8 + $0x40] ss:$8 sps:$4 sm:$0xff]  }
 0x35b   : > { %1799 = vmatprep.subr.bf16.mxu1 %v2565_v23  ;;  %v2538_v31 = vld [vmem:[#allocation5 + $0xe4] ss:$8 sps:$4 sm:$0xff]   ;;  %v2540_v33 = vld [vmem:[#allocation5 + $0xe0] ss:$8 sps:$4 sm:$0xff]   ;;  %v2574_v34 = vld [vmem:[#allocation8 + $0x34] ss:$8 sps:$4 sm:$0xff]  }
 0x35c   : > { %1550 = vmatpush1.bf16.msra.mxu0 %v2519_v10  ;;  %v2541_v35 = vld [vmem:[#allocation5 + $0xd4] ss:$8 sps:$4 sm:$0xff]   ;;  %v2543_v36 = vld [vmem:[#allocation5 + $0xd0] ss:$8 sps:$4 sm:$0xff]   ;;  %v2544_v38 = vld [vmem:[#allocation5 + $0xc4] ss:$8 sps:$4 sm:$0xff]  }
 0x35d   : > { %1551 = vmatprep.subr.bf16.mxu0 %v2520_v11  ;;  %v2576_v37 = vld [vmem:[#allocation8 + $0x30] ss:$8 sps:$4 sm:$0xff]   ;;  %v2577_v39 = vld [vmem:[#allocation8 + $0x24] ss:$8 sps:$4 sm:$0xff]   ;;  %v2579_v40 = vld [vmem:[#allocation8 + $0x20] ss:$8 sps:$4 sm:$0xff]   ;;  %v1365_v11 = vlaneseq }
 0x35e   : > { %1800 = vmatpush1.bf16.msra.mxu1 %v2567_v24  ;;  %v2546_v41 = vld [vmem:[#allocation5 + $0xc0] ss:$8 sps:$4 sm:$0xff]   ;;  %v2580_v42 = vld [vmem:[#allocation8 + $0x14] ss:$8 sps:$4 sm:$0xff]   ;;  %v2582_v44 = vld [vmem:[#allocation8 + $0x10] ss:$8 sps:$4 sm:$0xff]  }
 0x35f   : > { %1801 = vmatprep.subr.bf16.mxu1 %v2568_v26  ;;  %v2547_v43 = vld [vmem:[#allocation5 + $0xb4] ss:$8 sps:$4 sm:$0xff]   ;;  %v2549_v45 = vld [vmem:[#allocation5 + $0xb0] ss:$8 sps:$4 sm:$0xff]   ;;  %v2583_v46 = vld [vmem:[#allocation8 + $0x4] ss:$8 sps:$4 sm:$0xff]  }
 0x360   : > { %1552 = vmatpush1.bf16.msra.mxu0 %v2522_v12  ;;  %v2550_v47 = vld [vmem:[#allocation5 + $0xa4] ss:$8 sps:$4 sm:$0xff]   ;;  %v2585_v48 = vld [vmem:[#allocation8] ss:$8 sps:$4 sm:$0xff]   ;;  %v2586_v50 = vld [vmem:[#allocation8 + $0xf4] ss:$8 sps:$4 sm:$0xff]  }
 0x361   : > { %1553 = vmatprep.subr.bf16.mxu0 %v2523_v13  ;;  %v2552_v49 = vld [vmem:[#allocation5 + $0xa0] ss:$8 sps:$4 sm:$0xff]   ;;  %v2553_v51 = vld [vmem:[#allocation5 + $0x94] ss:$8 sps:$4 sm:$0xff]   ;;  %v2588_v52 = vld [vmem:[#allocation8 + $0xf0] ss:$8 sps:$4 sm:$0xff]  }
 0x362   : > { %1802 = vmatpush1.bf16.msra.mxu1 %v2570_v28  ;;  %v2555_v53 = vld [vmem:[#allocation5 + $0x90] ss:$8 sps:$4 sm:$0xff]   ;;  %v2589_v54 = vld [vmem:[#allocation8 + $0xe4] ss:$8 sps:$4 sm:$0xff]   ;;  %v2591_v56 = vld [vmem:[#allocation8 + $0xe0] ss:$8 sps:$4 sm:$0xff]  }
 0x363   : > { %1803 = vmatprep.subr.bf16.mxu1 %v2571_v30  ;;  %v2556_v55 = vld [vmem:[#allocation5 + $0x84] ss:$8 sps:$4 sm:$0xff]   ;;  %v2558_v57 = vld [vmem:[#allocation5 + $0x80] ss:$8 sps:$4 sm:$0xff]   ;;  %v2592_v58 = vld [vmem:[#allocation8 + $0xd4] ss:$8 sps:$4 sm:$0xff]  }
 0x364   : > { %1554 = vmatpush1.bf16.msra.mxu0 %v2525_v15  ;;  %v2559_v59 = vld [vmem:[%s2971_s20] ss:$8 sps:$4 sm:$0xff]   ;;  %v2594_v60 = vld [vmem:[#allocation8 + $0xd0] ss:$8 sps:$4 sm:$0xff]   ;;  %v1366_v12 = vshrl.u32 %v1365_v11, 7  ;;  %s2284_s20 = sshll.u32 %s2957_s24, 4 }
 0x365   : > { %1555 = vmatprep.subr.bf16.mxu0 %v2526_v16  ;;  %v2595_v61 = vld [vmem:[#allocation8 + $0xc4] ss:$8 sps:$4 sm:$0xff]   ;;  %v2597_v62 = vld [vmem:[#allocation8 + $0xc0] ss:$8 sps:$4 sm:$0xff]   ;;  %v2598_v63 = vld [vmem:[#allocation8 + $0xb4] ss:$8 sps:$4 sm:$0xff]  }
 0x366   : > { %1804 = vmatpush1.bf16.msra.mxu1 %v2573_v32  ;;  %v2600_v0 = vld [vmem:[#allocation8 + $0xb0] ss:$8 sps:$4 sm:$0xff]   ;;  %v2601_v1 = vld [vmem:[#allocation8 + $0xa4] ss:$8 sps:$4 sm:$0xff]   ;;  %v2603_v4 = vld [vmem:[#allocation8 + $0xa0] ss:$8 sps:$4 sm:$0xff]  }
 0x367   : > { %1805 = vmatprep.subr.bf16.mxu1 %v2574_v34  ;;  %v2604_v7 = vld [vmem:[#allocation8 + $0x94] ss:$8 sps:$4 sm:$0xff]   ;;  %v2606_v8 = vld [vmem:[#allocation8 + $0x90] ss:$8 sps:$4 sm:$0xff]   ;;  %v2607_v9 = vld [vmem:[#allocation8 + $0x84] ss:$8 sps:$4 sm:$0xff]  }
 0x368   : > { %1556 = vmatpush1.bf16.msra.mxu0 %v2528_v17  ;;  %v2609_v10 = vld [vmem:[#allocation8 + $0x80] ss:$8 sps:$4 sm:$0xff]   ;;  %v1371_v13 = vsub.s32 1, %v1366_v12  ;;  %v1367_v15 = vsub.s32 0, %v1366_v12  ;;  %s2780_s24 = smov 1   ;;  %vm1943_vm0 = vcmask 7168  }
 0x369   : > { %1557 = vmatprep.subr.bf16.mxu0 %v2529_v14  ;;  %vm1946_vm1 = vcmask 15360   ;;  %vm1957_vm2 = vcmask 8192  }
 0x36a   : > { %1806 = vmatpush1.bf16.msra.mxu1 %v2576_v37  ;;  %v1372_v17 = vrot.slane %v2991_v2, %v1371_v13  ;;  %v1368_v14 = vrot.slane %v2991_v2, %v1367_v15  ;;  %v1630_v32 = vrot.slane %v2996_v3, %v1367_v15  ;;  %v1634_v2 = vrot.slane %v2996_v3, %v1371_v13 }
 0x36b   : > { %1807 = vmatprep.subr.bf16.mxu1 %v2577_v39 }
 0x36c   : > { %1558 = vmatpush1.bf16.msra.mxu0 %v2531_v18 }
 0x36d   : > { %1559 = vmatprep.subr.bf16.mxu0 %v2532_v19 }
 0x36e   : > { %1808 = vmatpush1.bf16.msra.mxu1 %v2579_v40 }
 0x36f   : > { %1809 = vmatprep.subr.bf16.mxu1 %v2580_v42 }
 0x370   : > { %1560 = vmatpush1.bf16.msra.mxu0 %v2534_v25 }
 0x371   : > { %1561 = vmatprep.subr.bf16.mxu0 %v2535_v27 }
 0x372   : > { %1810 = vmatpush1.bf16.msra.mxu1 %v2582_v44 }
 0x373   : > { %1811 = vmatprep.subr.bf16.mxu1 %v2583_v46 }
 0x374   : > { %1562 = vmatpush2.bf16.msra.mxu0 %v2537_v29 }
 0x375   : > { %1563 = vmatprep.subr.bf16.mxu0 %v2538_v31  ;;  %v1851_v31 = vsub.s32 2, %v1366_v12 }
 0x376   : > { %1812 = vmatpush1.bf16.msra.mxu1 %v2585_v48 }
 0x377   : > { %1813 = vmatprep.subr.bf16.mxu1 %v2586_v50  ;;  %v1852_v34 = vrot.slane %v3001_v5, %v1851_v31 }
 0x378   : > { %1564 = vmatpush2.bf16.msra.mxu0 %v2540_v33  ;;  %v1848_v33 = vrot.slane %v3001_v5, %v1367_v15 }
 0x379   : > { %1565 = vmatprep.subr.bf16.mxu0 %v2541_v35 }
 0x37a   : > { %1814 = vmatpush2.bf16.msra.mxu1 %v2588_v52  ;;  %v1858_v40 = vrot.slane %v1848_v33, %v1367_v15 }
 0x37b   : > { %1815 = vmatprep.subr.bf16.mxu1 %v2589_v54  ;;  %v1887_v54 = vadd.s32 8, %v1366_v12 }
 0x37c   : > { %1566 = vmatpush2.bf16.msra.mxu0 %v2543_v36 }
 0x37d   : > { %1567 = vmatprep.subr.bf16.mxu0 %v2544_v38 }
 0x37e   : > { %1816 = vmatpush2.bf16.msra.mxu1 %v2591_v56 }
 0x37f   : > { %1817 = vmatprep.subr.bf16.mxu1 %v2592_v58 }
 0x380   : > { %1568 = vmatpush2.bf16.msra.mxu0 %v2546_v41  ;;  %v1862_v41 = vrot.slane %v1852_v34, %v1367_v15 }
 0x381   : > { %1569 = vmatprep.subr.bf16.mxu0 %v2547_v43 }
 0x382   : > { %1818 = vmatpush2.bf16.msra.mxu1 %v2594_v60 }
 0x383   : > { %1819 = vmatprep.subr.bf16.mxu1 %v2595_v61 }
 0x384   : > { %1570 = vmatpush2.bf16.msra.mxu0 %v2549_v45 }
 0x385   : > { %1571 = vmatprep.subr.bf16.mxu0 %v2550_v47 }
 0x386   : > { %1820 = vmatpush2.bf16.msra.mxu1 %v2597_v62 }
 0x387   : > { %1821 = vmatprep.subr.bf16.mxu1 %v2598_v63 }
 0x388   : > { %1572 = vmatpush2.bf16.msra.mxu0 %v2552_v49 }
 0x389   : > { %1573 = vmatprep.subr.bf16.mxu0 %v2553_v51 }
 0x38a   : > { %1822 = vmatpush2.bf16.msra.mxu1 %v2600_v0  ;;  %v2779_v0 = vmov 0.0  }
 0x38b   : > { %1823 = vmatprep.subr.bf16.mxu1 %v2601_v1 }
 0x38c   : > { %1574 = vmatpush2.bf16.msra.mxu0 %v2555_v53  ;;  %v1877_v53 = vrot.slane %v3003_v6, %v1367_v15 }
 0x38d   : > { %1575 = vmatprep.subr.bf16.mxu0 %v2556_v55  ;;  %v1888_v55 = vstv %s2284_s20 }
 0x38e   : > { %1824 = vmatpush2.bf16.msra.mxu1 %v2603_v4  ;;  %v1889_v58 = vadd.s32 %v1888_v55, %v1366_v12 }
 0x38f   : > { %1825 = vmatprep.subr.bf16.mxu1 %v2604_v7 }
 0x390   : > { %1576 = vmatpush2.bf16.msra.mxu0 %v2558_v57  ;;  %vm1891_vm11 = vcmp.lt.s32.totalorder %v1889_v58, 20 }
 0x392   : > { %1826 = vmatpush2.bf16.msra.mxu1 %v2606_v8 }
 0x393   : > { %1578 = vmatmul.mubr.bf16.vlgmr.msra.gmra.mxu0 %v2559_v59  ;;  %1827 = vmatprep.subr.bf16.mxu1 %v2607_v9  ;;  %v1890_v59 = vadd.s32 %v1888_v55, %v1887_v54 }
 0x395   : > { %vm1892_vm12 = vcmp.lt.s32.totalorder %v1890_v59, 20 }
 0x396   : > { %1828 = vmatpush2.bf16.msra.mxu1 %v2609_v10 }
 0x453   : > { %v1579_v16 = vpop.f32.mrf.mxu0 }
 0x454   : > { %v1580_v22 = vadd.f32 %v1579_v16, %v1368_v14 }
 0x455   : > { %v1581_v18 = vpop.f32.mrf.mxu0 }
 0x456   : > { %v1582_v20 = vadd.f32 %v1581_v18, %v1372_v17  ;;  %v1588_v28 = vmax.f32 %v1580_v22, 0.0 }
 0x457   : > { %v1583_v19 = vpop.f32.mrf.mxu0 }
 0x458   : > { %v1584_v21 = vadd.f32 %v1583_v19, %v1368_v14  ;;  %v1589_v26 = vmax.f32 %v1582_v20, 0.0 }
 0x459   : > { %v1585_v23 = vpop.f32.mrf.mxu0 }
 0x45a   : > { %v1586_v24 = vadd.f32 %v1585_v23, %v1372_v17  ;;  %v1590_v25 = vmax.f32 %v1584_v21, 0.0 }
 0x45c   : > { %v1591_v27 = vmax.f32 %v1586_v24, 0.0  ;;  %v1592_v30 = vpack.c.bf16 %v1590_v25, %v1588_v28  ;;  %v1882_v28 = vld [vmem:[%s2981_s12] sm:$0xff] }
 0x45e   : > { %v1593_v29 = vpack.c.bf16 %v1591_v27, %v1589_v26 }
 0x460   : > { %1829 = vmatprep.mubr.bf16.mxu1 %v1593_v29 }
 0x461   : > { %1830 = vmatmul.mubr.bf16.vlgmr.msra.gmra.mxu1 %v1592_v30 }
 0x521   : > { %v1831_v35 = vpop.f32.mrf.mxu1 }
 0x522   : > { %v1832_v36 = vadd.f32 %v1831_v35, %v1630_v32  ;;  %v1883_v35 = vld [vmem:[%s2981_s12 + $0x8] sm:$0xff] }
 0x523   : > { %v1833_v37 = vpop.f32.mrf.mxu1 }
 0x524   : > { %v1840_v38 = vmax.f32 %v1832_v36, 0.0  ;;  %v1834_v39 = vadd.f32 %v1833_v37, %v1634_v2 }
 0x525   : > { %v1835_v42 = vpop.f32.mrf.mxu1 }
 0x526   : > { %v1841_v43 = vmax.f32 %v1834_v39, 0.0  ;;  %v1836_v44 = vadd.f32 %v1835_v42, %v1630_v32  ;;  %v1863_v48 = vmul.f32 %v1858_v40, %v1840_v38 }
 0x527   : > { %v1837_v45 = vpop.f32.mrf.mxu1 }
 0x528   : > { %v1842_v46 = vmax.f32 %v1836_v44, 0.0  ;;  %v1838_v47 = vadd.f32 %v1837_v45, %v1634_v2  ;;  %v1864_v3 = vmul.f32 %v1862_v41, %v1841_v43 }
 0x52a   : > { %v1843_v49 = vmax.f32 %v1838_v47, 0.0  ;;  %v1867_v50 = vadd.f32 %v1864_v3, %v1863_v48  ;;  %v1865_v51 = vmul.f32 %v1858_v40, %v1842_v46 }
 0x52c   : > { %v1866_v5 = vmul.f32 %v1862_v41, %v1843_v49  ;;  %1868 = vadd.xlane.f32.xlu0 %v1867_v50 }
 0x52e   : > { %v1870_v52 = vadd.f32 %v1866_v5, %v1865_v51  ;;  %v1881_v5 = vld [vmem:[#allocation3] sm:$0x1] }
 0x530   : > { %1871 = vadd.xlane.f32.xlu0 %v1870_v52 }
 0x5b5   : > { %v1869_v56 = vpop.xlane.xlu0 %1868 }
 0x5b6   : > { %v1879_v57 = vadd.f32 %v1877_v53, %v1869_v56 }
 0x5b8   : > { %v1895_v60 = vand.u32 2147483647, %v1879_v57  ;;  %vm1925_vm10 = vcmp.lt.f32.partialorder %v1879_v57, 0.0  ;;  %v1893_v25 = vmax.f32 %v1879_v57, 0.0 }
 0x5b9   : > { %v1872_v61 = vpop.xlane.xlu0 %1871  ;;  %v2285_v1 = vsel %vm1925_vm10, 1.0, %v2779_v0 }
 0x5ba   : > { %v1897_v62 = vsub.f32 0.0, %v1895_v60  ;;  %v1880_v63 = vadd.f32 %v1877_v53, %v1872_v61  ;;  %v1933_v9 = vsel %vm1891_vm11, %v2285_v1, 0.0 }
 0x5bc   : > { %v1899_v4 = vmul.f32 1.442695, %v1897_v62  ;;  %v1896_v7 = vand.u32 2147483647, %v1880_v63  ;;  %vm1926_vm13 = vcmp.lt.f32.partialorder %v1880_v63, 0.0  ;;  %v1894_v2 = vmax.f32 %v1880_v63, 0.0 }
 0x5bd   : > { %v2286_v8 = vsel %vm1926_vm13, 1.0, %v2779_v0 }
 0x5be   : > { %2610 = vpow2.f32 %v1899_v4  ;;  %v1898_v6 = vsub.f32 0.0, %v1896_v7  ;;  %v1934_v10 = vsel %vm1892_vm12, %v2286_v8, 0.0 }
 0x5bf   : > { %v2506_v11 = vpack.i.bf16 %v1934_v10, %v1933_v9 }
 0x5c0   : > { %v1901_v12 = vmul.f32 1.442695, %v1898_v6 }
 0x5c1   : > { %2507 = vrot.lane.b32.xlu1 %v2506_v11, %s2780_s24 }
 0x5c2   : > { %2612 = vpow2.f32 %v1901_v12 }
 0x5cb   : > { %v2611_v13 = vpop.eup %2610 }
 0x5cc   : > { %v1903_v15 = vadd.f32 1.0, %v2611_v13  ;;  %v1906_v14 = vmul.f32 -0.5, %v2611_v13  ;;  %v1909_v20 = vand.u32 2147483647, %v2611_v13 }
 0x5ce   : > { %2614 = vlog2.f32 %v1903_v15  ;;  %v1907_v18 = vadd.f32 1.0, %v1906_v14  ;;  %vm1910_vm14 = vcmp.lt.f32.partialorder %v1909_v20, 0.0004427343 }
 0x5cf   : > { %v2613_v16 = vpop.eup %2612 }
 0x5d0   : > { %v1912_v17 = vadd.f32 1.0, %v2613_v16  ;;  %v1915_v19 = vmul.f32 -0.5, %v2613_v16  ;;  %v1908_v23 = vmul.f32 %v2611_v13, %v1907_v18  ;;  %v1918_v26 = vand.u32 2147483647, %v2613_v16 }
 0x5d2   : > { %2616 = vlog2.f32 %v1912_v17  ;;  %v1916_v24 = vadd.f32 1.0, %v1915_v19  ;;  %vm1919_vm15 = vcmp.lt.f32.partialorder %v1918_v26, 0.0004427343 }
 0x5d4   : > { %v1917_v32 = vmul.f32 %v2613_v16, %v1916_v24 }
 0x5db   : > { %v2615_v21 = vpop.eup %2614 }
 0x5dc   : > { %v1905_v22 = vmul.f32 0.6931472, %v2615_v21 }
 0x5de   : > { %v1911_v27 = vsel %vm1910_vm14, %v1908_v23, %v1905_v22 }
 0x5df   : > { %v2617_v29 = vpop.eup %2616  ;;  %v1921_v30 = vadd.f32 %v1911_v27, %v1893_v25 }
 0x5e0   : > { %v1914_v31 = vmul.f32 0.6931472, %v2617_v29 }
 0x5e1   : > { %v1923_v33 = vmul.f32 %v1921_v30, %v1882_v28 }
 0x5e2   : > { %v1920_v34 = vsel %vm1919_vm15, %v1917_v32, %v1914_v31 }
 0x5e3   : > { %v1922_v36 = vadd.f32 %v1920_v34, %v1894_v2  ;;  %v1931_v37 = vsel %vm1891_vm11, %v1923_v33, 0.0 }
 0x5e5   : > { %v1924_v38 = vmul.f32 %v1922_v36, %v1883_v35 }
 0x5e7   : > { %v1932_v39 = vsel %vm1892_vm12, %v1924_v38, 0.0 }
 0x633   : > { %v2508_v40 = vpop.permute.xlu1 %2507 }
 0x634   : > { %v2510_v41 = vunpack.i.h.bf16 %v2508_v40  ;;  %v2509_v42 = vunpack.i.l.bf16 %v2508_v40 }
 0x636   : > { %v1944_v43 = vsel %vm1943_vm0, %v1931_v37, %v2509_v42  ;;  %v1945_v44 = vsel %vm1943_vm0, %v1932_v39, %v2510_v41 }
 0x637   : > { %v1947_v45 = vsel %vm1946_vm1, %v1944_v43, 0.0  ;;  %v1948_v46 = vsel %vm1946_vm1, %v1945_v44, 0.0 }
 0x638   : > { %v1949_v47 = vadd.f32 %v1948_v46, %v1947_v45 }
 0x63a   : > { %v1950_v48 = vrot.slane %v1949_v47, 4 }
 0x63c   : > { %v1951_v3 = vadd.f32 %v1950_v48, %v1949_v47 }
 0x63e   : > { %v1952_v49 = vrot.slane %v1951_v3, 2 }
 0x640   : > { %v1953_v50 = vadd.f32 %v1952_v49, %v1951_v3 }
 0x642   : > { %v1954_v51 = vrot.slane %v1953_v50, 1 }
 0x644   : > { %v1955_v52 = vadd.f32 %v1954_v51, %v1953_v50 }
 0x646   : > { %v1956_v53 = vadd.f32 %v1955_v52, %v1881_v5 }
 0x648   : > { %1958 = vst.msk [vmem:[#allocation3] sm:$0x1] %vm1957_vm2, %v1956_v53 }
 0x649 PF: > { %p2287_p4 = scmp.ne.s32.totalorder %s2754_s18, 1 }
 0x64a   : > { %s2781_s13 = smov (!%p2287_p4), 2  }
 0x64b   : > { %1962 = sbr.rel (%p2287_p4) target bundleno = 1734 (0x6c6), region = 84 }
 0x650   : > { %v2288_v54 = vld [vmem:[#allocation3] ss:$0 sm:$0xff]  ;;  %v1963_v55 = vld [vmem:[#allocation2] sm:$0x1]  ;;  %vm1973_vm3 = vcmask 15360   ;;  %vm1975_vm4 = vcmask 24576  }
 0x651   : > { %1970 = vrot.lane.b32.xlu0 %v2288_v54, %s2781_s13 }
 0x6c3   : > { %v1971_v56 = vpop.permute.xlu0 %1970 }
 0x6c4   : > { %v1974_v57 = vsel %vm1973_vm3, %v1963_v55, %v1971_v56 }
 0x6c5   : > { %1976 = vst.msk [vmem:[%s2985_s23] sm:$0x1] %vm1975_vm4, %v1974_v57 }
 0x6c6 PF: > { %s2289_s30 = sshll.u32 %s2758_s19, 4  ;;  %s1990_s29 = sshll.u32 %s2985_s23, 4  ;;  %s1991_s29 = int_to_ptr.vmem [resolvable:$true] %s1990_s29 }
 0x6c7   : > { %s1988_s18 = scalar_lea.hbm %s3098_s10, %s2289_s30  ;;  %s3121_s12 = sand.u32 1, %s2746_s16  }
 0x6c8   : > { %s1978_s11 = scalar_lea.sflag [#allocation7], %s3121_s12  ;;  %s2670_s4 = scalar_lea.vmem %s1991_s29, 16 }
 0x6c9   : > { %p2671_p5 = scmp.ne.s32.totalorder %s1991_s29, %s2670_s4  ;;  %s2782_s6 = smov [#allocation10]  }
 0x6ca   : > { %s2674_s17 = sshll.u32 %s2782_s6, 4  ;;  %s2675_s17 = int_to_ptr.vmem [resolvable:$false] %s2674_s17 }
 0x6cb   : > { %p2672_p6 = pnand %p2671_p5, %p2891_p3  ;;  %s2676_s28 = scalar_lea.vmem %s2675_s17, 32 }
 0x6cc   : > { %p2677_p8 = scmp.lt.s32.totalorder %s1991_s29, %s2675_s17  ;;  %p2678_p10 = scmp.lt.s32.totalorder %s2676_s28, %s2670_s4 }
 0x6cd   : > { %p2673_p7 = pneg %p2672_p6 }
 0x6ce   : > { %p2679_p0 = por %p2678_p10, %p2677_p8 }
 0x6d0   : > { %p2680_p1 = pnand %p2679_p0, %p2673_p7 }
 0x6d2   : > { %2683 = shalt.err (!%p2680_p1)
}
 0x6d3   : > { %s2684_s19 = scalar_lea.hbm %s1988_s18, 16  ;;  %s2688_s22 = scalar_lea.hbm %s3098_s10, 32 }
 0x6d4   : > { %p2685_p13 = scmp.ne.s32.totalorder %s1988_s18, %s2684_s19  ;;  %p2689_p2 = scmp.lt.s32.totalorder %s1988_s18, %s3098_s10 }
 0x6d5   : > { %p2690_p4 = scmp.lt.s32.totalorder %s2688_s22, %s2684_s19 }
 0x6d6   : > { %p2686_p11 = pnand %p2685_p13, %p2891_p3 }
 0x6d7   : > { %p2691_p5 = por %p2690_p4, %p2689_p2 }
 0x6d8   : > { %p2687_p12 = pneg %p2686_p11 }
 0x6da   : > { %p2692_p6 = pnand %p2691_p5, %p2687_p12 }
 0x6dc   : > { %2695 = shalt.err (!%p2692_p6)
}
 0x6dd   : > { %2302 = dma.vmem_to_hbm [thread:$0]  (%p2891_p3), %s1991_s29, 16, %s1988_s18, %s1978_s11  }
 0x6de PF: > { %p2319_p7 = scmp.ge.s32.totalorder %s2770_s9, 2  ;;  %s2002_s13 = sand.u32 1, %s2742_s15  }
 0x6df   : > { %s2003_s30 = scalar_lea.sflag [#allocation7], %s2002_s13 }
 0x6e0   : > { %p2312_p8 = pnand %p2319_p7, %p2901_p9 }
 0x6e2   : > { %p2313_p10 = pneg %p2312_p8 }
 0x6e4   : > { %2737 = dma.done.wait (%p2313_p10), %s2003_s30, 16  }
 0x6e5   : > { %2739 = vsyncadd (%p2313_p10), %s2003_s30, 4294967280  ;;  %s27_s9 = sadd.s32 1, %s2770_s9   ;;  %s3123_s21 = sld [smem:[#allocation14_spill]] }
 0x6e6   : > { %p24_p0 = scmp.ge.s32.totalorder %s27_s9, 6   ;;  %s3124_s17 = sld [smem:[#allocation20_spill]] }
 0x6e7   : > { %s3125_s18 = sld [smem:[#allocation15_spill]]  ;;  %s3129_s15 = smov %s2746_s16 }
 0x6e8   : > { %s3126_s19 = sld [smem:[#allocation16_spill]] }
 0x6e9   : > { %s3127_s20 = sld [smem:[#allocation17_spill]] }
 0x6ea   : > { %s3128_s27 = sld [smem:[#allocation18_spill]] }
 0x6eb   : > { %s3130_s16 = smov %s3123_s21 }
 0x6ec   :  { %26 = sbr.rel (!%p24_p0) target bundleno = 10 (0xa), region = 129 }
 0x6f0   : > { %s3131_s21 = smov %s3128_s27 }
 0x6f1   :  { %2007 = vsyncpa [#allocation6], 1 }
 0x6f2   :  { %2009 = vsyncpa [#allocation6 + $0x1], 1 }
 0x6f3   :  { %2010 = vsyncpa [#allocation9], 1 }
 0x6f4   :  { %2011 = vsyncpa [#allocation7], 1 }
 0x6f5   :  { %2013 = vsyncpa [#allocation7 + $0x1], 1 }

</bundles_post_ra>
